<compile_context>
chip_gen: v7x
topology: tpu7x:2x2x1
jax: 0.10.0
libtpu: 0.0.40
codegen_flags: <defaults>
</compile_context>

<pallas_src>
import jax
import jax.numpy as jnp
from jax.experimental import pallas as pl
from jax.experimental.pallas import tpu as pltpu

NUM_FEATS = 8      # dataset.num_node_features
NUM_CLASSES = 3    # dataset.num_classes
EMB = 32           # model_embedding_size
HEADS = 2          # model_attention_heads
EDGE_DIM = 4       # model_edge_dim
DENSE = 64         # model_dense_neurons
N_LAYERS = 2       # model_layers
BN_EPS = 1e-5
NEG_SLOPE = 0.01   # F.leaky_relu default
GAT_SLOPE = 0.2    # GATConv attention leaky_relu slope
BN_SCALE = (1.0 + BN_EPS) ** -0.5   # eval-mode BN with default running stats
MASK_VAL = 1e30


def _vmem():
    return pl.BlockSpec(memory_space=pltpu.MemorySpace.VMEM)


# ----------------------------------------------------------------------------
# Static slab layouts (shared by the host packer and the kernel).
# ----------------------------------------------------------------------------
# graph slab (G_COUNT, N, N)
G_ADJ = 0
G_ADJ_SL = 1
G_EA = 2                     # + d
G_EA_SL = G_EA + EDGE_DIM    # + d
G_COUNT = G_EA_SL + EDGE_DIM

# pooling slab (2, B, N)
P_MEAN = 0     # onehot * 1/count
P_MAXMASK = 1  # 0 on members else -1e30

# w32 slab: every entry is a (32, 32) matrix
W32_GATLIN = 0                       # + h   (node-feature rows zero-padded 8->32)
W32_T1W = W32_GATLIN + HEADS         # + h   (BN scale folded)
_W32_LH0 = W32_T1W + HEADS
W32_LH_STRIDE = 6
W32_WQ, W32_WK, W32_WV, W32_WSKIP, W32_WET, W32_TRW = range(6)
W32_W1 = _W32_LH0 + N_LAYERS * HEADS * W32_LH_STRIDE   # [max->a, max->b, mean->a, mean->b]
W32_W2 = W32_W1 + 4                                    # [a, b]
W32_W3 = W32_W2 + 2                                    # cols zero-padded 3->32
W32_COUNT = W32_W3 + 1

def _w32_lh(l, h):
    return _W32_LH0 + (l * HEADS + h) * W32_LH_STRIDE

# rows slab: every entry is a (1, 32) row
R_ATT_SRC = 0                        # + h
R_ATT_DST = R_ATT_SRC + HEADS        # + h
R_EV = R_ATT_DST + HEADS             # + h  (rank-EDGE_DIM GAT edge factor, lanes 0..3)
R_T1B = R_EV + HEADS                 # gat_bias + transf1_b + BN folded
_R_LH0 = R_T1B + 1
R_LH_STRIDE = 7 + EDGE_DIM
R_BQ, R_BK, R_BV, R_BSKIP, R_WB1, R_WB2, R_WB3 = range(7)
R_WE = 7                             # + d (rows of lin_edge weight, per head)
R_TRB = _R_LH0 + N_LAYERS * HEADS * R_LH_STRIDE        # + l (BN folded)
R_B1A = R_TRB + N_LAYERS
R_B1B = R_B1A + 1
R_B2 = R_B1B + 1
R_B3 = R_B2 + 1                      # lanes 0..2 used
R_COUNT = R_B3 + 1

def _row_lh(l, h):
    return _R_LH0 + (l * HEADS + h) * R_LH_STRIDE


# ----------------------------------------------------------------------------
# Single fused kernel: GATConv -> transf1+bn1 -> N_LAYERS x (TransformerConv ->
# transf+bn -> global max/mean pool) -> layer-softmax mix -> 3-layer MLP head.
# ----------------------------------------------------------------------------
def _pkgnn_fused_kernel(x_ref, graph_ref, pool_ref, w32_ref, rows_ref, o_ref):
    f32 = jnp.float32

    def mat(k):
        return w32_ref[k]                 # (32, 32)

    def row(k):
        return rows_ref[k]                # (1, 32)

    def dot(a, b):
        return jnp.dot(a, b, preferred_element_type=f32)

    def leaky(v, slope=NEG_SLOPE):
        return jnp.where(v > 0, v, slope * v)

    def masked_softmax(logits, add_bias, mul_mask):
        # additive bias (0 / -1e30); final *mul_mask keeps rows with no incoming
        # edges at exactly zero (matches scatter-softmax semantics).
        logits = logits + add_bias
        m = jnp.max(logits, axis=-1, keepdims=True)
        p = jnp.exp(logits - m)
        denom = jnp.maximum(jnp.sum(p, axis=-1, keepdims=True), 1e-20)
        return p * pl.reciprocal(denom, approx=True) * mul_mask

    x = x_ref[...]                        # (N, 32) zero-padded node features
    adj = graph_ref[G_ADJ]                # (N, N) 0/1, no self loops
    adj_sl = graph_ref[G_ADJ_SL]          # (N, N) 0/1, with self loops
    bias = (adj - 1.0) * MASK_VAL         # additive masks built in-kernel (no DMA)
    bias_sl = (adj_sl - 1.0) * MASK_VAL
    ea = [graph_ref[G_EA + d] for d in range(EDGE_DIM)]        # 4 x (N, N)
    ea_sl = [graph_ref[G_EA_SL + d] for d in range(EDGE_DIM)]  # 4 x (N, N)
    pool_mean = pool_ref[P_MEAN]          # (B, N)
    pool_mask = pool_ref[P_MAXMASK]       # (B, N)

    # ---------------- GATConv (edge_dim, add_self_loops) + folded transf1/bn1 ----
    acc = None
    for h in range(HEADS):
        xw = dot(x, mat(W32_GATLIN + h))                                     # (N, 32)
        a_dst = jnp.sum(xw * row(R_ATT_DST + h), axis=-1, keepdims=True)     # (N, 1)
        a_src = dot(row(R_ATT_SRC + h), xw.T)                                # (1, N)
        ev = row(R_EV + h)                                                   # (1, 32)
        a_edge = ea_sl[0] * ev[0:1, 0:1]
        for d in range(1, EDGE_DIM):
            a_edge = a_edge + ea_sl[d] * ev[0:1, d:d + 1]
        alpha = masked_softmax(leaky(a_dst + a_src + a_edge, GAT_SLOPE),
                               bias_sl, adj_sl)
        head = dot(alpha, xw)                                                # (N, 32)
        c = dot(head, mat(W32_T1W + h))                                      # per-head partial sum
        acc = c if acc is None else acc + c
    xcur = leaky(acc + row(R_T1B))       # leaky_relu(transf1(.)) ; BN scale folded

    # ---------------- TransformerConv stack ----------------
    gmax, gmean = [], []
    for l in range(N_LAYERS):
        skips, msgs = [], []
        b_acc = None
        for h in range(HEADS):
            wb = _w32_lh(l, h)
            rb = _row_lh(l, h)
            q = dot(xcur, mat(wb + W32_WQ)) + row(rb + R_BQ)     # 1/sqrt(d) folded
            k = dot(xcur, mat(wb + W32_WK)) + row(rb + R_BK)
            v = dot(xcur, mat(wb + W32_WV)) + row(rb + R_BV)
            skip = dot(xcur, mat(wb + W32_WSKIP)) + row(rb + R_BSKIP)
            qe = dot(q, mat(wb + W32_WET))                       # (N, 32), lanes 0..3 used
            logits = dot(q, k.T)                                 # (N, N)
            for d in range(EDGE_DIM):
                logits = logits + ea[d] * qe[:, d:d + 1]
            alpha = masked_softmax(logits, bias, adj)
            msg = dot(alpha, v)                                  # (N, 32)
            for d in range(EDGE_DIM):
                e_agg = jnp.sum(alpha * ea[d], axis=-1, keepdims=True)   # (N, 1)
                msg = msg + e_agg * row(rb + R_WE + d)
            bt = (jnp.sum(skip * row(rb + R_WB1), axis=-1, keepdims=True)
                  + jnp.sum(msg * row(rb + R_WB2), axis=-1, keepdims=True)
                  + jnp.sum((skip - msg) * row(rb + R_WB3), axis=-1, keepdims=True))
            b_acc = bt if b_acc is None else b_acc + bt
            skips.append(skip)
            msgs.append(msg)

        beta = pl.reciprocal(1.0 + jnp.exp(-b_acc), approx=True)            # sigmoid, (N, 1)
        acc = None
        for h in range(HEADS):
            comb = beta * skips[h] + (1.0 - beta) * msgs[h]
            c = dot(comb, mat(_w32_lh(l, h) + W32_TRW))
            acc = c if acc is None else acc + c
        xcur = leaky(acc + row(R_TRB + l))                       # transf + BN (folded)

        # cat([global_max_pool, global_mean_pool]) kept as two 32-wide streams
        gmean.append(dot(pool_mean, xcur))                                        # (B, 32)
        gmax.append(jnp.max(xcur[None, :, :] + pool_mask[:, :, None], axis=1))    # (B, 32)

    # softmax over the layer axis of the stacked global representations (per
    # feature, so the max / mean streams stay independent; no concat needed).
    def layer_mix(reps):
        m = reps[0]
        for g in reps[1:]:
            m = jnp.maximum(m, g)
        exps = [jnp.exp(g - m) for g in reps]
        den = exps[0]
        for e in exps[1:]:
            den = den + e
        out = exps[0] * reps[0]
        for e, g in zip(exps[1:], reps[1:]):
            out = out + e * g
        return out * pl.reciprocal(den, approx=True)

    xg_max = layer_mix(gmax)      # (B, 32): gmp half of torch.cat([gmp, gap])
    xg_mean = layer_mix(gmean)    # (B, 32): gap half

    # feature_dimensions == 0 -> additional-feature / concat_bn branch skipped
    # (isolate='graph', feature_attention_flag=False, concat_norm_flag=False).
    # classification head; F.dropout(p=0.2, training=False) -> identity.
    # 64-wide layers handled as two 32-wide blocks (no lane-unaligned slices).
    h1a = leaky(dot(xg_max, mat(W32_W1 + 0)) + dot(xg_mean, mat(W32_W1 + 2)) + row(R_B1A))
    h1b = leaky(dot(xg_max, mat(W32_W1 + 1)) + dot(xg_mean, mat(W32_W1 + 3)) + row(R_B1B))
    h2 = leaky(dot(h1a, mat(W32_W2 + 0)) + dot(h1b, mat(W32_W2 + 1)) + row(R_B2))
    out = dot(h2, mat(W32_W3)) + row(R_B3)                        # (B, 32), lanes 0..2 used
    o_ref[...] = out[:, :NUM_CLASSES]


# ----------------------------------------------------------------------------
# Parameters (same structure as before)
# ----------------------------------------------------------------------------
def init_params(key):
    ks = iter(jax.random.split(key, 128))
    w = lambda shape, s=0.1: jax.random.normal(next(ks), shape, jnp.float32) * s

    params = {}
    params["gat"] = dict(
        lin_w=w((NUM_FEATS, HEADS * EMB)),
        lin_edge_w=w((EDGE_DIM, HEADS * EMB)),
        att_src=w((HEADS, EMB)),
        att_dst=w((HEADS, EMB)),
        att_edge=w((HEADS, EMB)),
        bias=w((HEADS * EMB,), 0.05),
    )
    params["transf1_w"] = w((HEADS * EMB, EMB))
    params["transf1_b"] = w((EMB,), 0.05)

    layers = []
    for _ in range(N_LAYERS):
        layers.append(dict(
            wq=w((EMB, HEADS * EMB)), bq=w((HEADS * EMB,), 0.05),
            wk=w((EMB, HEADS * EMB)), bk=w((HEADS * EMB,), 0.05),
            wv=w((EMB, HEADS * EMB)), bv=w((HEADS * EMB,), 0.05),
            we=w((EDGE_DIM, HEADS * EMB)),
            w_skip=w((EMB, HEADS * EMB)), b_skip=w((HEADS * EMB,), 0.05),
            w_beta1=w((1, HEADS * EMB)),
            w_beta2=w((1, HEADS * EMB)),
            w_beta3=w((1, HEADS * EMB)),
            transf_w=w((HEADS * EMB, EMB)), transf_b=w((EMB,), 0.05),
        ))
    params["layers"] = layers

    params["linear1_w"] = w((2 * EMB, DENSE))
    params["linear1_b"] = w((DENSE,), 0.05)
    params["linear2_w"] = w((DENSE, DENSE // 2))
    params["linear2_b"] = w((DENSE // 2,), 0.05)
    params["linear3_w"] = w((DENSE // 2, NUM_CLASSES))
    params["linear3_b"] = w((NUM_CLASSES,), 0.05)
    return params


# ----------------------------------------------------------------------------
# Host-side one-time weight packing / constant folding.
# ----------------------------------------------------------------------------
def _pack_weights(params):
    f32 = jnp.float32
    attn_scale = 1.0 / (EMB ** 0.5)
    g = params["gat"]

    def pad32x32(m):
        return jnp.zeros((32, 32), f32).at[:m.shape[0], :m.shape[1]].set(m)

    def padrow(v):
        return jnp.zeros((32,), f32).at[:v.shape[0]].set(v)

    w32, rows = [], []

    # --- matrices ---
    for h in range(HEADS):                                        # GAT lin per head
        w32.append(pad32x32(g["lin_w"][:, h * EMB:(h + 1) * EMB]))
    for h in range(HEADS):                                        # transf1 per head (BN folded)
        w32.append(BN_SCALE * params["transf1_w"][h * EMB:(h + 1) * EMB, :])
    for l in range(N_LAYERS):
        p = params["layers"][l]
        for h in range(HEADS):
            sl = slice(h * EMB, (h + 1) * EMB)
            w32.append(attn_scale * p["wq"][:, sl])               # 1/sqrt(d) folded
            w32.append(p["wk"][:, sl])
            w32.append(p["wv"][:, sl])
            w32.append(p["w_skip"][:, sl])
            w32.append(pad32x32(p["we"][:, sl].T))                # (32, 4) -> (32, 32)
            w32.append(BN_SCALE * p["transf_w"][sl, :])           # BN folded
    W1 = params["linear1_w"]                                      # (64, 64): [gmp; gap] rows
    w32.append(W1[0:EMB, 0:EMB]); w32.append(W1[0:EMB, EMB:2 * EMB])
    w32.append(W1[EMB:2 * EMB, 0:EMB]); w32.append(W1[EMB:2 * EMB, EMB:2 * EMB])
    W2 = params["linear2_w"]                                      # (64, 32)
    w32.append(W2[0:EMB, :]); w32.append(W2[EMB:2 * EMB, :])
    w32.append(pad32x32(params["linear3_w"]))                     # (32, 3) -> (32, 32)
    assert len(w32) == W32_COUNT
    w32 = jnp.stack(w32)                                          # (35, 32, 32)

    # --- rows ---
    for h in range(HEADS):
        rows.append(g["att_src"][h])
    for h in range(HEADS):
        rows.append(g["att_dst"][h])
    for h in range(HEADS):                                        # rank-EDGE_DIM GAT edge factor
        rows.append(padrow(g["lin_edge_w"][:, h * EMB:(h + 1) * EMB] @ g["att_edge"][h]))
    rows.append(BN_SCALE * (g["bias"] @ params["transf1_w"] + params["transf1_b"]))
    for l in range(N_LAYERS):
        p = params["layers"][l]
        for h in range(HEADS):
            sl = slice(h * EMB, (h + 1) * EMB)
            rows.append(attn_scale * p["bq"][sl])
            rows.append(p["bk"][sl])
            rows.append(p["bv"][sl])
            rows.append(p["b_skip"][sl])
            rows.append(p["w_beta1"][0, sl])
            rows.append(p["w_beta2"][0, sl])
            rows.append(p["w_beta3"][0, sl])
            for d in range(EDGE_DIM):
                rows.append(p["we"][d, sl])
    for l in range(N_LAYERS):
        rows.append(BN_SCALE * params["layers"][l]["transf_b"])
    rows.append(params["linear1_b"][0:EMB])
    rows.append(params["linear1_b"][EMB:2 * EMB])
    rows.append(params["linear2_b"])
    rows.append(padrow(params["linear3_b"]))
    assert len(rows) == R_COUNT
    rows = jnp.stack(rows)[:, None, :]                            # (57, 1, 32)
    return w32, rows


# ----------------------------------------------------------------------------
# Forward (host side builds the dense adjacency / edge slabs and the packed
# weight slabs once; one pallas_call does the whole forward in VMEM).
# ----------------------------------------------------------------------------
def pkgnn_forward(params, x, edge_index, edge_attr, batch, num_graphs):
    n = x.shape[0]
    src, dst = edge_index[0], edge_index[1]

    adj = jnp.zeros((n, n), jnp.float32).at[dst, src].set(1.0)
    ea_dense = jnp.zeros((n, n, EDGE_DIM), jnp.float32).at[dst, src].set(edge_attr)

    # GATConv add_self_loops=True with self-loop edge_attr = mean(edge_attr)
    eye = jnp.eye(n, dtype=jnp.float32)
    adj_sl = jnp.maximum(adj, eye)
    mean_ea = jnp.mean(edge_attr, axis=0)
    ea_sl = jnp.where(eye[:, :, None] > 0, mean_ea[None, None, :], ea_dense)

    # one (10, N, N) lane-major graph slab: [adj, adj_sl, ea(4), ea_sl(4)]
    graph = jnp.concatenate(
        [adj[None], adj_sl[None],
         jnp.transpose(ea_dense, (2, 0, 1)),
         jnp.transpose(ea_sl, (2, 0, 1))], axis=0)

    onehot = (batch[None, :] == jnp.arange(num_graphs)[:, None]).astype(jnp.float32)
    inv_count = 1.0 / jnp.maximum(jnp.sum(onehot, axis=1, keepdims=True), 1.0)
    pool = jnp.stack([onehot * inv_count, (onehot - 1.0) * MASK_VAL], axis=0)  # (2, B, N)

    x_pad = jnp.zeros((n, EMB), jnp.float32).at[:, :NUM_FEATS].set(x)

    w32, rows = _pack_weights(params)

    # advisory cost estimate so XLA schedules the surrounding HLO around the call
    mm32 = 2 * n * EMB * EMB
    attnm = 2 * n * n * EMB
    flops = HEADS * ((2 * mm32 + 2 * attnm + 14 * n * n)
                     + N_LAYERS * (6 * mm32 + 2 * attnm + (10 + 6 * EDGE_DIM) * n * n)) \
        + 10 * num_graphs * EMB * EMB
    transcendentals = HEADS * (1 + N_LAYERS) * n * n + N_LAYERS * n + 4 * num_graphs * EMB
    bytes_accessed = 4 * (x_pad.size + graph.size + pool.size + w32.size + rows.size
                          + num_graphs * NUM_CLASSES)

    return pl.pallas_call(
        _pkgnn_fused_kernel,
        out_shape=jax.ShapeDtypeStruct((num_graphs, NUM_CLASSES), jnp.float32),
        in_specs=[_vmem()] * 5,
        out_specs=_vmem(),
        cost_estimate=pl.CostEstimate(flops=int(flops),
                                      transcendentals=int(transcendentals),
                                      bytes_accessed=int(bytes_accessed)),
    )(x_pad, graph, pool, w32, rows)


# ----------------------------------------------------------------------------
if __name__ == "__main__":
    key = jax.random.PRNGKey(0)
    kp, kx, ke = jax.random.split(key, 3)
    params = init_params(kp)

    B = 2                      # graphs in the batch
    nodes_per_graph = 8
    N = B * nodes_per_graph    # 16 nodes

    x = jax.random.normal(kx, (N, NUM_FEATS), jnp.float32)

    # bidirectional ring inside each graph (ensures every node has incoming edges)
    srcs, dsts = [], []
    for gidx in range(B):
        base = gidx * nodes_per_graph
        for i in range(nodes_per_graph):
            a = base + i
            b = base + (i + 1) % nodes_per_graph
            srcs += [a, b]
            dsts += [b, a]
    edge_index = jnp.array([srcs, dsts], dtype=jnp.int32)     # (2, 32)
    edge_attr = jax.random.normal(ke, (edge_index.shape[1], EDGE_DIM), jnp.float32)
    batch = jnp.array([0] * nodes_per_graph + [1] * nodes_per_graph, dtype=jnp.int32)

    forward = jax.jit(pkgnn_forward, static_argnames=("num_graphs",))
    out = forward(params, x, edge_index, edge_attr, batch, num_graphs=B)
    out = jax.block_until_ready(out)
    assert out.shape == (B, NUM_CLASSES), out.shape
    assert bool(jnp.all(jnp.isfinite(out)))
    print("KERNEL_OK")
</pallas_src>

<mosaic_0001>
module attributes {stable_mosaic.version = 11 : i64} {
  func.func @_pkgnn_fused_kernel(%arg0: memref<16x32xf32, #tpu.memory_space<vmem>>, %arg1: memref<10x16x16xf32, #tpu.memory_space<vmem>>, %arg2: memref<2x2x16xf32, #tpu.memory_space<vmem>>, %arg3: memref<35x32x32xf32, #tpu.memory_space<vmem>>, %arg4: memref<57x1x32xf32, #tpu.memory_space<vmem>>, %arg5: memref<2x3xf32, #tpu.memory_space<vmem>>) attributes {dimension_semantics = [], scalar_prefetch = 0 : i64, scratch_operands = 0 : i64, tpu.core_type = #tpu.core_type<tc>} {
    %c0 = arith.constant 0 : index
    %c0_0 = arith.constant 0 : index
    %0 = vector.load %arg0[%c0, %c0_0] : memref<16x32xf32, #tpu.memory_space<vmem>>, vector<16x32xf32>
    %c0_1 = arith.constant 0 : index
    %c0_2 = arith.constant 0 : index
    %c0_3 = arith.constant 0 : index
    %1 = vector.load %arg1[%c0_1, %c0_2, %c0_3] : memref<10x16x16xf32, #tpu.memory_space<vmem>>, vector<1x16x16xf32>
    %2 = vector.shape_cast %1 : vector<1x16x16xf32> to vector<16x16xf32>
    %c1 = arith.constant 1 : index
    %c0_4 = arith.constant 0 : index
    %c0_5 = arith.constant 0 : index
    %3 = vector.load %arg1[%c1, %c0_4, %c0_5] : memref<10x16x16xf32, #tpu.memory_space<vmem>>, vector<1x16x16xf32>
    %4 = vector.shape_cast %3 : vector<1x16x16xf32> to vector<16x16xf32>
    %cst = arith.constant 1.000000e+00 : f32
    %5 = vector.broadcast %cst : f32 to vector<16x16xf32>
    %6 = arith.subf %2, %5 : vector<16x16xf32>
    %cst_6 = arith.constant 1.000000e+30 : f32
    %7 = vector.broadcast %cst_6 : f32 to vector<16x16xf32>
    %8 = arith.mulf %6, %7 : vector<16x16xf32>
    %cst_7 = arith.constant 1.000000e+00 : f32
    %9 = vector.broadcast %cst_7 : f32 to vector<16x16xf32>
    %10 = arith.subf %4, %9 : vector<16x16xf32>
    %cst_8 = arith.constant 1.000000e+30 : f32
    %11 = vector.broadcast %cst_8 : f32 to vector<16x16xf32>
    %12 = arith.mulf %10, %11 : vector<16x16xf32>
    %c2 = arith.constant 2 : index
    %c0_9 = arith.constant 0 : index
    %c0_10 = arith.constant 0 : index
    %13 = vector.load %arg1[%c2, %c0_9, %c0_10] : memref<10x16x16xf32, #tpu.memory_space<vmem>>, vector<1x16x16xf32>
    %14 = vector.shape_cast %13 : vector<1x16x16xf32> to vector<16x16xf32>
    %c3 = arith.constant 3 : index
    %c0_11 = arith.constant 0 : index
    %c0_12 = arith.constant 0 : index
    %15 = vector.load %arg1[%c3, %c0_11, %c0_12] : memref<10x16x16xf32, #tpu.memory_space<vmem>>, vector<1x16x16xf32>
    %16 = vector.shape_cast %15 : vector<1x16x16xf32> to vector<16x16xf32>
    %c4 = arith.constant 4 : index
    %c0_13 = arith.constant 0 : index
    %c0_14 = arith.constant 0 : index
    %17 = vector.load %arg1[%c4, %c0_13, %c0_14] : memref<10x16x16xf32, #tpu.memory_space<vmem>>, vector<1x16x16xf32>
    %18 = vector.shape_cast %17 : vector<1x16x16xf32> to vector<16x16xf32>
    %c5 = arith.constant 5 : index
    %c0_15 = arith.constant 0 : index
    %c0_16 = arith.constant 0 : index
    %19 = vector.load %arg1[%c5, %c0_15, %c0_16] : memref<10x16x16xf32, #tpu.memory_space<vmem>>, vector<1x16x16xf32>
    %20 = vector.shape_cast %19 : vector<1x16x16xf32> to vector<16x16xf32>
    %c6 = arith.constant 6 : index
    %c0_17 = arith.constant 0 : index
    %c0_18 = arith.constant 0 : index
    %21 = vector.load %arg1[%c6, %c0_17, %c0_18] : memref<10x16x16xf32, #tpu.memory_space<vmem>>, vector<1x16x16xf32>
    %22 = vector.shape_cast %21 : vector<1x16x16xf32> to vector<16x16xf32>
    %c7 = arith.constant 7 : index
    %c0_19 = arith.constant 0 : index
    %c0_20 = arith.constant 0 : index
    %23 = vector.load %arg1[%c7, %c0_19, %c0_20] : memref<10x16x16xf32, #tpu.memory_space<vmem>>, vector<1x16x16xf32>
    %24 = vector.shape_cast %23 : vector<1x16x16xf32> to vector<16x16xf32>
    %c8 = arith.constant 8 : index
    %c0_21 = arith.constant 0 : index
    %c0_22 = arith.constant 0 : index
    %25 = vector.load %arg1[%c8, %c0_21, %c0_22] : memref<10x16x16xf32, #tpu.memory_space<vmem>>, vector<1x16x16xf32>
    %26 = vector.shape_cast %25 : vector<1x16x16xf32> to vector<16x16xf32>
    %c9 = arith.constant 9 : index
    %c0_23 = arith.constant 0 : index
    %c0_24 = arith.constant 0 : index
    %27 = vector.load %arg1[%c9, %c0_23, %c0_24] : memref<10x16x16xf32, #tpu.memory_space<vmem>>, vector<1x16x16xf32>
    %28 = vector.shape_cast %27 : vector<1x16x16xf32> to vector<16x16xf32>
    %c0_25 = arith.constant 0 : index
    %c0_26 = arith.constant 0 : index
    %c0_27 = arith.constant 0 : index
    %29 = vector.load %arg2[%c0_25, %c0_26, %c0_27] : memref<2x2x16xf32, #tpu.memory_space<vmem>>, vector<1x2x16xf32>
    %30 = vector.shape_cast %29 : vector<1x2x16xf32> to vector<2x16xf32>
    %c1_28 = arith.constant 1 : index
    %c0_29 = arith.constant 0 : index
    %c0_30 = arith.constant 0 : index
    %31 = vector.load %arg2[%c1_28, %c0_29, %c0_30] : memref<2x2x16xf32, #tpu.memory_space<vmem>>, vector<1x2x16xf32>
    %32 = vector.shape_cast %31 : vector<1x2x16xf32> to vector<2x16xf32>
    %c0_31 = arith.constant 0 : index
    %c0_32 = arith.constant 0 : index
    %c0_33 = arith.constant 0 : index
    %33 = vector.load %arg3[%c0_31, %c0_32, %c0_33] : memref<35x32x32xf32, #tpu.memory_space<vmem>>, vector<1x32x32xf32>
    %34 = vector.shape_cast %33 : vector<1x32x32xf32> to vector<32x32xf32>
    %cst_34 = arith.constant dense<0.000000e+00> : vector<16x32xf32>
    %35 = tpu.matmul %0, %34, %cst_34 {dimension_numbers = #tpu.dot_dimension_numbers<[1], [0], [0], [1], [0, 0, 1, 1], [], []>} : vector<16x32xf32>, vector<32x32xf32>, vector<16x32xf32> -> vector<16x32xf32>
    %c2_35 = arith.constant 2 : index
    %c0_36 = arith.constant 0 : index
    %c0_37 = arith.constant 0 : index
    %36 = vector.load %arg4[%c2_35, %c0_36, %c0_37] : memref<57x1x32xf32, #tpu.memory_space<vmem>>, vector<1x1x32xf32>
    %37 = vector.shape_cast %36 : vector<1x1x32xf32> to vector<1x32xf32>
    %38 = vector.broadcast %37 : vector<1x32xf32> to vector<16x32xf32>
    %39 = arith.mulf %35, %38 : vector<16x32xf32>
    %cst_38 = arith.constant dense<0.000000e+00> : vector<16xf32>
    %40 = vector.multi_reduction <add>, %39, %cst_38 [1] : vector<16x32xf32> to vector<16xf32>
    %41 = vector.shape_cast %40 : vector<16xf32> to vector<16x1xf32>
    %c0_39 = arith.constant 0 : index
    %c0_40 = arith.constant 0 : index
    %c0_41 = arith.constant 0 : index
    %42 = vector.load %arg4[%c0_39, %c0_40, %c0_41] : memref<57x1x32xf32, #tpu.memory_space<vmem>>, vector<1x1x32xf32>
    %43 = vector.shape_cast %42 : vector<1x1x32xf32> to vector<1x32xf32>
    %44 = tpu.transpose %35, [1, 0] : vector<16x32xf32> -> vector<32x16xf32>
    %cst_42 = arith.constant dense<0.000000e+00> : vector<1x16xf32>
    %45 = tpu.matmul %43, %44, %cst_42 {dimension_numbers = #tpu.dot_dimension_numbers<[1], [0], [0], [1], [0, 0, 1, 1], [], []>} : vector<1x32xf32>, vector<32x16xf32>, vector<1x16xf32> -> vector<1x16xf32>
    %c4_43 = arith.constant 4 : index
    %c0_44 = arith.constant 0 : index
    %c0_45 = arith.constant 0 : index
    %46 = vector.load %arg4[%c4_43, %c0_44, %c0_45] : memref<57x1x32xf32, #tpu.memory_space<vmem>>, vector<1x1x32xf32>
    %47 = vector.shape_cast %46 : vector<1x1x32xf32> to vector<1x32xf32>
    %48 = vector.extract_strided_slice %47 {offsets = [0, 0], sizes = [1, 1], strides = [1, 1]} : vector<1x32xf32> to vector<1x1xf32>
    %49 = vector.broadcast %48 : vector<1x1xf32> to vector<16x16xf32>
    %50 = arith.mulf %22, %49 : vector<16x16xf32>
    %51 = vector.extract_strided_slice %47 {offsets = [0, 1], sizes = [1, 1], strides = [1, 1]} : vector<1x32xf32> to vector<1x1xf32>
    %52 = vector.broadcast %51 : vector<1x1xf32> to vector<16x16xf32>
    %53 = arith.mulf %24, %52 : vector<16x16xf32>
    %54 = arith.addf %50, %53 : vector<16x16xf32>
    %55 = vector.extract_strided_slice %47 {offsets = [0, 2], sizes = [1, 1], strides = [1, 1]} : vector<1x32xf32> to vector<1x1xf32>
    %56 = vector.broadcast %55 : vector<1x1xf32> to vector<16x16xf32>
    %57 = arith.mulf %26, %56 : vector<16x16xf32>
    %58 = arith.addf %54, %57 : vector<16x16xf32>
    %59 = vector.extract_strided_slice %47 {offsets = [0, 3], sizes = [1, 1], strides = [1, 1]} : vector<1x32xf32> to vector<1x1xf32>
    %60 = vector.broadcast %59 : vector<1x1xf32> to vector<16x16xf32>
    %61 = arith.mulf %28, %60 : vector<16x16xf32>
    %62 = arith.addf %58, %61 : vector<16x16xf32>
    %63 = vector.broadcast %41 : vector<16x1xf32> to vector<16x16xf32>
    %64 = vector.broadcast %45 : vector<1x16xf32> to vector<16x16xf32>
    %65 = arith.addf %63, %64 : vector<16x16xf32>
    %66 = arith.addf %65, %62 : vector<16x16xf32>
    %cst_46 = arith.constant 0.000000e+00 : f32
    %67 = vector.broadcast %cst_46 : f32 to vector<16x16xf32>
    %68 = arith.cmpf ogt, %66, %67 : vector<16x16xf32>
    %cst_47 = arith.constant 2.000000e-01 : f32
    %69 = vector.broadcast %cst_47 : f32 to vector<16x16xf32>
    %70 = arith.mulf %69, %66 : vector<16x16xf32>
    %71 = arith.select %68, %66, %70 : vector<16x16xi1>, vector<16x16xf32>
    %72 = arith.addf %71, %12 : vector<16x16xf32>
    %cst_48 = arith.constant dense<0xFF800000> : vector<16xf32>
    %73 = vector.multi_reduction <maximumf>, %72, %cst_48 [1] : vector<16x16xf32> to vector<16xf32>
    %74 = vector.shape_cast %73 : vector<16xf32> to vector<16x1xf32>
    %75 = vector.broadcast %74 : vector<16x1xf32> to vector<16x16xf32>
    %76 = arith.subf %72, %75 : vector<16x16xf32>
    %77 = math.exp %76 : vector<16x16xf32>
    %cst_49 = arith.constant dense<0.000000e+00> : vector<16xf32>
    %78 = vector.multi_reduction <add>, %77, %cst_49 [1] : vector<16x16xf32> to vector<16xf32>
    %79 = vector.shape_cast %78 : vector<16xf32> to vector<16x1xf32>
    %cst_50 = arith.constant 9.99999968E-21 : f32
    %80 = vector.broadcast %cst_50 : f32 to vector<16x1xf32>
    %81 = arith.maximumf %79, %80 : vector<16x1xf32>
    %82 = tpu.reciprocal %81 {approx = true} : vector<16x1xf32> -> vector<16x1xf32>
    %83 = vector.broadcast %82 : vector<16x1xf32> to vector<16x16xf32>
    %84 = arith.mulf %77, %83 : vector<16x16xf32>
    %85 = arith.mulf %84, %4 : vector<16x16xf32>
    %cst_51 = arith.constant dense<0.000000e+00> : vector<16x32xf32>
    %86 = tpu.matmul %85, %35, %cst_51 {dimension_numbers = #tpu.dot_dimension_numbers<[1], [0], [0], [1], [0, 0, 1, 1], [], []>} : vector<16x16xf32>, vector<16x32xf32>, vector<16x32xf32> -> vector<16x32xf32>
    %c2_52 = arith.constant 2 : index
    %c0_53 = arith.constant 0 : index
    %c0_54 = arith.constant 0 : index
    %87 = vector.load %arg3[%c2_52, %c0_53, %c0_54] : memref<35x32x32xf32, #tpu.memory_space<vmem>>, vector<1x32x32xf32>
    %88 = vector.shape_cast %87 : vector<1x32x32xf32> to vector<32x32xf32>
    %cst_55 = arith.constant dense<0.000000e+00> : vector<16x32xf32>
    %89 = tpu.matmul %86, %88, %cst_55 {dimension_numbers = #tpu.dot_dimension_numbers<[1], [0], [0], [1], [0, 0, 1, 1], [], []>} : vector<16x32xf32>, vector<32x32xf32>, vector<16x32xf32> -> vector<16x32xf32>
    %c1_56 = arith.constant 1 : index
    %c0_57 = arith.constant 0 : index
    %c0_58 = arith.constant 0 : index
    %90 = vector.load %arg3[%c1_56, %c0_57, %c0_58] : memref<35x32x32xf32, #tpu.memory_space<vmem>>, vector<1x32x32xf32>
    %91 = vector.shape_cast %90 : vector<1x32x32xf32> to vector<32x32xf32>
    %cst_59 = arith.constant dense<0.000000e+00> : vector<16x32xf32>
    %92 = tpu.matmul %0, %91, %cst_59 {dimension_numbers = #tpu.dot_dimension_numbers<[1], [0], [0], [1], [0, 0, 1, 1], [], []>} : vector<16x32xf32>, vector<32x32xf32>, vector<16x32xf32> -> vector<16x32xf32>
    %c3_60 = arith.constant 3 : index
    %c0_61 = arith.constant 0 : index
    %c0_62 = arith.constant 0 : index
    %93 = vector.load %arg4[%c3_60, %c0_61, %c0_62] : memref<57x1x32xf32, #tpu.memory_space<vmem>>, vector<1x1x32xf32>
    %94 = vector.shape_cast %93 : vector<1x1x32xf32> to vector<1x32xf32>
    %95 = vector.broadcast %94 : vector<1x32xf32> to vector<16x32xf32>
    %96 = arith.mulf %92, %95 : vector<16x32xf32>
    %cst_63 = arith.constant dense<0.000000e+00> : vector<16xf32>
    %97 = vector.multi_reduction <add>, %96, %cst_63 [1] : vector<16x32xf32> to vector<16xf32>
    %98 = vector.shape_cast %97 : vector<16xf32> to vector<16x1xf32>
    %c1_64 = arith.constant 1 : index
    %c0_65 = arith.constant 0 : index
    %c0_66 = arith.constant 0 : index
    %99 = vector.load %arg4[%c1_64, %c0_65, %c0_66] : memref<57x1x32xf32, #tpu.memory_space<vmem>>, vector<1x1x32xf32>
    %100 = vector.shape_cast %99 : vector<1x1x32xf32> to vector<1x32xf32>
    %101 = tpu.transpose %92, [1, 0] : vector<16x32xf32> -> vector<32x16xf32>
    %cst_67 = arith.constant dense<0.000000e+00> : vector<1x16xf32>
    %102 = tpu.matmul %100, %101, %cst_67 {dimension_numbers = #tpu.dot_dimension_numbers<[1], [0], [0], [1], [0, 0, 1, 1], [], []>} : vector<1x32xf32>, vector<32x16xf32>, vector<1x16xf32> -> vector<1x16xf32>
    %c5_68 = arith.constant 5 : index
    %c0_69 = arith.constant 0 : index
    %c0_70 = arith.constant 0 : index
    %103 = vector.load %arg4[%c5_68, %c0_69, %c0_70] : memref<57x1x32xf32, #tpu.memory_space<vmem>>, vector<1x1x32xf32>
    %104 = vector.shape_cast %103 : vector<1x1x32xf32> to vector<1x32xf32>
    %105 = vector.extract_strided_slice %104 {offsets = [0, 0], sizes = [1, 1], strides = [1, 1]} : vector<1x32xf32> to vector<1x1xf32>
    %106 = vector.broadcast %105 : vector<1x1xf32> to vector<16x16xf32>
    %107 = arith.mulf %22, %106 : vector<16x16xf32>
    %108 = vector.extract_strided_slice %104 {offsets = [0, 1], sizes = [1, 1], strides = [1, 1]} : vector<1x32xf32> to vector<1x1xf32>
    %109 = vector.broadcast %108 : vector<1x1xf32> to vector<16x16xf32>
    %110 = arith.mulf %24, %109 : vector<16x16xf32>
    %111 = arith.addf %107, %110 : vector<16x16xf32>
    %112 = vector.extract_strided_slice %104 {offsets = [0, 2], sizes = [1, 1], strides = [1, 1]} : vector<1x32xf32> to vector<1x1xf32>
    %113 = vector.broadcast %112 : vector<1x1xf32> to vector<16x16xf32>
    %114 = arith.mulf %26, %113 : vector<16x16xf32>
    %115 = arith.addf %111, %114 : vector<16x16xf32>
    %116 = vector.extract_strided_slice %104 {offsets = [0, 3], sizes = [1, 1], strides = [1, 1]} : vector<1x32xf32> to vector<1x1xf32>
    %117 = vector.broadcast %116 : vector<1x1xf32> to vector<16x16xf32>
    %118 = arith.mulf %28, %117 : vector<16x16xf32>
    %119 = arith.addf %115, %118 : vector<16x16xf32>
    %120 = vector.broadcast %98 : vector<16x1xf32> to vector<16x16xf32>
    %121 = vector.broadcast %102 : vector<1x16xf32> to vector<16x16xf32>
    %122 = arith.addf %120, %121 : vector<16x16xf32>
    %123 = arith.addf %122, %119 : vector<16x16xf32>
    %cst_71 = arith.constant 0.000000e+00 : f32
    %124 = vector.broadcast %cst_71 : f32 to vector<16x16xf32>
    %125 = arith.cmpf ogt, %123, %124 : vector<16x16xf32>
    %cst_72 = arith.constant 2.000000e-01 : f32
    %126 = vector.broadcast %cst_72 : f32 to vector<16x16xf32>
    %127 = arith.mulf %126, %123 : vector<16x16xf32>
    %128 = arith.select %125, %123, %127 : vector<16x16xi1>, vector<16x16xf32>
    %129 = arith.addf %128, %12 : vector<16x16xf32>
    %cst_73 = arith.constant dense<0xFF800000> : vector<16xf32>
    %130 = vector.multi_reduction <maximumf>, %129, %cst_73 [1] : vector<16x16xf32> to vector<16xf32>
    %131 = vector.shape_cast %130 : vector<16xf32> to vector<16x1xf32>
    %132 = vector.broadcast %131 : vector<16x1xf32> to vector<16x16xf32>
    %133 = arith.subf %129, %132 : vector<16x16xf32>
    %134 = math.exp %133 : vector<16x16xf32>
    %cst_74 = arith.constant dense<0.000000e+00> : vector<16xf32>
    %135 = vector.multi_reduction <add>, %134, %cst_74 [1] : vector<16x16xf32> to vector<16xf32>
    %136 = vector.shape_cast %135 : vector<16xf32> to vector<16x1xf32>
    %cst_75 = arith.constant 9.99999968E-21 : f32
    %137 = vector.broadcast %cst_75 : f32 to vector<16x1xf32>
    %138 = arith.maximumf %136, %137 : vector<16x1xf32>
    %139 = tpu.reciprocal %138 {approx = true} : vector<16x1xf32> -> vector<16x1xf32>
    %140 = vector.broadcast %139 : vector<16x1xf32> to vector<16x16xf32>
    %141 = arith.mulf %134, %140 : vector<16x16xf32>
    %142 = arith.mulf %141, %4 : vector<16x16xf32>
    %cst_76 = arith.constant dense<0.000000e+00> : vector<16x32xf32>
    %143 = tpu.matmul %142, %92, %cst_76 {dimension_numbers = #tpu.dot_dimension_numbers<[1], [0], [0], [1], [0, 0, 1, 1], [], []>} : vector<16x16xf32>, vector<16x32xf32>, vector<16x32xf32> -> vector<16x32xf32>
    %c3_77 = arith.constant 3 : index
    %c0_78 = arith.constant 0 : index
    %c0_79 = arith.constant 0 : index
    %144 = vector.load %arg3[%c3_77, %c0_78, %c0_79] : memref<35x32x32xf32, #tpu.memory_space<vmem>>, vector<1x32x32xf32>
    %145 = vector.shape_cast %144 : vector<1x32x32xf32> to vector<32x32xf32>
    %cst_80 = arith.constant dense<0.000000e+00> : vector<16x32xf32>
    %146 = tpu.matmul %143, %145, %cst_80 {dimension_numbers = #tpu.dot_dimension_numbers<[1], [0], [0], [1], [0, 0, 1, 1], [], []>} : vector<16x32xf32>, vector<32x32xf32>, vector<16x32xf32> -> vector<16x32xf32>
    %147 = arith.addf %89, %146 : vector<16x32xf32>
    %c6_81 = arith.constant 6 : index
    %c0_82 = arith.constant 0 : index
    %c0_83 = arith.constant 0 : index
    %148 = vector.load %arg4[%c6_81, %c0_82, %c0_83] : memref<57x1x32xf32, #tpu.memory_space<vmem>>, vector<1x1x32xf32>
    %149 = vector.shape_cast %148 : vector<1x1x32xf32> to vector<1x32xf32>
    %150 = vector.broadcast %149 : vector<1x32xf32> to vector<16x32xf32>
    %151 = arith.addf %147, %150 : vector<16x32xf32>
    %cst_84 = arith.constant 0.000000e+00 : f32
    %152 = vector.broadcast %cst_84 : f32 to vector<16x32xf32>
    %153 = arith.cmpf ogt, %151, %152 : vector<16x32xf32>
    %cst_85 = arith.constant 0.00999999977 : f32
    %154 = vector.broadcast %cst_85 : f32 to vector<16x32xf32>
    %155 = arith.mulf %154, %151 : vector<16x32xf32>
    %156 = arith.select %153, %151, %155 : vector<16x32xi1>, vector<16x32xf32>
    %c4_86 = arith.constant 4 : index
    %c0_87 = arith.constant 0 : index
    %c0_88 = arith.constant 0 : index
    %157 = vector.load %arg3[%c4_86, %c0_87, %c0_88] : memref<35x32x32xf32, #tpu.memory_space<vmem>>, vector<1x32x32xf32>
    %158 = vector.shape_cast %157 : vector<1x32x32xf32> to vector<32x32xf32>
    %cst_89 = arith.constant dense<0.000000e+00> : vector<16x32xf32>
    %159 = tpu.matmul %156, %158, %cst_89 {dimension_numbers = #tpu.dot_dimension_numbers<[1], [0], [0], [1], [0, 0, 1, 1], [], []>} : vector<16x32xf32>, vector<32x32xf32>, vector<16x32xf32> -> vector<16x32xf32>
    %c7_90 = arith.constant 7 : index
    %c0_91 = arith.constant 0 : index
    %c0_92 = arith.constant 0 : index
    %160 = vector.load %arg4[%c7_90, %c0_91, %c0_92] : memref<57x1x32xf32, #tpu.memory_space<vmem>>, vector<1x1x32xf32>
    %161 = vector.shape_cast %160 : vector<1x1x32xf32> to vector<1x32xf32>
    %162 = vector.broadcast %161 : vector<1x32xf32> to vector<16x32xf32>
    %163 = arith.addf %159, %162 : vector<16x32xf32>
    %c5_93 = arith.constant 5 : index
    %c0_94 = arith.constant 0 : index
    %c0_95 = arith.constant 0 : index
    %164 = vector.load %arg3[%c5_93, %c0_94, %c0_95] : memref<35x32x32xf32, #tpu.memory_space<vmem>>, vector<1x32x32xf32>
    %165 = vector.shape_cast %164 : vector<1x32x32xf32> to vector<32x32xf32>
    %cst_96 = arith.constant dense<0.000000e+00> : vector<16x32xf32>
    %166 = tpu.matmul %156, %165, %cst_96 {dimension_numbers = #tpu.dot_dimension_numbers<[1], [0], [0], [1], [0, 0, 1, 1], [], []>} : vector<16x32xf32>, vector<32x32xf32>, vector<16x32xf32> -> vector<16x32xf32>
    %c8_97 = arith.constant 8 : index
    %c0_98 = arith.constant 0 : index
    %c0_99 = arith.constant 0 : index
    %167 = vector.load %arg4[%c8_97, %c0_98, %c0_99] : memref<57x1x32xf32, #tpu.memory_space<vmem>>, vector<1x1x32xf32>
    %168 = vector.shape_cast %167 : vector<1x1x32xf32> to vector<1x32xf32>
    %169 = vector.broadcast %168 : vector<1x32xf32> to vector<16x32xf32>
    %170 = arith.addf %166, %169 : vector<16x32xf32>
    %c6_100 = arith.constant 6 : index
    %c0_101 = arith.constant 0 : index
    %c0_102 = arith.constant 0 : index
    %171 = vector.load %arg3[%c6_100, %c0_101, %c0_102] : memref<35x32x32xf32, #tpu.memory_space<vmem>>, vector<1x32x32xf32>
    %172 = vector.shape_cast %171 : vector<1x32x32xf32> to vector<32x32xf32>
    %cst_103 = arith.constant dense<0.000000e+00> : vector<16x32xf32>
    %173 = tpu.matmul %156, %172, %cst_103 {dimension_numbers = #tpu.dot_dimension_numbers<[1], [0], [0], [1], [0, 0, 1, 1], [], []>} : vector<16x32xf32>, vector<32x32xf32>, vector<16x32xf32> -> vector<16x32xf32>
    %c9_104 = arith.constant 9 : index
    %c0_105 = arith.constant 0 : index
    %c0_106 = arith.constant 0 : index
    %174 = vector.load %arg4[%c9_104, %c0_105, %c0_106] : memref<57x1x32xf32, #tpu.memory_space<vmem>>, vector<1x1x32xf32>
    %175 = vector.shape_cast %174 : vector<1x1x32xf32> to vector<1x32xf32>
    %176 = vector.broadcast %175 : vector<1x32xf32> to vector<16x32xf32>
    %177 = arith.addf %173, %176 : vector<16x32xf32>
    %c7_107 = arith.constant 7 : index
    %c0_108 = arith.constant 0 : index
    %c0_109 = arith.constant 0 : index
    %178 = vector.load %arg3[%c7_107, %c0_108, %c0_109] : memref<35x32x32xf32, #tpu.memory_space<vmem>>, vector<1x32x32xf32>
    %179 = vector.shape_cast %178 : vector<1x32x32xf32> to vector<32x32xf32>
    %cst_110 = arith.constant dense<0.000000e+00> : vector<16x32xf32>
    %180 = tpu.matmul %156, %179, %cst_110 {dimension_numbers = #tpu.dot_dimension_numbers<[1], [0], [0], [1], [0, 0, 1, 1], [], []>} : vector<16x32xf32>, vector<32x32xf32>, vector<16x32xf32> -> vector<16x32xf32>
    %c10 = arith.constant 10 : index
    %c0_111 = arith.constant 0 : index
    %c0_112 = arith.constant 0 : index
    %181 = vector.load %arg4[%c10, %c0_111, %c0_112] : memref<57x1x32xf32, #tpu.memory_space<vmem>>, vector<1x1x32xf32>
    %182 = vector.shape_cast %181 : vector<1x1x32xf32> to vector<1x32xf32>
    %183 = vector.broadcast %182 : vector<1x32xf32> to vector<16x32xf32>
    %184 = arith.addf %180, %183 : vector<16x32xf32>
    %c8_113 = arith.constant 8 : index
    %c0_114 = arith.constant 0 : index
    %c0_115 = arith.constant 0 : index
    %185 = vector.load %arg3[%c8_113, %c0_114, %c0_115] : memref<35x32x32xf32, #tpu.memory_space<vmem>>, vector<1x32x32xf32>
    %186 = vector.shape_cast %185 : vector<1x32x32xf32> to vector<32x32xf32>
    %cst_116 = arith.constant dense<0.000000e+00> : vector<16x32xf32>
    %187 = tpu.matmul %163, %186, %cst_116 {dimension_numbers = #tpu.dot_dimension_numbers<[1], [0], [0], [1], [0, 0, 1, 1], [], []>} : vector<16x32xf32>, vector<32x32xf32>, vector<16x32xf32> -> vector<16x32xf32>
    %188 = tpu.transpose %170, [1, 0] : vector<16x32xf32> -> vector<32x16xf32>
    %cst_117 = arith.constant dense<0.000000e+00> : vector<16x16xf32>
    %189 = tpu.matmul %163, %188, %cst_117 {dimension_numbers = #tpu.dot_dimension_numbers<[1], [0], [0], [1], [0, 0, 1, 1], [], []>} : vector<16x32xf32>, vector<32x16xf32>, vector<16x16xf32> -> vector<16x16xf32>
    %190 = vector.extract_strided_slice %187 {offsets = [0, 0], sizes = [16, 1], strides = [1, 1]} : vector<16x32xf32> to vector<16x1xf32>
    %191 = vector.broadcast %190 : vector<16x1xf32> to vector<16x16xf32>
    %192 = arith.mulf %14, %191 : vector<16x16xf32>
    %193 = arith.addf %189, %192 : vector<16x16xf32>
    %194 = vector.extract_strided_slice %187 {offsets = [0, 1], sizes = [16, 1], strides = [1, 1]} : vector<16x32xf32> to vector<16x1xf32>
    %195 = vector.broadcast %194 : vector<16x1xf32> to vector<16x16xf32>
    %196 = arith.mulf %16, %195 : vector<16x16xf32>
    %197 = arith.addf %193, %196 : vector<16x16xf32>
    %198 = vector.extract_strided_slice %187 {offsets = [0, 2], sizes = [16, 1], strides = [1, 1]} : vector<16x32xf32> to vector<16x1xf32>
    %199 = vector.broadcast %198 : vector<16x1xf32> to vector<16x16xf32>
    %200 = arith.mulf %18, %199 : vector<16x16xf32>
    %201 = arith.addf %197, %200 : vector<16x16xf32>
    %202 = vector.extract_strided_slice %187 {offsets = [0, 3], sizes = [16, 1], strides = [1, 1]} : vector<16x32xf32> to vector<16x1xf32>
    %203 = vector.broadcast %202 : vector<16x1xf32> to vector<16x16xf32>
    %204 = arith.mulf %20, %203 : vector<16x16xf32>
    %205 = arith.addf %201, %204 : vector<16x16xf32>
    %206 = arith.addf %205, %8 : vector<16x16xf32>
    %cst_118 = arith.constant dense<0xFF800000> : vector<16xf32>
    %207 = vector.multi_reduction <maximumf>, %206, %cst_118 [1] : vector<16x16xf32> to vector<16xf32>
    %208 = vector.shape_cast %207 : vector<16xf32> to vector<16x1xf32>
    %209 = vector.broadcast %208 : vector<16x1xf32> to vector<16x16xf32>
    %210 = arith.subf %206, %209 : vector<16x16xf32>
    %211 = math.exp %210 : vector<16x16xf32>
    %cst_119 = arith.constant dense<0.000000e+00> : vector<16xf32>
    %212 = vector.multi_reduction <add>, %211, %cst_119 [1] : vector<16x16xf32> to vector<16xf32>
    %213 = vector.shape_cast %212 : vector<16xf32> to vector<16x1xf32>
    %cst_120 = arith.constant 9.99999968E-21 : f32
    %214 = vector.broadcast %cst_120 : f32 to vector<16x1xf32>
    %215 = arith.maximumf %213, %214 : vector<16x1xf32>
    %216 = tpu.reciprocal %215 {approx = true} : vector<16x1xf32> -> vector<16x1xf32>
    %217 = vector.broadcast %216 : vector<16x1xf32> to vector<16x16xf32>
    %218 = arith.mulf %211, %217 : vector<16x16xf32>
    %219 = arith.mulf %218, %2 : vector<16x16xf32>
    %cst_121 = arith.constant dense<0.000000e+00> : vector<16x32xf32>
    %220 = tpu.matmul %219, %177, %cst_121 {dimension_numbers = #tpu.dot_dimension_numbers<[1], [0], [0], [1], [0, 0, 1, 1], [], []>} : vector<16x16xf32>, vector<16x32xf32>, vector<16x32xf32> -> vector<16x32xf32>
    %221 = arith.mulf %219, %14 : vector<16x16xf32>
    %cst_122 = arith.constant dense<0.000000e+00> : vector<16xf32>
    %222 = vector.multi_reduction <add>, %221, %cst_122 [1] : vector<16x16xf32> to vector<16xf32>
    %223 = vector.shape_cast %222 : vector<16xf32> to vector<16x1xf32>
    %c14 = arith.constant 14 : index
    %c0_123 = arith.constant 0 : index
    %c0_124 = arith.constant 0 : index
    %224 = vector.load %arg4[%c14, %c0_123, %c0_124] : memref<57x1x32xf32, #tpu.memory_space<vmem>>, vector<1x1x32xf32>
    %225 = vector.shape_cast %224 : vector<1x1x32xf32> to vector<1x32xf32>
    %226 = vector.broadcast %223 : vector<16x1xf32> to vector<16x32xf32>
    %227 = vector.broadcast %225 : vector<1x32xf32> to vector<16x32xf32>
    %228 = arith.mulf %226, %227 : vector<16x32xf32>
    %229 = arith.addf %220, %228 : vector<16x32xf32>
    %230 = arith.mulf %219, %16 : vector<16x16xf32>
    %cst_125 = arith.constant dense<0.000000e+00> : vector<16xf32>
    %231 = vector.multi_reduction <add>, %230, %cst_125 [1] : vector<16x16xf32> to vector<16xf32>
    %232 = vector.shape_cast %231 : vector<16xf32> to vector<16x1xf32>
    %c15 = arith.constant 15 : index
    %c0_126 = arith.constant 0 : index
    %c0_127 = arith.constant 0 : index
    %233 = vector.load %arg4[%c15, %c0_126, %c0_127] : memref<57x1x32xf32, #tpu.memory_space<vmem>>, vector<1x1x32xf32>
    %234 = vector.shape_cast %233 : vector<1x1x32xf32> to vector<1x32xf32>
    %235 = vector.broadcast %232 : vector<16x1xf32> to vector<16x32xf32>
    %236 = vector.broadcast %234 : vector<1x32xf32> to vector<16x32xf32>
    %237 = arith.mulf %235, %236 : vector<16x32xf32>
    %238 = arith.addf %229, %237 : vector<16x32xf32>
    %239 = arith.mulf %219, %18 : vector<16x16xf32>
    %cst_128 = arith.constant dense<0.000000e+00> : vector<16xf32>
    %240 = vector.multi_reduction <add>, %239, %cst_128 [1] : vector<16x16xf32> to vector<16xf32>
    %241 = vector.shape_cast %240 : vector<16xf32> to vector<16x1xf32>
    %c16 = arith.constant 16 : index
    %c0_129 = arith.constant 0 : index
    %c0_130 = arith.constant 0 : index
    %242 = vector.load %arg4[%c16, %c0_129, %c0_130] : memref<57x1x32xf32, #tpu.memory_space<vmem>>, vector<1x1x32xf32>
    %243 = vector.shape_cast %242 : vector<1x1x32xf32> to vector<1x32xf32>
    %244 = vector.broadcast %241 : vector<16x1xf32> to vector<16x32xf32>
    %245 = vector.broadcast %243 : vector<1x32xf32> to vector<16x32xf32>
    %246 = arith.mulf %244, %245 : vector<16x32xf32>
    %247 = arith.addf %238, %246 : vector<16x32xf32>
    %248 = arith.mulf %219, %20 : vector<16x16xf32>
    %cst_131 = arith.constant dense<0.000000e+00> : vector<16xf32>
    %249 = vector.multi_reduction <add>, %248, %cst_131 [1] : vector<16x16xf32> to vector<16xf32>
    %250 = vector.shape_cast %249 : vector<16xf32> to vector<16x1xf32>
    %c17 = arith.constant 17 : index
    %c0_132 = arith.constant 0 : index
    %c0_133 = arith.constant 0 : index
    %251 = vector.load %arg4[%c17, %c0_132, %c0_133] : memref<57x1x32xf32, #tpu.memory_space<vmem>>, vector<1x1x32xf32>
    %252 = vector.shape_cast %251 : vector<1x1x32xf32> to vector<1x32xf32>
    %253 = vector.broadcast %250 : vector<16x1xf32> to vector<16x32xf32>
    %254 = vector.broadcast %252 : vector<1x32xf32> to vector<16x32xf32>
    %255 = arith.mulf %253, %254 : vector<16x32xf32>
    %256 = arith.addf %247, %255 : vector<16x32xf32>
    %c11 = arith.constant 11 : index
    %c0_134 = arith.constant 0 : index
    %c0_135 = arith.constant 0 : index
    %257 = vector.load %arg4[%c11, %c0_134, %c0_135] : memref<57x1x32xf32, #tpu.memory_space<vmem>>, vector<1x1x32xf32>
    %258 = vector.shape_cast %257 : vector<1x1x32xf32> to vector<1x32xf32>
    %259 = vector.broadcast %258 : vector<1x32xf32> to vector<16x32xf32>
    %260 = arith.mulf %184, %259 : vector<16x32xf32>
    %cst_136 = arith.constant dense<0.000000e+00> : vector<16xf32>
    %261 = vector.multi_reduction <add>, %260, %cst_136 [1] : vector<16x32xf32> to vector<16xf32>
    %262 = vector.shape_cast %261 : vector<16xf32> to vector<16x1xf32>
    %c12 = arith.constant 12 : index
    %c0_137 = arith.constant 0 : index
    %c0_138 = arith.constant 0 : index
    %263 = vector.load %arg4[%c12, %c0_137, %c0_138] : memref<57x1x32xf32, #tpu.memory_space<vmem>>, vector<1x1x32xf32>
    %264 = vector.shape_cast %263 : vector<1x1x32xf32> to vector<1x32xf32>
    %265 = vector.broadcast %264 : vector<1x32xf32> to vector<16x32xf32>
    %266 = arith.mulf %256, %265 : vector<16x32xf32>
    %cst_139 = arith.constant dense<0.000000e+00> : vector<16xf32>
    %267 = vector.multi_reduction <add>, %266, %cst_139 [1] : vector<16x32xf32> to vector<16xf32>
    %268 = vector.shape_cast %267 : vector<16xf32> to vector<16x1xf32>
    %269 = arith.addf %262, %268 : vector<16x1xf32>
    %270 = arith.subf %184, %256 : vector<16x32xf32>
    %c13 = arith.constant 13 : index
    %c0_140 = arith.constant 0 : index
    %c0_141 = arith.constant 0 : index
    %271 = vector.load %arg4[%c13, %c0_140, %c0_141] : memref<57x1x32xf32, #tpu.memory_space<vmem>>, vector<1x1x32xf32>
    %272 = vector.shape_cast %271 : vector<1x1x32xf32> to vector<1x32xf32>
    %273 = vector.broadcast %272 : vector<1x32xf32> to vector<16x32xf32>
    %274 = arith.mulf %270, %273 : vector<16x32xf32>
    %cst_142 = arith.constant dense<0.000000e+00> : vector<16xf32>
    %275 = vector.multi_reduction <add>, %274, %cst_142 [1] : vector<16x32xf32> to vector<16xf32>
    %276 = vector.shape_cast %275 : vector<16xf32> to vector<16x1xf32>
    %277 = arith.addf %269, %276 : vector<16x1xf32>
    %c10_143 = arith.constant 10 : index
    %c0_144 = arith.constant 0 : index
    %c0_145 = arith.constant 0 : index
    %278 = vector.load %arg3[%c10_143, %c0_144, %c0_145] : memref<35x32x32xf32, #tpu.memory_space<vmem>>, vector<1x32x32xf32>
    %279 = vector.shape_cast %278 : vector<1x32x32xf32> to vector<32x32xf32>
    %cst_146 = arith.constant dense<0.000000e+00> : vector<16x32xf32>
    %280 = tpu.matmul %156, %279, %cst_146 {dimension_numbers = #tpu.dot_dimension_numbers<[1], [0], [0], [1], [0, 0, 1, 1], [], []>} : vector<16x32xf32>, vector<32x32xf32>, vector<16x32xf32> -> vector<16x32xf32>
    %c18 = arith.constant 18 : index
    %c0_147 = arith.constant 0 : index
    %c0_148 = arith.constant 0 : index
    %281 = vector.load %arg4[%c18, %c0_147, %c0_148] : memref<57x1x32xf32, #tpu.memory_space<vmem>>, vector<1x1x32xf32>
    %282 = vector.shape_cast %281 : vector<1x1x32xf32> to vector<1x32xf32>
    %283 = vector.broadcast %282 : vector<1x32xf32> to vector<16x32xf32>
    %284 = arith.addf %280, %283 : vector<16x32xf32>
    %c11_149 = arith.constant 11 : index
    %c0_150 = arith.constant 0 : index
    %c0_151 = arith.constant 0 : index
    %285 = vector.load %arg3[%c11_149, %c0_150, %c0_151] : memref<35x32x32xf32, #tpu.memory_space<vmem>>, vector<1x32x32xf32>
    %286 = vector.shape_cast %285 : vector<1x32x32xf32> to vector<32x32xf32>
    %cst_152 = arith.constant dense<0.000000e+00> : vector<16x32xf32>
    %287 = tpu.matmul %156, %286, %cst_152 {dimension_numbers = #tpu.dot_dimension_numbers<[1], [0], [0], [1], [0, 0, 1, 1], [], []>} : vector<16x32xf32>, vector<32x32xf32>, vector<16x32xf32> -> vector<16x32xf32>
    %c19 = arith.constant 19 : index
    %c0_153 = arith.constant 0 : index
    %c0_154 = arith.constant 0 : index
    %288 = vector.load %arg4[%c19, %c0_153, %c0_154] : memref<57x1x32xf32, #tpu.memory_space<vmem>>, vector<1x1x32xf32>
    %289 = vector.shape_cast %288 : vector<1x1x32xf32> to vector<1x32xf32>
    %290 = vector.broadcast %289 : vector<1x32xf32> to vector<16x32xf32>
    %291 = arith.addf %287, %290 : vector<16x32xf32>
    %c12_155 = arith.constant 12 : index
    %c0_156 = arith.constant 0 : index
    %c0_157 = arith.constant 0 : index
    %292 = vector.load %arg3[%c12_155, %c0_156, %c0_157] : memref<35x32x32xf32, #tpu.memory_space<vmem>>, vector<1x32x32xf32>
    %293 = vector.shape_cast %292 : vector<1x32x32xf32> to vector<32x32xf32>
    %cst_158 = arith.constant dense<0.000000e+00> : vector<16x32xf32>
    %294 = tpu.matmul %156, %293, %cst_158 {dimension_numbers = #tpu.dot_dimension_numbers<[1], [0], [0], [1], [0, 0, 1, 1], [], []>} : vector<16x32xf32>, vector<32x32xf32>, vector<16x32xf32> -> vector<16x32xf32>
    %c20 = arith.constant 20 : index
    %c0_159 = arith.constant 0 : index
    %c0_160 = arith.constant 0 : index
    %295 = vector.load %arg4[%c20, %c0_159, %c0_160] : memref<57x1x32xf32, #tpu.memory_space<vmem>>, vector<1x1x32xf32>
    %296 = vector.shape_cast %295 : vector<1x1x32xf32> to vector<1x32xf32>
    %297 = vector.broadcast %296 : vector<1x32xf32> to vector<16x32xf32>
    %298 = arith.addf %294, %297 : vector<16x32xf32>
    %c13_161 = arith.constant 13 : index
    %c0_162 = arith.constant 0 : index
    %c0_163 = arith.constant 0 : index
    %299 = vector.load %arg3[%c13_161, %c0_162, %c0_163] : memref<35x32x32xf32, #tpu.memory_space<vmem>>, vector<1x32x32xf32>
    %300 = vector.shape_cast %299 : vector<1x32x32xf32> to vector<32x32xf32>
    %cst_164 = arith.constant dense<0.000000e+00> : vector<16x32xf32>
    %301 = tpu.matmul %156, %300, %cst_164 {dimension_numbers = #tpu.dot_dimension_numbers<[1], [0], [0], [1], [0, 0, 1, 1], [], []>} : vector<16x32xf32>, vector<32x32xf32>, vector<16x32xf32> -> vector<16x32xf32>
    %c21 = arith.constant 21 : index
    %c0_165 = arith.constant 0 : index
    %c0_166 = arith.constant 0 : index
    %302 = vector.load %arg4[%c21, %c0_165, %c0_166] : memref<57x1x32xf32, #tpu.memory_space<vmem>>, vector<1x1x32xf32>
    %303 = vector.shape_cast %302 : vector<1x1x32xf32> to vector<1x32xf32>
    %304 = vector.broadcast %303 : vector<1x32xf32> to vector<16x32xf32>
    %305 = arith.addf %301, %304 : vector<16x32xf32>
    %c14_167 = arith.constant 14 : index
    %c0_168 = arith.constant 0 : index
    %c0_169 = arith.constant 0 : index
    %306 = vector.load %arg3[%c14_167, %c0_168, %c0_169] : memref<35x32x32xf32, #tpu.memory_space<vmem>>, vector<1x32x32xf32>
    %307 = vector.shape_cast %306 : vector<1x32x32xf32> to vector<32x32xf32>
    %cst_170 = arith.constant dense<0.000000e+00> : vector<16x32xf32>
    %308 = tpu.matmul %284, %307, %cst_170 {dimension_numbers = #tpu.dot_dimension_numbers<[1], [0], [0], [1], [0, 0, 1, 1], [], []>} : vector<16x32xf32>, vector<32x32xf32>, vector<16x32xf32> -> vector<16x32xf32>
    %309 = tpu.transpose %291, [1, 0] : vector<16x32xf32> -> vector<32x16xf32>
    %cst_171 = arith.constant dense<0.000000e+00> : vector<16x16xf32>
    %310 = tpu.matmul %284, %309, %cst_171 {dimension_numbers = #tpu.dot_dimension_numbers<[1], [0], [0], [1], [0, 0, 1, 1], [], []>} : vector<16x32xf32>, vector<32x16xf32>, vector<16x16xf32> -> vector<16x16xf32>
    %311 = vector.extract_strided_slice %308 {offsets = [0, 0], sizes = [16, 1], strides = [1, 1]} : vector<16x32xf32> to vector<16x1xf32>
    %312 = vector.broadcast %311 : vector<16x1xf32> to vector<16x16xf32>
    %313 = arith.mulf %14, %312 : vector<16x16xf32>
    %314 = arith.addf %310, %313 : vector<16x16xf32>
    %315 = vector.extract_strided_slice %308 {offsets = [0, 1], sizes = [16, 1], strides = [1, 1]} : vector<16x32xf32> to vector<16x1xf32>
    %316 = vector.broadcast %315 : vector<16x1xf32> to vector<16x16xf32>
    %317 = arith.mulf %16, %316 : vector<16x16xf32>
    %318 = arith.addf %314, %317 : vector<16x16xf32>
    %319 = vector.extract_strided_slice %308 {offsets = [0, 2], sizes = [16, 1], strides = [1, 1]} : vector<16x32xf32> to vector<16x1xf32>
    %320 = vector.broadcast %319 : vector<16x1xf32> to vector<16x16xf32>
    %321 = arith.mulf %18, %320 : vector<16x16xf32>
    %322 = arith.addf %318, %321 : vector<16x16xf32>
    %323 = vector.extract_strided_slice %308 {offsets = [0, 3], sizes = [16, 1], strides = [1, 1]} : vector<16x32xf32> to vector<16x1xf32>
    %324 = vector.broadcast %323 : vector<16x1xf32> to vector<16x16xf32>
    %325 = arith.mulf %20, %324 : vector<16x16xf32>
    %326 = arith.addf %322, %325 : vector<16x16xf32>
    %327 = arith.addf %326, %8 : vector<16x16xf32>
    %cst_172 = arith.constant dense<0xFF800000> : vector<16xf32>
    %328 = vector.multi_reduction <maximumf>, %327, %cst_172 [1] : vector<16x16xf32> to vector<16xf32>
    %329 = vector.shape_cast %328 : vector<16xf32> to vector<16x1xf32>
    %330 = vector.broadcast %329 : vector<16x1xf32> to vector<16x16xf32>
    %331 = arith.subf %327, %330 : vector<16x16xf32>
    %332 = math.exp %331 : vector<16x16xf32>
    %cst_173 = arith.constant dense<0.000000e+00> : vector<16xf32>
    %333 = vector.multi_reduction <add>, %332, %cst_173 [1] : vector<16x16xf32> to vector<16xf32>
    %334 = vector.shape_cast %333 : vector<16xf32> to vector<16x1xf32>
    %cst_174 = arith.constant 9.99999968E-21 : f32
    %335 = vector.broadcast %cst_174 : f32 to vector<16x1xf32>
    %336 = arith.maximumf %334, %335 : vector<16x1xf32>
    %337 = tpu.reciprocal %336 {approx = true} : vector<16x1xf32> -> vector<16x1xf32>
    %338 = vector.broadcast %337 : vector<16x1xf32> to vector<16x16xf32>
    %339 = arith.mulf %332, %338 : vector<16x16xf32>
    %340 = arith.mulf %339, %2 : vector<16x16xf32>
    %cst_175 = arith.constant dense<0.000000e+00> : vector<16x32xf32>
    %341 = tpu.matmul %340, %298, %cst_175 {dimension_numbers = #tpu.dot_dimension_numbers<[1], [0], [0], [1], [0, 0, 1, 1], [], []>} : vector<16x16xf32>, vector<16x32xf32>, vector<16x32xf32> -> vector<16x32xf32>
    %342 = arith.mulf %340, %14 : vector<16x16xf32>
    %cst_176 = arith.constant dense<0.000000e+00> : vector<16xf32>
    %343 = vector.multi_reduction <add>, %342, %cst_176 [1] : vector<16x16xf32> to vector<16xf32>
    %344 = vector.shape_cast %343 : vector<16xf32> to vector<16x1xf32>
    %c25 = arith.constant 25 : index
    %c0_177 = arith.constant 0 : index
    %c0_178 = arith.constant 0 : index
    %345 = vector.load %arg4[%c25, %c0_177, %c0_178] : memref<57x1x32xf32, #tpu.memory_space<vmem>>, vector<1x1x32xf32>
    %346 = vector.shape_cast %345 : vector<1x1x32xf32> to vector<1x32xf32>
    %347 = vector.broadcast %344 : vector<16x1xf32> to vector<16x32xf32>
    %348 = vector.broadcast %346 : vector<1x32xf32> to vector<16x32xf32>
    %349 = arith.mulf %347, %348 : vector<16x32xf32>
    %350 = arith.addf %341, %349 : vector<16x32xf32>
    %351 = arith.mulf %340, %16 : vector<16x16xf32>
    %cst_179 = arith.constant dense<0.000000e+00> : vector<16xf32>
    %352 = vector.multi_reduction <add>, %351, %cst_179 [1] : vector<16x16xf32> to vector<16xf32>
    %353 = vector.shape_cast %352 : vector<16xf32> to vector<16x1xf32>
    %c26 = arith.constant 26 : index
    %c0_180 = arith.constant 0 : index
    %c0_181 = arith.constant 0 : index
    %354 = vector.load %arg4[%c26, %c0_180, %c0_181] : memref<57x1x32xf32, #tpu.memory_space<vmem>>, vector<1x1x32xf32>
    %355 = vector.shape_cast %354 : vector<1x1x32xf32> to vector<1x32xf32>
    %356 = vector.broadcast %353 : vector<16x1xf32> to vector<16x32xf32>
    %357 = vector.broadcast %355 : vector<1x32xf32> to vector<16x32xf32>
    %358 = arith.mulf %356, %357 : vector<16x32xf32>
    %359 = arith.addf %350, %358 : vector<16x32xf32>
    %360 = arith.mulf %340, %18 : vector<16x16xf32>
    %cst_182 = arith.constant dense<0.000000e+00> : vector<16xf32>
    %361 = vector.multi_reduction <add>, %360, %cst_182 [1] : vector<16x16xf32> to vector<16xf32>
    %362 = vector.shape_cast %361 : vector<16xf32> to vector<16x1xf32>
    %c27 = arith.constant 27 : index
    %c0_183 = arith.constant 0 : index
    %c0_184 = arith.constant 0 : index
    %363 = vector.load %arg4[%c27, %c0_183, %c0_184] : memref<57x1x32xf32, #tpu.memory_space<vmem>>, vector<1x1x32xf32>
    %364 = vector.shape_cast %363 : vector<1x1x32xf32> to vector<1x32xf32>
    %365 = vector.broadcast %362 : vector<16x1xf32> to vector<16x32xf32>
    %366 = vector.broadcast %364 : vector<1x32xf32> to vector<16x32xf32>
    %367 = arith.mulf %365, %366 : vector<16x32xf32>
    %368 = arith.addf %359, %367 : vector<16x32xf32>
    %369 = arith.mulf %340, %20 : vector<16x16xf32>
    %cst_185 = arith.constant dense<0.000000e+00> : vector<16xf32>
    %370 = vector.multi_reduction <add>, %369, %cst_185 [1] : vector<16x16xf32> to vector<16xf32>
    %371 = vector.shape_cast %370 : vector<16xf32> to vector<16x1xf32>
    %c28 = arith.constant 28 : index
    %c0_186 = arith.constant 0 : index
    %c0_187 = arith.constant 0 : index
    %372 = vector.load %arg4[%c28, %c0_186, %c0_187] : memref<57x1x32xf32, #tpu.memory_space<vmem>>, vector<1x1x32xf32>
    %373 = vector.shape_cast %372 : vector<1x1x32xf32> to vector<1x32xf32>
    %374 = vector.broadcast %371 : vector<16x1xf32> to vector<16x32xf32>
    %375 = vector.broadcast %373 : vector<1x32xf32> to vector<16x32xf32>
    %376 = arith.mulf %374, %375 : vector<16x32xf32>
    %377 = arith.addf %368, %376 : vector<16x32xf32>
    %c22 = arith.constant 22 : index
    %c0_188 = arith.constant 0 : index
    %c0_189 = arith.constant 0 : index
    %378 = vector.load %arg4[%c22, %c0_188, %c0_189] : memref<57x1x32xf32, #tpu.memory_space<vmem>>, vector<1x1x32xf32>
    %379 = vector.shape_cast %378 : vector<1x1x32xf32> to vector<1x32xf32>
    %380 = vector.broadcast %379 : vector<1x32xf32> to vector<16x32xf32>
    %381 = arith.mulf %305, %380 : vector<16x32xf32>
    %cst_190 = arith.constant dense<0.000000e+00> : vector<16xf32>
    %382 = vector.multi_reduction <add>, %381, %cst_190 [1] : vector<16x32xf32> to vector<16xf32>
    %383 = vector.shape_cast %382 : vector<16xf32> to vector<16x1xf32>
    %c23 = arith.constant 23 : index
    %c0_191 = arith.constant 0 : index
    %c0_192 = arith.constant 0 : index
    %384 = vector.load %arg4[%c23, %c0_191, %c0_192] : memref<57x1x32xf32, #tpu.memory_space<vmem>>, vector<1x1x32xf32>
    %385 = vector.shape_cast %384 : vector<1x1x32xf32> to vector<1x32xf32>
    %386 = vector.broadcast %385 : vector<1x32xf32> to vector<16x32xf32>
    %387 = arith.mulf %377, %386 : vector<16x32xf32>
    %cst_193 = arith.constant dense<0.000000e+00> : vector<16xf32>
    %388 = vector.multi_reduction <add>, %387, %cst_193 [1] : vector<16x32xf32> to vector<16xf32>
    %389 = vector.shape_cast %388 : vector<16xf32> to vector<16x1xf32>
    %390 = arith.addf %383, %389 : vector<16x1xf32>
    %391 = arith.subf %305, %377 : vector<16x32xf32>
    %c24 = arith.constant 24 : index
    %c0_194 = arith.constant 0 : index
    %c0_195 = arith.constant 0 : index
    %392 = vector.load %arg4[%c24, %c0_194, %c0_195] : memref<57x1x32xf32, #tpu.memory_space<vmem>>, vector<1x1x32xf32>
    %393 = vector.shape_cast %392 : vector<1x1x32xf32> to vector<1x32xf32>
    %394 = vector.broadcast %393 : vector<1x32xf32> to vector<16x32xf32>
    %395 = arith.mulf %391, %394 : vector<16x32xf32>
    %cst_196 = arith.constant dense<0.000000e+00> : vector<16xf32>
    %396 = vector.multi_reduction <add>, %395, %cst_196 [1] : vector<16x32xf32> to vector<16xf32>
    %397 = vector.shape_cast %396 : vector<16xf32> to vector<16x1xf32>
    %398 = arith.addf %390, %397 : vector<16x1xf32>
    %399 = arith.addf %277, %398 : vector<16x1xf32>
    %cst_197 = arith.constant 0.000000e+00 : f32
    %400 = vector.broadcast %cst_197 : f32 to vector<16x1xf32>
    %401 = arith.subf %400, %399 : vector<16x1xf32>
    %402 = math.exp %401 : vector<16x1xf32>
    %cst_198 = arith.constant 1.000000e+00 : f32
    %403 = vector.broadcast %cst_198 : f32 to vector<16x1xf32>
    %404 = arith.addf %403, %402 : vector<16x1xf32>
    %405 = tpu.reciprocal %404 {approx = true} : vector<16x1xf32> -> vector<16x1xf32>
    %406 = vector.broadcast %405 : vector<16x1xf32> to vector<16x32xf32>
    %407 = arith.mulf %406, %184 : vector<16x32xf32>
    %cst_199 = arith.constant 1.000000e+00 : f32
    %408 = vector.broadcast %cst_199 : f32 to vector<16x1xf32>
    %409 = arith.subf %408, %405 : vector<16x1xf32>
    %410 = vector.broadcast %409 : vector<16x1xf32> to vector<16x32xf32>
    %411 = arith.mulf %410, %256 : vector<16x32xf32>
    %412 = arith.addf %407, %411 : vector<16x32xf32>
    %c9_200 = arith.constant 9 : index
    %c0_201 = arith.constant 0 : index
    %c0_202 = arith.constant 0 : index
    %413 = vector.load %arg3[%c9_200, %c0_201, %c0_202] : memref<35x32x32xf32, #tpu.memory_space<vmem>>, vector<1x32x32xf32>
    %414 = vector.shape_cast %413 : vector<1x32x32xf32> to vector<32x32xf32>
    %cst_203 = arith.constant dense<0.000000e+00> : vector<16x32xf32>
    %415 = tpu.matmul %412, %414, %cst_203 {dimension_numbers = #tpu.dot_dimension_numbers<[1], [0], [0], [1], [0, 0, 1, 1], [], []>} : vector<16x32xf32>, vector<32x32xf32>, vector<16x32xf32> -> vector<16x32xf32>
    %416 = vector.broadcast %405 : vector<16x1xf32> to vector<16x32xf32>
    %417 = arith.mulf %416, %305 : vector<16x32xf32>
    %cst_204 = arith.constant 1.000000e+00 : f32
    %418 = vector.broadcast %cst_204 : f32 to vector<16x1xf32>
    %419 = arith.subf %418, %405 : vector<16x1xf32>
    %420 = vector.broadcast %419 : vector<16x1xf32> to vector<16x32xf32>
    %421 = arith.mulf %420, %377 : vector<16x32xf32>
    %422 = arith.addf %417, %421 : vector<16x32xf32>
    %c15_205 = arith.constant 15 : index
    %c0_206 = arith.constant 0 : index
    %c0_207 = arith.constant 0 : index
    %423 = vector.load %arg3[%c15_205, %c0_206, %c0_207] : memref<35x32x32xf32, #tpu.memory_space<vmem>>, vector<1x32x32xf32>
    %424 = vector.shape_cast %423 : vector<1x32x32xf32> to vector<32x32xf32>
    %cst_208 = arith.constant dense<0.000000e+00> : vector<16x32xf32>
    %425 = tpu.matmul %422, %424, %cst_208 {dimension_numbers = #tpu.dot_dimension_numbers<[1], [0], [0], [1], [0, 0, 1, 1], [], []>} : vector<16x32xf32>, vector<32x32xf32>, vector<16x32xf32> -> vector<16x32xf32>
    %426 = arith.addf %415, %425 : vector<16x32xf32>
    %c51 = arith.constant 51 : index
    %c0_209 = arith.constant 0 : index
    %c0_210 = arith.constant 0 : index
    %427 = vector.load %arg4[%c51, %c0_209, %c0_210] : memref<57x1x32xf32, #tpu.memory_space<vmem>>, vector<1x1x32xf32>
    %428 = vector.shape_cast %427 : vector<1x1x32xf32> to vector<1x32xf32>
    %429 = vector.broadcast %428 : vector<1x32xf32> to vector<16x32xf32>
    %430 = arith.addf %426, %429 : vector<16x32xf32>
    %cst_211 = arith.constant 0.000000e+00 : f32
    %431 = vector.broadcast %cst_211 : f32 to vector<16x32xf32>
    %432 = arith.cmpf ogt, %430, %431 : vector<16x32xf32>
    %cst_212 = arith.constant 0.00999999977 : f32
    %433 = vector.broadcast %cst_212 : f32 to vector<16x32xf32>
    %434 = arith.mulf %433, %430 : vector<16x32xf32>
    %435 = arith.select %432, %430, %434 : vector<16x32xi1>, vector<16x32xf32>
    %cst_213 = arith.constant dense<0.000000e+00> : vector<2x32xf32>
    %436 = tpu.matmul %30, %435, %cst_213 {dimension_numbers = #tpu.dot_dimension_numbers<[1], [0], [0], [1], [0, 0, 1, 1], [], []>} : vector<2x16xf32>, vector<16x32xf32>, vector<2x32xf32> -> vector<2x32xf32>
    %437 = vector.shape_cast %435 : vector<16x32xf32> to vector<1x16x32xf32>
    %438 = vector.shape_cast %32 : vector<2x16xf32> to vector<2x16x1xf32>
    %439 = vector.broadcast %437 : vector<1x16x32xf32> to vector<2x16x32xf32>
    %440 = vector.broadcast %438 : vector<2x16x1xf32> to vector<2x16x32xf32>
    %441 = arith.addf %439, %440 : vector<2x16x32xf32>
    %cst_214 = arith.constant dense<0xFF800000> : vector<2x32xf32>
    %442 = vector.multi_reduction <maximumf>, %441, %cst_214 [1] : vector<2x16x32xf32> to vector<2x32xf32>
    %c16_215 = arith.constant 16 : index
    %c0_216 = arith.constant 0 : index
    %c0_217 = arith.constant 0 : index
    %443 = vector.load %arg3[%c16_215, %c0_216, %c0_217] : memref<35x32x32xf32, #tpu.memory_space<vmem>>, vector<1x32x32xf32>
    %444 = vector.shape_cast %443 : vector<1x32x32xf32> to vector<32x32xf32>
    %cst_218 = arith.constant dense<0.000000e+00> : vector<16x32xf32>
    %445 = tpu.matmul %435, %444, %cst_218 {dimension_numbers = #tpu.dot_dimension_numbers<[1], [0], [0], [1], [0, 0, 1, 1], [], []>} : vector<16x32xf32>, vector<32x32xf32>, vector<16x32xf32> -> vector<16x32xf32>
    %c29 = arith.constant 29 : index
    %c0_219 = arith.constant 0 : index
    %c0_220 = arith.constant 0 : index
    %446 = vector.load %arg4[%c29, %c0_219, %c0_220] : memref<57x1x32xf32, #tpu.memory_space<vmem>>, vector<1x1x32xf32>
    %447 = vector.shape_cast %446 : vector<1x1x32xf32> to vector<1x32xf32>
    %448 = vector.broadcast %447 : vector<1x32xf32> to vector<16x32xf32>
    %449 = arith.addf %445, %448 : vector<16x32xf32>
    %c17_221 = arith.constant 17 : index
    %c0_222 = arith.constant 0 : index
    %c0_223 = arith.constant 0 : index
    %450 = vector.load %arg3[%c17_221, %c0_222, %c0_223] : memref<35x32x32xf32, #tpu.memory_space<vmem>>, vector<1x32x32xf32>
    %451 = vector.shape_cast %450 : vector<1x32x32xf32> to vector<32x32xf32>
    %cst_224 = arith.constant dense<0.000000e+00> : vector<16x32xf32>
    %452 = tpu.matmul %435, %451, %cst_224 {dimension_numbers = #tpu.dot_dimension_numbers<[1], [0], [0], [1], [0, 0, 1, 1], [], []>} : vector<16x32xf32>, vector<32x32xf32>, vector<16x32xf32> -> vector<16x32xf32>
    %c30 = arith.constant 30 : index
    %c0_225 = arith.constant 0 : index
    %c0_226 = arith.constant 0 : index
    %453 = vector.load %arg4[%c30, %c0_225, %c0_226] : memref<57x1x32xf32, #tpu.memory_space<vmem>>, vector<1x1x32xf32>
    %454 = vector.shape_cast %453 : vector<1x1x32xf32> to vector<1x32xf32>
    %455 = vector.broadcast %454 : vector<1x32xf32> to vector<16x32xf32>
    %456 = arith.addf %452, %455 : vector<16x32xf32>
    %c18_227 = arith.constant 18 : index
    %c0_228 = arith.constant 0 : index
    %c0_229 = arith.constant 0 : index
    %457 = vector.load %arg3[%c18_227, %c0_228, %c0_229] : memref<35x32x32xf32, #tpu.memory_space<vmem>>, vector<1x32x32xf32>
    %458 = vector.shape_cast %457 : vector<1x32x32xf32> to vector<32x32xf32>
    %cst_230 = arith.constant dense<0.000000e+00> : vector<16x32xf32>
    %459 = tpu.matmul %435, %458, %cst_230 {dimension_numbers = #tpu.dot_dimension_numbers<[1], [0], [0], [1], [0, 0, 1, 1], [], []>} : vector<16x32xf32>, vector<32x32xf32>, vector<16x32xf32> -> vector<16x32xf32>
    %c31 = arith.constant 31 : index
    %c0_231 = arith.constant 0 : index
    %c0_232 = arith.constant 0 : index
    %460 = vector.load %arg4[%c31, %c0_231, %c0_232] : memref<57x1x32xf32, #tpu.memory_space<vmem>>, vector<1x1x32xf32>
    %461 = vector.shape_cast %460 : vector<1x1x32xf32> to vector<1x32xf32>
    %462 = vector.broadcast %461 : vector<1x32xf32> to vector<16x32xf32>
    %463 = arith.addf %459, %462 : vector<16x32xf32>
    %c19_233 = arith.constant 19 : index
    %c0_234 = arith.constant 0 : index
    %c0_235 = arith.constant 0 : index
    %464 = vector.load %arg3[%c19_233, %c0_234, %c0_235] : memref<35x32x32xf32, #tpu.memory_space<vmem>>, vector<1x32x32xf32>
    %465 = vector.shape_cast %464 : vector<1x32x32xf32> to vector<32x32xf32>
    %cst_236 = arith.constant dense<0.000000e+00> : vector<16x32xf32>
    %466 = tpu.matmul %435, %465, %cst_236 {dimension_numbers = #tpu.dot_dimension_numbers<[1], [0], [0], [1], [0, 0, 1, 1], [], []>} : vector<16x32xf32>, vector<32x32xf32>, vector<16x32xf32> -> vector<16x32xf32>
    %c32 = arith.constant 32 : index
    %c0_237 = arith.constant 0 : index
    %c0_238 = arith.constant 0 : index
    %467 = vector.load %arg4[%c32, %c0_237, %c0_238] : memref<57x1x32xf32, #tpu.memory_space<vmem>>, vector<1x1x32xf32>
    %468 = vector.shape_cast %467 : vector<1x1x32xf32> to vector<1x32xf32>
    %469 = vector.broadcast %468 : vector<1x32xf32> to vector<16x32xf32>
    %470 = arith.addf %466, %469 : vector<16x32xf32>
    %c20_239 = arith.constant 20 : index
    %c0_240 = arith.constant 0 : index
    %c0_241 = arith.constant 0 : index
    %471 = vector.load %arg3[%c20_239, %c0_240, %c0_241] : memref<35x32x32xf32, #tpu.memory_space<vmem>>, vector<1x32x32xf32>
    %472 = vector.shape_cast %471 : vector<1x32x32xf32> to vector<32x32xf32>
    %cst_242 = arith.constant dense<0.000000e+00> : vector<16x32xf32>
    %473 = tpu.matmul %449, %472, %cst_242 {dimension_numbers = #tpu.dot_dimension_numbers<[1], [0], [0], [1], [0, 0, 1, 1], [], []>} : vector<16x32xf32>, vector<32x32xf32>, vector<16x32xf32> -> vector<16x32xf32>
    %474 = tpu.transpose %456, [1, 0] : vector<16x32xf32> -> vector<32x16xf32>
    %cst_243 = arith.constant dense<0.000000e+00> : vector<16x16xf32>
    %475 = tpu.matmul %449, %474, %cst_243 {dimension_numbers = #tpu.dot_dimension_numbers<[1], [0], [0], [1], [0, 0, 1, 1], [], []>} : vector<16x32xf32>, vector<32x16xf32>, vector<16x16xf32> -> vector<16x16xf32>
    %476 = vector.extract_strided_slice %473 {offsets = [0, 0], sizes = [16, 1], strides = [1, 1]} : vector<16x32xf32> to vector<16x1xf32>
    %477 = vector.broadcast %476 : vector<16x1xf32> to vector<16x16xf32>
    %478 = arith.mulf %14, %477 : vector<16x16xf32>
    %479 = arith.addf %475, %478 : vector<16x16xf32>
    %480 = vector.extract_strided_slice %473 {offsets = [0, 1], sizes = [16, 1], strides = [1, 1]} : vector<16x32xf32> to vector<16x1xf32>
    %481 = vector.broadcast %480 : vector<16x1xf32> to vector<16x16xf32>
    %482 = arith.mulf %16, %481 : vector<16x16xf32>
    %483 = arith.addf %479, %482 : vector<16x16xf32>
    %484 = vector.extract_strided_slice %473 {offsets = [0, 2], sizes = [16, 1], strides = [1, 1]} : vector<16x32xf32> to vector<16x1xf32>
    %485 = vector.broadcast %484 : vector<16x1xf32> to vector<16x16xf32>
    %486 = arith.mulf %18, %485 : vector<16x16xf32>
    %487 = arith.addf %483, %486 : vector<16x16xf32>
    %488 = vector.extract_strided_slice %473 {offsets = [0, 3], sizes = [16, 1], strides = [1, 1]} : vector<16x32xf32> to vector<16x1xf32>
    %489 = vector.broadcast %488 : vector<16x1xf32> to vector<16x16xf32>
    %490 = arith.mulf %20, %489 : vector<16x16xf32>
    %491 = arith.addf %487, %490 : vector<16x16xf32>
    %492 = arith.addf %491, %8 : vector<16x16xf32>
    %cst_244 = arith.constant dense<0xFF800000> : vector<16xf32>
    %493 = vector.multi_reduction <maximumf>, %492, %cst_244 [1] : vector<16x16xf32> to vector<16xf32>
    %494 = vector.shape_cast %493 : vector<16xf32> to vector<16x1xf32>
    %495 = vector.broadcast %494 : vector<16x1xf32> to vector<16x16xf32>
    %496 = arith.subf %492, %495 : vector<16x16xf32>
    %497 = math.exp %496 : vector<16x16xf32>
    %cst_245 = arith.constant dense<0.000000e+00> : vector<16xf32>
    %498 = vector.multi_reduction <add>, %497, %cst_245 [1] : vector<16x16xf32> to vector<16xf32>
    %499 = vector.shape_cast %498 : vector<16xf32> to vector<16x1xf32>
    %cst_246 = arith.constant 9.99999968E-21 : f32
    %500 = vector.broadcast %cst_246 : f32 to vector<16x1xf32>
    %501 = arith.maximumf %499, %500 : vector<16x1xf32>
    %502 = tpu.reciprocal %501 {approx = true} : vector<16x1xf32> -> vector<16x1xf32>
    %503 = vector.broadcast %502 : vector<16x1xf32> to vector<16x16xf32>
    %504 = arith.mulf %497, %503 : vector<16x16xf32>
    %505 = arith.mulf %504, %2 : vector<16x16xf32>
    %cst_247 = arith.constant dense<0.000000e+00> : vector<16x32xf32>
    %506 = tpu.matmul %505, %463, %cst_247 {dimension_numbers = #tpu.dot_dimension_numbers<[1], [0], [0], [1], [0, 0, 1, 1], [], []>} : vector<16x16xf32>, vector<16x32xf32>, vector<16x32xf32> -> vector<16x32xf32>
    %507 = arith.mulf %505, %14 : vector<16x16xf32>
    %cst_248 = arith.constant dense<0.000000e+00> : vector<16xf32>
    %508 = vector.multi_reduction <add>, %507, %cst_248 [1] : vector<16x16xf32> to vector<16xf32>
    %509 = vector.shape_cast %508 : vector<16xf32> to vector<16x1xf32>
    %c36 = arith.constant 36 : index
    %c0_249 = arith.constant 0 : index
    %c0_250 = arith.constant 0 : index
    %510 = vector.load %arg4[%c36, %c0_249, %c0_250] : memref<57x1x32xf32, #tpu.memory_space<vmem>>, vector<1x1x32xf32>
    %511 = vector.shape_cast %510 : vector<1x1x32xf32> to vector<1x32xf32>
    %512 = vector.broadcast %509 : vector<16x1xf32> to vector<16x32xf32>
    %513 = vector.broadcast %511 : vector<1x32xf32> to vector<16x32xf32>
    %514 = arith.mulf %512, %513 : vector<16x32xf32>
    %515 = arith.addf %506, %514 : vector<16x32xf32>
    %516 = arith.mulf %505, %16 : vector<16x16xf32>
    %cst_251 = arith.constant dense<0.000000e+00> : vector<16xf32>
    %517 = vector.multi_reduction <add>, %516, %cst_251 [1] : vector<16x16xf32> to vector<16xf32>
    %518 = vector.shape_cast %517 : vector<16xf32> to vector<16x1xf32>
    %c37 = arith.constant 37 : index
    %c0_252 = arith.constant 0 : index
    %c0_253 = arith.constant 0 : index
    %519 = vector.load %arg4[%c37, %c0_252, %c0_253] : memref<57x1x32xf32, #tpu.memory_space<vmem>>, vector<1x1x32xf32>
    %520 = vector.shape_cast %519 : vector<1x1x32xf32> to vector<1x32xf32>
    %521 = vector.broadcast %518 : vector<16x1xf32> to vector<16x32xf32>
    %522 = vector.broadcast %520 : vector<1x32xf32> to vector<16x32xf32>
    %523 = arith.mulf %521, %522 : vector<16x32xf32>
    %524 = arith.addf %515, %523 : vector<16x32xf32>
    %525 = arith.mulf %505, %18 : vector<16x16xf32>
    %cst_254 = arith.constant dense<0.000000e+00> : vector<16xf32>
    %526 = vector.multi_reduction <add>, %525, %cst_254 [1] : vector<16x16xf32> to vector<16xf32>
    %527 = vector.shape_cast %526 : vector<16xf32> to vector<16x1xf32>
    %c38 = arith.constant 38 : index
    %c0_255 = arith.constant 0 : index
    %c0_256 = arith.constant 0 : index
    %528 = vector.load %arg4[%c38, %c0_255, %c0_256] : memref<57x1x32xf32, #tpu.memory_space<vmem>>, vector<1x1x32xf32>
    %529 = vector.shape_cast %528 : vector<1x1x32xf32> to vector<1x32xf32>
    %530 = vector.broadcast %527 : vector<16x1xf32> to vector<16x32xf32>
    %531 = vector.broadcast %529 : vector<1x32xf32> to vector<16x32xf32>
    %532 = arith.mulf %530, %531 : vector<16x32xf32>
    %533 = arith.addf %524, %532 : vector<16x32xf32>
    %534 = arith.mulf %505, %20 : vector<16x16xf32>
    %cst_257 = arith.constant dense<0.000000e+00> : vector<16xf32>
    %535 = vector.multi_reduction <add>, %534, %cst_257 [1] : vector<16x16xf32> to vector<16xf32>
    %536 = vector.shape_cast %535 : vector<16xf32> to vector<16x1xf32>
    %c39 = arith.constant 39 : index
    %c0_258 = arith.constant 0 : index
    %c0_259 = arith.constant 0 : index
    %537 = vector.load %arg4[%c39, %c0_258, %c0_259] : memref<57x1x32xf32, #tpu.memory_space<vmem>>, vector<1x1x32xf32>
    %538 = vector.shape_cast %537 : vector<1x1x32xf32> to vector<1x32xf32>
    %539 = vector.broadcast %536 : vector<16x1xf32> to vector<16x32xf32>
    %540 = vector.broadcast %538 : vector<1x32xf32> to vector<16x32xf32>
    %541 = arith.mulf %539, %540 : vector<16x32xf32>
    %542 = arith.addf %533, %541 : vector<16x32xf32>
    %c33 = arith.constant 33 : index
    %c0_260 = arith.constant 0 : index
    %c0_261 = arith.constant 0 : index
    %543 = vector.load %arg4[%c33, %c0_260, %c0_261] : memref<57x1x32xf32, #tpu.memory_space<vmem>>, vector<1x1x32xf32>
    %544 = vector.shape_cast %543 : vector<1x1x32xf32> to vector<1x32xf32>
    %545 = vector.broadcast %544 : vector<1x32xf32> to vector<16x32xf32>
    %546 = arith.mulf %470, %545 : vector<16x32xf32>
    %cst_262 = arith.constant dense<0.000000e+00> : vector<16xf32>
    %547 = vector.multi_reduction <add>, %546, %cst_262 [1] : vector<16x32xf32> to vector<16xf32>
    %548 = vector.shape_cast %547 : vector<16xf32> to vector<16x1xf32>
    %c34 = arith.constant 34 : index
    %c0_263 = arith.constant 0 : index
    %c0_264 = arith.constant 0 : index
    %549 = vector.load %arg4[%c34, %c0_263, %c0_264] : memref<57x1x32xf32, #tpu.memory_space<vmem>>, vector<1x1x32xf32>
    %550 = vector.shape_cast %549 : vector<1x1x32xf32> to vector<1x32xf32>
    %551 = vector.broadcast %550 : vector<1x32xf32> to vector<16x32xf32>
    %552 = arith.mulf %542, %551 : vector<16x32xf32>
    %cst_265 = arith.constant dense<0.000000e+00> : vector<16xf32>
    %553 = vector.multi_reduction <add>, %552, %cst_265 [1] : vector<16x32xf32> to vector<16xf32>
    %554 = vector.shape_cast %553 : vector<16xf32> to vector<16x1xf32>
    %555 = arith.addf %548, %554 : vector<16x1xf32>
    %556 = arith.subf %470, %542 : vector<16x32xf32>
    %c35 = arith.constant 35 : index
    %c0_266 = arith.constant 0 : index
    %c0_267 = arith.constant 0 : index
    %557 = vector.load %arg4[%c35, %c0_266, %c0_267] : memref<57x1x32xf32, #tpu.memory_space<vmem>>, vector<1x1x32xf32>
    %558 = vector.shape_cast %557 : vector<1x1x32xf32> to vector<1x32xf32>
    %559 = vector.broadcast %558 : vector<1x32xf32> to vector<16x32xf32>
    %560 = arith.mulf %556, %559 : vector<16x32xf32>
    %cst_268 = arith.constant dense<0.000000e+00> : vector<16xf32>
    %561 = vector.multi_reduction <add>, %560, %cst_268 [1] : vector<16x32xf32> to vector<16xf32>
    %562 = vector.shape_cast %561 : vector<16xf32> to vector<16x1xf32>
    %563 = arith.addf %555, %562 : vector<16x1xf32>
    %c22_269 = arith.constant 22 : index
    %c0_270 = arith.constant 0 : index
    %c0_271 = arith.constant 0 : index
    %564 = vector.load %arg3[%c22_269, %c0_270, %c0_271] : memref<35x32x32xf32, #tpu.memory_space<vmem>>, vector<1x32x32xf32>
    %565 = vector.shape_cast %564 : vector<1x32x32xf32> to vector<32x32xf32>
    %cst_272 = arith.constant dense<0.000000e+00> : vector<16x32xf32>
    %566 = tpu.matmul %435, %565, %cst_272 {dimension_numbers = #tpu.dot_dimension_numbers<[1], [0], [0], [1], [0, 0, 1, 1], [], []>} : vector<16x32xf32>, vector<32x32xf32>, vector<16x32xf32> -> vector<16x32xf32>
    %c40 = arith.constant 40 : index
    %c0_273 = arith.constant 0 : index
    %c0_274 = arith.constant 0 : index
    %567 = vector.load %arg4[%c40, %c0_273, %c0_274] : memref<57x1x32xf32, #tpu.memory_space<vmem>>, vector<1x1x32xf32>
    %568 = vector.shape_cast %567 : vector<1x1x32xf32> to vector<1x32xf32>
    %569 = vector.broadcast %568 : vector<1x32xf32> to vector<16x32xf32>
    %570 = arith.addf %566, %569 : vector<16x32xf32>
    %c23_275 = arith.constant 23 : index
    %c0_276 = arith.constant 0 : index
    %c0_277 = arith.constant 0 : index
    %571 = vector.load %arg3[%c23_275, %c0_276, %c0_277] : memref<35x32x32xf32, #tpu.memory_space<vmem>>, vector<1x32x32xf32>
    %572 = vector.shape_cast %571 : vector<1x32x32xf32> to vector<32x32xf32>
    %cst_278 = arith.constant dense<0.000000e+00> : vector<16x32xf32>
    %573 = tpu.matmul %435, %572, %cst_278 {dimension_numbers = #tpu.dot_dimension_numbers<[1], [0], [0], [1], [0, 0, 1, 1], [], []>} : vector<16x32xf32>, vector<32x32xf32>, vector<16x32xf32> -> vector<16x32xf32>
    %c41 = arith.constant 41 : index
    %c0_279 = arith.constant 0 : index
    %c0_280 = arith.constant 0 : index
    %574 = vector.load %arg4[%c41, %c0_279, %c0_280] : memref<57x1x32xf32, #tpu.memory_space<vmem>>, vector<1x1x32xf32>
    %575 = vector.shape_cast %574 : vector<1x1x32xf32> to vector<1x32xf32>
    %576 = vector.broadcast %575 : vector<1x32xf32> to vector<16x32xf32>
    %577 = arith.addf %573, %576 : vector<16x32xf32>
    %c24_281 = arith.constant 24 : index
    %c0_282 = arith.constant 0 : index
    %c0_283 = arith.constant 0 : index
    %578 = vector.load %arg3[%c24_281, %c0_282, %c0_283] : memref<35x32x32xf32, #tpu.memory_space<vmem>>, vector<1x32x32xf32>
    %579 = vector.shape_cast %578 : vector<1x32x32xf32> to vector<32x32xf32>
    %cst_284 = arith.constant dense<0.000000e+00> : vector<16x32xf32>
    %580 = tpu.matmul %435, %579, %cst_284 {dimension_numbers = #tpu.dot_dimension_numbers<[1], [0], [0], [1], [0, 0, 1, 1], [], []>} : vector<16x32xf32>, vector<32x32xf32>, vector<16x32xf32> -> vector<16x32xf32>
    %c42 = arith.constant 42 : index
    %c0_285 = arith.constant 0 : index
    %c0_286 = arith.constant 0 : index
    %581 = vector.load %arg4[%c42, %c0_285, %c0_286] : memref<57x1x32xf32, #tpu.memory_space<vmem>>, vector<1x1x32xf32>
    %582 = vector.shape_cast %581 : vector<1x1x32xf32> to vector<1x32xf32>
    %583 = vector.broadcast %582 : vector<1x32xf32> to vector<16x32xf32>
    %584 = arith.addf %580, %583 : vector<16x32xf32>
    %c25_287 = arith.constant 25 : index
    %c0_288 = arith.constant 0 : index
    %c0_289 = arith.constant 0 : index
    %585 = vector.load %arg3[%c25_287, %c0_288, %c0_289] : memref<35x32x32xf32, #tpu.memory_space<vmem>>, vector<1x32x32xf32>
    %586 = vector.shape_cast %585 : vector<1x32x32xf32> to vector<32x32xf32>
    %cst_290 = arith.constant dense<0.000000e+00> : vector<16x32xf32>
    %587 = tpu.matmul %435, %586, %cst_290 {dimension_numbers = #tpu.dot_dimension_numbers<[1], [0], [0], [1], [0, 0, 1, 1], [], []>} : vector<16x32xf32>, vector<32x32xf32>, vector<16x32xf32> -> vector<16x32xf32>
    %c43 = arith.constant 43 : index
    %c0_291 = arith.constant 0 : index
    %c0_292 = arith.constant 0 : index
    %588 = vector.load %arg4[%c43, %c0_291, %c0_292] : memref<57x1x32xf32, #tpu.memory_space<vmem>>, vector<1x1x32xf32>
    %589 = vector.shape_cast %588 : vector<1x1x32xf32> to vector<1x32xf32>
    %590 = vector.broadcast %589 : vector<1x32xf32> to vector<16x32xf32>
    %591 = arith.addf %587, %590 : vector<16x32xf32>
    %c26_293 = arith.constant 26 : index
    %c0_294 = arith.constant 0 : index
    %c0_295 = arith.constant 0 : index
    %592 = vector.load %arg3[%c26_293, %c0_294, %c0_295] : memref<35x32x32xf32, #tpu.memory_space<vmem>>, vector<1x32x32xf32>
    %593 = vector.shape_cast %592 : vector<1x32x32xf32> to vector<32x32xf32>
    %cst_296 = arith.constant dense<0.000000e+00> : vector<16x32xf32>
    %594 = tpu.matmul %570, %593, %cst_296 {dimension_numbers = #tpu.dot_dimension_numbers<[1], [0], [0], [1], [0, 0, 1, 1], [], []>} : vector<16x32xf32>, vector<32x32xf32>, vector<16x32xf32> -> vector<16x32xf32>
    %595 = tpu.transpose %577, [1, 0] : vector<16x32xf32> -> vector<32x16xf32>
    %cst_297 = arith.constant dense<0.000000e+00> : vector<16x16xf32>
    %596 = tpu.matmul %570, %595, %cst_297 {dimension_numbers = #tpu.dot_dimension_numbers<[1], [0], [0], [1], [0, 0, 1, 1], [], []>} : vector<16x32xf32>, vector<32x16xf32>, vector<16x16xf32> -> vector<16x16xf32>
    %597 = vector.extract_strided_slice %594 {offsets = [0, 0], sizes = [16, 1], strides = [1, 1]} : vector<16x32xf32> to vector<16x1xf32>
    %598 = vector.broadcast %597 : vector<16x1xf32> to vector<16x16xf32>
    %599 = arith.mulf %14, %598 : vector<16x16xf32>
    %600 = arith.addf %596, %599 : vector<16x16xf32>
    %601 = vector.extract_strided_slice %594 {offsets = [0, 1], sizes = [16, 1], strides = [1, 1]} : vector<16x32xf32> to vector<16x1xf32>
    %602 = vector.broadcast %601 : vector<16x1xf32> to vector<16x16xf32>
    %603 = arith.mulf %16, %602 : vector<16x16xf32>
    %604 = arith.addf %600, %603 : vector<16x16xf32>
    %605 = vector.extract_strided_slice %594 {offsets = [0, 2], sizes = [16, 1], strides = [1, 1]} : vector<16x32xf32> to vector<16x1xf32>
    %606 = vector.broadcast %605 : vector<16x1xf32> to vector<16x16xf32>
    %607 = arith.mulf %18, %606 : vector<16x16xf32>
    %608 = arith.addf %604, %607 : vector<16x16xf32>
    %609 = vector.extract_strided_slice %594 {offsets = [0, 3], sizes = [16, 1], strides = [1, 1]} : vector<16x32xf32> to vector<16x1xf32>
    %610 = vector.broadcast %609 : vector<16x1xf32> to vector<16x16xf32>
    %611 = arith.mulf %20, %610 : vector<16x16xf32>
    %612 = arith.addf %608, %611 : vector<16x16xf32>
    %613 = arith.addf %612, %8 : vector<16x16xf32>
    %cst_298 = arith.constant dense<0xFF800000> : vector<16xf32>
    %614 = vector.multi_reduction <maximumf>, %613, %cst_298 [1] : vector<16x16xf32> to vector<16xf32>
    %615 = vector.shape_cast %614 : vector<16xf32> to vector<16x1xf32>
    %616 = vector.broadcast %615 : vector<16x1xf32> to vector<16x16xf32>
    %617 = arith.subf %613, %616 : vector<16x16xf32>
    %618 = math.exp %617 : vector<16x16xf32>
    %cst_299 = arith.constant dense<0.000000e+00> : vector<16xf32>
    %619 = vector.multi_reduction <add>, %618, %cst_299 [1] : vector<16x16xf32> to vector<16xf32>
    %620 = vector.shape_cast %619 : vector<16xf32> to vector<16x1xf32>
    %cst_300 = arith.constant 9.99999968E-21 : f32
    %621 = vector.broadcast %cst_300 : f32 to vector<16x1xf32>
    %622 = arith.maximumf %620, %621 : vector<16x1xf32>
    %623 = tpu.reciprocal %622 {approx = true} : vector<16x1xf32> -> vector<16x1xf32>
    %624 = vector.broadcast %623 : vector<16x1xf32> to vector<16x16xf32>
    %625 = arith.mulf %618, %624 : vector<16x16xf32>
    %626 = arith.mulf %625, %2 : vector<16x16xf32>
    %cst_301 = arith.constant dense<0.000000e+00> : vector<16x32xf32>
    %627 = tpu.matmul %626, %584, %cst_301 {dimension_numbers = #tpu.dot_dimension_numbers<[1], [0], [0], [1], [0, 0, 1, 1], [], []>} : vector<16x16xf32>, vector<16x32xf32>, vector<16x32xf32> -> vector<16x32xf32>
    %628 = arith.mulf %626, %14 : vector<16x16xf32>
    %cst_302 = arith.constant dense<0.000000e+00> : vector<16xf32>
    %629 = vector.multi_reduction <add>, %628, %cst_302 [1] : vector<16x16xf32> to vector<16xf32>
    %630 = vector.shape_cast %629 : vector<16xf32> to vector<16x1xf32>
    %c47 = arith.constant 47 : index
    %c0_303 = arith.constant 0 : index
    %c0_304 = arith.constant 0 : index
    %631 = vector.load %arg4[%c47, %c0_303, %c0_304] : memref<57x1x32xf32, #tpu.memory_space<vmem>>, vector<1x1x32xf32>
    %632 = vector.shape_cast %631 : vector<1x1x32xf32> to vector<1x32xf32>
    %633 = vector.broadcast %630 : vector<16x1xf32> to vector<16x32xf32>
    %634 = vector.broadcast %632 : vector<1x32xf32> to vector<16x32xf32>
    %635 = arith.mulf %633, %634 : vector<16x32xf32>
    %636 = arith.addf %627, %635 : vector<16x32xf32>
    %637 = arith.mulf %626, %16 : vector<16x16xf32>
    %cst_305 = arith.constant dense<0.000000e+00> : vector<16xf32>
    %638 = vector.multi_reduction <add>, %637, %cst_305 [1] : vector<16x16xf32> to vector<16xf32>
    %639 = vector.shape_cast %638 : vector<16xf32> to vector<16x1xf32>
    %c48 = arith.constant 48 : index
    %c0_306 = arith.constant 0 : index
    %c0_307 = arith.constant 0 : index
    %640 = vector.load %arg4[%c48, %c0_306, %c0_307] : memref<57x1x32xf32, #tpu.memory_space<vmem>>, vector<1x1x32xf32>
    %641 = vector.shape_cast %640 : vector<1x1x32xf32> to vector<1x32xf32>
    %642 = vector.broadcast %639 : vector<16x1xf32> to vector<16x32xf32>
    %643 = vector.broadcast %641 : vector<1x32xf32> to vector<16x32xf32>
    %644 = arith.mulf %642, %643 : vector<16x32xf32>
    %645 = arith.addf %636, %644 : vector<16x32xf32>
    %646 = arith.mulf %626, %18 : vector<16x16xf32>
    %cst_308 = arith.constant dense<0.000000e+00> : vector<16xf32>
    %647 = vector.multi_reduction <add>, %646, %cst_308 [1] : vector<16x16xf32> to vector<16xf32>
    %648 = vector.shape_cast %647 : vector<16xf32> to vector<16x1xf32>
    %c49 = arith.constant 49 : index
    %c0_309 = arith.constant 0 : index
    %c0_310 = arith.constant 0 : index
    %649 = vector.load %arg4[%c49, %c0_309, %c0_310] : memref<57x1x32xf32, #tpu.memory_space<vmem>>, vector<1x1x32xf32>
    %650 = vector.shape_cast %649 : vector<1x1x32xf32> to vector<1x32xf32>
    %651 = vector.broadcast %648 : vector<16x1xf32> to vector<16x32xf32>
    %652 = vector.broadcast %650 : vector<1x32xf32> to vector<16x32xf32>
    %653 = arith.mulf %651, %652 : vector<16x32xf32>
    %654 = arith.addf %645, %653 : vector<16x32xf32>
    %655 = arith.mulf %626, %20 : vector<16x16xf32>
    %cst_311 = arith.constant dense<0.000000e+00> : vector<16xf32>
    %656 = vector.multi_reduction <add>, %655, %cst_311 [1] : vector<16x16xf32> to vector<16xf32>
    %657 = vector.shape_cast %656 : vector<16xf32> to vector<16x1xf32>
    %c50 = arith.constant 50 : index
    %c0_312 = arith.constant 0 : index
    %c0_313 = arith.constant 0 : index
    %658 = vector.load %arg4[%c50, %c0_312, %c0_313] : memref<57x1x32xf32, #tpu.memory_space<vmem>>, vector<1x1x32xf32>
    %659 = vector.shape_cast %658 : vector<1x1x32xf32> to vector<1x32xf32>
    %660 = vector.broadcast %657 : vector<16x1xf32> to vector<16x32xf32>
    %661 = vector.broadcast %659 : vector<1x32xf32> to vector<16x32xf32>
    %662 = arith.mulf %660, %661 : vector<16x32xf32>
    %663 = arith.addf %654, %662 : vector<16x32xf32>
    %c44 = arith.constant 44 : index
    %c0_314 = arith.constant 0 : index
    %c0_315 = arith.constant 0 : index
    %664 = vector.load %arg4[%c44, %c0_314, %c0_315] : memref<57x1x32xf32, #tpu.memory_space<vmem>>, vector<1x1x32xf32>
    %665 = vector.shape_cast %664 : vector<1x1x32xf32> to vector<1x32xf32>
    %666 = vector.broadcast %665 : vector<1x32xf32> to vector<16x32xf32>
    %667 = arith.mulf %591, %666 : vector<16x32xf32>
    %cst_316 = arith.constant dense<0.000000e+00> : vector<16xf32>
    %668 = vector.multi_reduction <add>, %667, %cst_316 [1] : vector<16x32xf32> to vector<16xf32>
    %669 = vector.shape_cast %668 : vector<16xf32> to vector<16x1xf32>
    %c45 = arith.constant 45 : index
    %c0_317 = arith.constant 0 : index
    %c0_318 = arith.constant 0 : index
    %670 = vector.load %arg4[%c45, %c0_317, %c0_318] : memref<57x1x32xf32, #tpu.memory_space<vmem>>, vector<1x1x32xf32>
    %671 = vector.shape_cast %670 : vector<1x1x32xf32> to vector<1x32xf32>
    %672 = vector.broadcast %671 : vector<1x32xf32> to vector<16x32xf32>
    %673 = arith.mulf %663, %672 : vector<16x32xf32>
    %cst_319 = arith.constant dense<0.000000e+00> : vector<16xf32>
    %674 = vector.multi_reduction <add>, %673, %cst_319 [1] : vector<16x32xf32> to vector<16xf32>
    %675 = vector.shape_cast %674 : vector<16xf32> to vector<16x1xf32>
    %676 = arith.addf %669, %675 : vector<16x1xf32>
    %677 = arith.subf %591, %663 : vector<16x32xf32>
    %c46 = arith.constant 46 : index
    %c0_320 = arith.constant 0 : index
    %c0_321 = arith.constant 0 : index
    %678 = vector.load %arg4[%c46, %c0_320, %c0_321] : memref<57x1x32xf32, #tpu.memory_space<vmem>>, vector<1x1x32xf32>
    %679 = vector.shape_cast %678 : vector<1x1x32xf32> to vector<1x32xf32>
    %680 = vector.broadcast %679 : vector<1x32xf32> to vector<16x32xf32>
    %681 = arith.mulf %677, %680 : vector<16x32xf32>
    %cst_322 = arith.constant dense<0.000000e+00> : vector<16xf32>
    %682 = vector.multi_reduction <add>, %681, %cst_322 [1] : vector<16x32xf32> to vector<16xf32>
    %683 = vector.shape_cast %682 : vector<16xf32> to vector<16x1xf32>
    %684 = arith.addf %676, %683 : vector<16x1xf32>
    %685 = arith.addf %563, %684 : vector<16x1xf32>
    %cst_323 = arith.constant 0.000000e+00 : f32
    %686 = vector.broadcast %cst_323 : f32 to vector<16x1xf32>
    %687 = arith.subf %686, %685 : vector<16x1xf32>
    %688 = math.exp %687 : vector<16x1xf32>
    %cst_324 = arith.constant 1.000000e+00 : f32
    %689 = vector.broadcast %cst_324 : f32 to vector<16x1xf32>
    %690 = arith.addf %689, %688 : vector<16x1xf32>
    %691 = tpu.reciprocal %690 {approx = true} : vector<16x1xf32> -> vector<16x1xf32>
    %692 = vector.broadcast %691 : vector<16x1xf32> to vector<16x32xf32>
    %693 = arith.mulf %692, %470 : vector<16x32xf32>
    %cst_325 = arith.constant 1.000000e+00 : f32
    %694 = vector.broadcast %cst_325 : f32 to vector<16x1xf32>
    %695 = arith.subf %694, %691 : vector<16x1xf32>
    %696 = vector.broadcast %695 : vector<16x1xf32> to vector<16x32xf32>
    %697 = arith.mulf %696, %542 : vector<16x32xf32>
    %698 = arith.addf %693, %697 : vector<16x32xf32>
    %c21_326 = arith.constant 21 : index
    %c0_327 = arith.constant 0 : index
    %c0_328 = arith.constant 0 : index
    %699 = vector.load %arg3[%c21_326, %c0_327, %c0_328] : memref<35x32x32xf32, #tpu.memory_space<vmem>>, vector<1x32x32xf32>
    %700 = vector.shape_cast %699 : vector<1x32x32xf32> to vector<32x32xf32>
    %cst_329 = arith.constant dense<0.000000e+00> : vector<16x32xf32>
    %701 = tpu.matmul %698, %700, %cst_329 {dimension_numbers = #tpu.dot_dimension_numbers<[1], [0], [0], [1], [0, 0, 1, 1], [], []>} : vector<16x32xf32>, vector<32x32xf32>, vector<16x32xf32> -> vector<16x32xf32>
    %702 = vector.broadcast %691 : vector<16x1xf32> to vector<16x32xf32>
    %703 = arith.mulf %702, %591 : vector<16x32xf32>
    %cst_330 = arith.constant 1.000000e+00 : f32
    %704 = vector.broadcast %cst_330 : f32 to vector<16x1xf32>
    %705 = arith.subf %704, %691 : vector<16x1xf32>
    %706 = vector.broadcast %705 : vector<16x1xf32> to vector<16x32xf32>
    %707 = arith.mulf %706, %663 : vector<16x32xf32>
    %708 = arith.addf %703, %707 : vector<16x32xf32>
    %c27_331 = arith.constant 27 : index
    %c0_332 = arith.constant 0 : index
    %c0_333 = arith.constant 0 : index
    %709 = vector.load %arg3[%c27_331, %c0_332, %c0_333] : memref<35x32x32xf32, #tpu.memory_space<vmem>>, vector<1x32x32xf32>
    %710 = vector.shape_cast %709 : vector<1x32x32xf32> to vector<32x32xf32>
    %cst_334 = arith.constant dense<0.000000e+00> : vector<16x32xf32>
    %711 = tpu.matmul %708, %710, %cst_334 {dimension_numbers = #tpu.dot_dimension_numbers<[1], [0], [0], [1], [0, 0, 1, 1], [], []>} : vector<16x32xf32>, vector<32x32xf32>, vector<16x32xf32> -> vector<16x32xf32>
    %712 = arith.addf %701, %711 : vector<16x32xf32>
    %c52 = arith.constant 52 : index
    %c0_335 = arith.constant 0 : index
    %c0_336 = arith.constant 0 : index
    %713 = vector.load %arg4[%c52, %c0_335, %c0_336] : memref<57x1x32xf32, #tpu.memory_space<vmem>>, vector<1x1x32xf32>
    %714 = vector.shape_cast %713 : vector<1x1x32xf32> to vector<1x32xf32>
    %715 = vector.broadcast %714 : vector<1x32xf32> to vector<16x32xf32>
    %716 = arith.addf %712, %715 : vector<16x32xf32>
    %cst_337 = arith.constant 0.000000e+00 : f32
    %717 = vector.broadcast %cst_337 : f32 to vector<16x32xf32>
    %718 = arith.cmpf ogt, %716, %717 : vector<16x32xf32>
    %cst_338 = arith.constant 0.00999999977 : f32
    %719 = vector.broadcast %cst_338 : f32 to vector<16x32xf32>
    %720 = arith.mulf %719, %716 : vector<16x32xf32>
    %721 = arith.select %718, %716, %720 : vector<16x32xi1>, vector<16x32xf32>
    %cst_339 = arith.constant dense<0.000000e+00> : vector<2x32xf32>
    %722 = tpu.matmul %30, %721, %cst_339 {dimension_numbers = #tpu.dot_dimension_numbers<[1], [0], [0], [1], [0, 0, 1, 1], [], []>} : vector<2x16xf32>, vector<16x32xf32>, vector<2x32xf32> -> vector<2x32xf32>
    %723 = vector.shape_cast %721 : vector<16x32xf32> to vector<1x16x32xf32>
    %724 = vector.shape_cast %32 : vector<2x16xf32> to vector<2x16x1xf32>
    %725 = vector.broadcast %723 : vector<1x16x32xf32> to vector<2x16x32xf32>
    %726 = vector.broadcast %724 : vector<2x16x1xf32> to vector<2x16x32xf32>
    %727 = arith.addf %725, %726 : vector<2x16x32xf32>
    %cst_340 = arith.constant dense<0xFF800000> : vector<2x32xf32>
    %728 = vector.multi_reduction <maximumf>, %727, %cst_340 [1] : vector<2x16x32xf32> to vector<2x32xf32>
    %729 = arith.maximumf %442, %728 : vector<2x32xf32>
    %730 = arith.subf %442, %729 : vector<2x32xf32>
    %731 = math.exp %730 : vector<2x32xf32>
    %732 = arith.subf %728, %729 : vector<2x32xf32>
    %733 = math.exp %732 : vector<2x32xf32>
    %734 = arith.addf %731, %733 : vector<2x32xf32>
    %735 = arith.mulf %731, %442 : vector<2x32xf32>
    %736 = arith.mulf %733, %728 : vector<2x32xf32>
    %737 = arith.addf %735, %736 : vector<2x32xf32>
    %738 = tpu.reciprocal %734 {approx = true} : vector<2x32xf32> -> vector<2x32xf32>
    %739 = arith.mulf %737, %738 : vector<2x32xf32>
    %740 = arith.maximumf %436, %722 : vector<2x32xf32>
    %741 = arith.subf %436, %740 : vector<2x32xf32>
    %742 = math.exp %741 : vector<2x32xf32>
    %743 = arith.subf %722, %740 : vector<2x32xf32>
    %744 = math.exp %743 : vector<2x32xf32>
    %745 = arith.addf %742, %744 : vector<2x32xf32>
    %746 = arith.mulf %742, %436 : vector<2x32xf32>
    %747 = arith.mulf %744, %722 : vector<2x32xf32>
    %748 = arith.addf %746, %747 : vector<2x32xf32>
    %749 = tpu.reciprocal %745 {approx = true} : vector<2x32xf32> -> vector<2x32xf32>
    %750 = arith.mulf %748, %749 : vector<2x32xf32>
    %c28_341 = arith.constant 28 : index
    %c0_342 = arith.constant 0 : index
    %c0_343 = arith.constant 0 : index
    %751 = vector.load %arg3[%c28_341, %c0_342, %c0_343] : memref<35x32x32xf32, #tpu.memory_space<vmem>>, vector<1x32x32xf32>
    %752 = vector.shape_cast %751 : vector<1x32x32xf32> to vector<32x32xf32>
    %cst_344 = arith.constant dense<0.000000e+00> : vector<2x32xf32>
    %753 = tpu.matmul %739, %752, %cst_344 {dimension_numbers = #tpu.dot_dimension_numbers<[1], [0], [0], [1], [0, 0, 1, 1], [], []>} : vector<2x32xf32>, vector<32x32xf32>, vector<2x32xf32> -> vector<2x32xf32>
    %c30_345 = arith.constant 30 : index
    %c0_346 = arith.constant 0 : index
    %c0_347 = arith.constant 0 : index
    %754 = vector.load %arg3[%c30_345, %c0_346, %c0_347] : memref<35x32x32xf32, #tpu.memory_space<vmem>>, vector<1x32x32xf32>
    %755 = vector.shape_cast %754 : vector<1x32x32xf32> to vector<32x32xf32>
    %cst_348 = arith.constant dense<0.000000e+00> : vector<2x32xf32>
    %756 = tpu.matmul %750, %755, %cst_348 {dimension_numbers = #tpu.dot_dimension_numbers<[1], [0], [0], [1], [0, 0, 1, 1], [], []>} : vector<2x32xf32>, vector<32x32xf32>, vector<2x32xf32> -> vector<2x32xf32>
    %757 = arith.addf %753, %756 : vector<2x32xf32>
    %c53 = arith.constant 53 : index
    %c0_349 = arith.constant 0 : index
    %c0_350 = arith.constant 0 : index
    %758 = vector.load %arg4[%c53, %c0_349, %c0_350] : memref<57x1x32xf32, #tpu.memory_space<vmem>>, vector<1x1x32xf32>
    %759 = vector.shape_cast %758 : vector<1x1x32xf32> to vector<1x32xf32>
    %760 = vector.broadcast %759 : vector<1x32xf32> to vector<2x32xf32>
    %761 = arith.addf %757, %760 : vector<2x32xf32>
    %cst_351 = arith.constant 0.000000e+00 : f32
    %762 = vector.broadcast %cst_351 : f32 to vector<2x32xf32>
    %763 = arith.cmpf ogt, %761, %762 : vector<2x32xf32>
    %cst_352 = arith.constant 0.00999999977 : f32
    %764 = vector.broadcast %cst_352 : f32 to vector<2x32xf32>
    %765 = arith.mulf %764, %761 : vector<2x32xf32>
    %766 = arith.select %763, %761, %765 : vector<2x32xi1>, vector<2x32xf32>
    %c29_353 = arith.constant 29 : index
    %c0_354 = arith.constant 0 : index
    %c0_355 = arith.constant 0 : index
    %767 = vector.load %arg3[%c29_353, %c0_354, %c0_355] : memref<35x32x32xf32, #tpu.memory_space<vmem>>, vector<1x32x32xf32>
    %768 = vector.shape_cast %767 : vector<1x32x32xf32> to vector<32x32xf32>
    %cst_356 = arith.constant dense<0.000000e+00> : vector<2x32xf32>
    %769 = tpu.matmul %739, %768, %cst_356 {dimension_numbers = #tpu.dot_dimension_numbers<[1], [0], [0], [1], [0, 0, 1, 1], [], []>} : vector<2x32xf32>, vector<32x32xf32>, vector<2x32xf32> -> vector<2x32xf32>
    %c31_357 = arith.constant 31 : index
    %c0_358 = arith.constant 0 : index
    %c0_359 = arith.constant 0 : index
    %770 = vector.load %arg3[%c31_357, %c0_358, %c0_359] : memref<35x32x32xf32, #tpu.memory_space<vmem>>, vector<1x32x32xf32>
    %771 = vector.shape_cast %770 : vector<1x32x32xf32> to vector<32x32xf32>
    %cst_360 = arith.constant dense<0.000000e+00> : vector<2x32xf32>
    %772 = tpu.matmul %750, %771, %cst_360 {dimension_numbers = #tpu.dot_dimension_numbers<[1], [0], [0], [1], [0, 0, 1, 1], [], []>} : vector<2x32xf32>, vector<32x32xf32>, vector<2x32xf32> -> vector<2x32xf32>
    %773 = arith.addf %769, %772 : vector<2x32xf32>
    %c54 = arith.constant 54 : index
    %c0_361 = arith.constant 0 : index
    %c0_362 = arith.constant 0 : index
    %774 = vector.load %arg4[%c54, %c0_361, %c0_362] : memref<57x1x32xf32, #tpu.memory_space<vmem>>, vector<1x1x32xf32>
    %775 = vector.shape_cast %774 : vector<1x1x32xf32> to vector<1x32xf32>
    %776 = vector.broadcast %775 : vector<1x32xf32> to vector<2x32xf32>
    %777 = arith.addf %773, %776 : vector<2x32xf32>
    %cst_363 = arith.constant 0.000000e+00 : f32
    %778 = vector.broadcast %cst_363 : f32 to vector<2x32xf32>
    %779 = arith.cmpf ogt, %777, %778 : vector<2x32xf32>
    %cst_364 = arith.constant 0.00999999977 : f32
    %780 = vector.broadcast %cst_364 : f32 to vector<2x32xf32>
    %781 = arith.mulf %780, %777 : vector<2x32xf32>
    %782 = arith.select %779, %777, %781 : vector<2x32xi1>, vector<2x32xf32>
    %c32_365 = arith.constant 32 : index
    %c0_366 = arith.constant 0 : index
    %c0_367 = arith.constant 0 : index
    %783 = vector.load %arg3[%c32_365, %c0_366, %c0_367] : memref<35x32x32xf32, #tpu.memory_space<vmem>>, vector<1x32x32xf32>
    %784 = vector.shape_cast %783 : vector<1x32x32xf32> to vector<32x32xf32>
    %cst_368 = arith.constant dense<0.000000e+00> : vector<2x32xf32>
    %785 = tpu.matmul %766, %784, %cst_368 {dimension_numbers = #tpu.dot_dimension_numbers<[1], [0], [0], [1], [0, 0, 1, 1], [], []>} : vector<2x32xf32>, vector<32x32xf32>, vector<2x32xf32> -> vector<2x32xf32>
    %c33_369 = arith.constant 33 : index
    %c0_370 = arith.constant 0 : index
    %c0_371 = arith.constant 0 : index
    %786 = vector.load %arg3[%c33_369, %c0_370, %c0_371] : memref<35x32x32xf32, #tpu.memory_space<vmem>>, vector<1x32x32xf32>
    %787 = vector.shape_cast %786 : vector<1x32x32xf32> to vector<32x32xf32>
    %cst_372 = arith.constant dense<0.000000e+00> : vector<2x32xf32>
    %788 = tpu.matmul %782, %787, %cst_372 {dimension_numbers = #tpu.dot_dimension_numbers<[1], [0], [0], [1], [0, 0, 1, 1], [], []>} : vector<2x32xf32>, vector<32x32xf32>, vector<2x32xf32> -> vector<2x32xf32>
    %789 = arith.addf %785, %788 : vector<2x32xf32>
    %c55 = arith.constant 55 : index
    %c0_373 = arith.constant 0 : index
    %c0_374 = arith.constant 0 : index
    %790 = vector.load %arg4[%c55, %c0_373, %c0_374] : memref<57x1x32xf32, #tpu.memory_space<vmem>>, vector<1x1x32xf32>
    %791 = vector.shape_cast %790 : vector<1x1x32xf32> to vector<1x32xf32>
    %792 = vector.broadcast %791 : vector<1x32xf32> to vector<2x32xf32>
    %793 = arith.addf %789, %792 : vector<2x32xf32>
    %cst_375 = arith.constant 0.000000e+00 : f32
    %794 = vector.broadcast %cst_375 : f32 to vector<2x32xf32>
    %795 = arith.cmpf ogt, %793, %794 : vector<2x32xf32>
    %cst_376 = arith.constant 0.00999999977 : f32
    %796 = vector.broadcast %cst_376 : f32 to vector<2x32xf32>
    %797 = arith.mulf %796, %793 : vector<2x32xf32>
    %798 = arith.select %795, %793, %797 : vector<2x32xi1>, vector<2x32xf32>
    %c34_377 = arith.constant 34 : index
    %c0_378 = arith.constant 0 : index
    %c0_379 = arith.constant 0 : index
    %799 = vector.load %arg3[%c34_377, %c0_378, %c0_379] : memref<35x32x32xf32, #tpu.memory_space<vmem>>, vector<1x32x32xf32>
    %800 = vector.shape_cast %799 : vector<1x32x32xf32> to vector<32x32xf32>
    %cst_380 = arith.constant dense<0.000000e+00> : vector<2x32xf32>
    %801 = tpu.matmul %798, %800, %cst_380 {dimension_numbers = #tpu.dot_dimension_numbers<[1], [0], [0], [1], [0, 0, 1, 1], [], []>} : vector<2x32xf32>, vector<32x32xf32>, vector<2x32xf32> -> vector<2x32xf32>
    %c56 = arith.constant 56 : index
    %c0_381 = arith.constant 0 : index
    %c0_382 = arith.constant 0 : index
    %802 = vector.load %arg4[%c56, %c0_381, %c0_382] : memref<57x1x32xf32, #tpu.memory_space<vmem>>, vector<1x1x32xf32>
    %803 = vector.shape_cast %802 : vector<1x1x32xf32> to vector<1x32xf32>
    %804 = vector.broadcast %803 : vector<1x32xf32> to vector<2x32xf32>
    %805 = arith.addf %801, %804 : vector<2x32xf32>
    %806 = vector.extract_strided_slice %805 {offsets = [0, 0], sizes = [2, 3], strides = [1, 1]} : vector<2x32xf32> to vector<2x3xf32>
    %c0_383 = arith.constant 0 : index
    %c0_384 = arith.constant 0 : index
    %807 = vector.load %arg5[%c0_383, %c0_384] : memref<2x3xf32, #tpu.memory_space<vmem>>, vector<2x3xf32>
    tpu.vector_store %arg5[%c0_383, %c0_384], %806 {strides = array<i32>} : memref<2x3xf32, #tpu.memory_space<vmem>>, vector<2x3xf32>,
    return
  }
}

</mosaic_0001>

<bundles_post_ra>
// kernel: pkgnn_forward.1
= control target key start
LH: loop header
LB: loop body
LE: loop exit
PB: predicated region body
PF: predicated region fallthrough
CT: control target
= control target key end

     0   :  { %vm67_vm0 = vcmask 261120   ;;  %s8479_s0 = inlined_call_operand.vmem [shape: f32[16,32], index: 0, kind: input, shape index: {}]   ;;  %s8480_s1 = inlined_call_operand.vmem [shape: f32[10,16,16], index: 1, kind: input, shape index: {}]   ;;  %s8481_s2 = inlined_call_operand.vmem [shape: f32[2,2,16], index: 2, kind: input, shape index: {}]   ;;  %s8482_s3 = inlined_call_operand.vmem [shape: f32[35,32,32], index: 3, kind: input, shape index: {}]   ;;  %s8483_s4 = inlined_call_operand.vmem [shape: f32[57,1,32], index: 4, kind: input, shape index: {}]   ;;  %s8484_s5 = inlined_call_operand.hbm [shape: f32[2,3], index: 5, kind: output, shape index: {}]  }
   0x1   :  { %v63_v0 = vld [vmem:[%s8482_s3] sm:$0xff]  ;;  %v64_v1 = vld [vmem:[%s8482_s3 + $0x8] sm:$0xff]  ;;  %v65_v2 = vld [vmem:[%s8482_s3 + $0x10] sm:$0xff] }
   0x2   :  { %v6561_v3 = vpack.c.bf16 %v64_v1, %v63_v0  ;;  %v66_v4 = vld [vmem:[%s8482_s3 + $0x18] sm:$0xff]  ;;  %v21_v5 = vld [vmem:[%s8479_s0] sm:$0xff] }
   0x3   :  { %v6565_v6 = vpack.c.bf16 %v66_v4, %v65_v2  ;;  %6086 = vmatprep.mubr.msk.f32.mxu0 %vm67_vm0, %v21_v5 }
   0x4   :  { %10 = vsyncpa [#allocation3], 0  ;;  %6562 = vmatprep.subr.bf16.mxu0 %v6561_v3  ;;  %v22_v7 = vld [vmem:[%s8479_s0 + $0x8] sm:$0xff]  ;;  %v7055_v8 = vmov 0.0|0.0   ;;  %vm7056_vm1 = vmmov 0   ;;  %v7057_v9 = vmov 0.0   ;;  %v282_v39 = vlaneseq }
   0x5   :  { %6564 = vmatpush3.bf16.msra.mxu0 %v6561_v3  ;;  %6569 = vmatprep.subr.bf16.mxu1 %v7055_v8  ;;  %v5485_v10 = vld [vmem:[%s8483_s4 + $0x4] ss:$0 sm:$0xff]  ;;  %v7058_v11 = vmov 0   ;;  %v7059_v12 = vmov 2   ;;  %v7060_v13 = vmov 1   ;;  %v7061_v14 = vmov 3   ;;  %vm7129_vm2 = vmpackc.low %vm67_vm0, %vm67_vm0 }
   0x6   :  { %6566 = vmatprep.subr.bf16.mxu0 %v6565_v6  ;;  %6093 = vmatprep.mubr.msk.f32.mxu1 %vm7056_vm1, %v7057_v9  ;;  %v5480_v15 = vld [vmem:[%s8483_s4 + $0x2] ss:$0 sm:$0xff]  ;;  %v165_v24 = vld [vmem:[%s8483_s4] sm:$0x1]  ;;  %v5493_v26 = vld [vmem:[%s8482_s3 + $0x28] sm:$0xff]  ;;  %v7190_v47 = vshrl.u32 %v282_v39, 7 }
   0x7   :  { %6903 = vset.pattern.permute.xlu1 %v7058_v11  ;;  %6905 = vset.pattern.permute.xlu0 %v7059_v12  ;;  %v5492_v25 = vld [vmem:[%s8482_s3 + $0x20] sm:$0xff]  ;;  %v5494_v27 = vld [vmem:[%s8482_s3 + $0x30] sm:$0xff]  ;;  %v5495_v29 = vld [vmem:[%s8482_s3 + $0x38] sm:$0xff]  ;;  %vm298_vm5 = vcmask 130048   ;;  %vm4936_vm14 = vcmask 1041409  }
   0x8   :  { %253 = vperm.xlu1 %6903, %v5485_v10   ;;  %v6577_v28 = vpack.c.bf16 %v5493_v26, %v5492_v25  ;;  %v6581_v30 = vpack.c.bf16 %v5495_v29, %v5494_v27  ;;  %v7159_v33 = vld [vmem:[%s8480_s1 + $0x60] sm:$0xff]  ;;  %v7164_v35 = vld [vmem:[%s8480_s1 + $0x68] sm:$0xff]  ;;  %v7169_v37 = vld [vmem:[%s8480_s1 + $0x70] sm:$0xff]  ;;  %v7205_v55 = vsub.s32 0, %v7190_v47 }
   0x9   :  { %6568 = vmatpush3.bf16.msra.mxu0 %v6565_v6  ;;  %v7174_v38 = vld [vmem:[%s8480_s1 + $0x78] sm:$0xff]  ;;  %v7183_v44 = vld [vmem:[%s8480_s1 + $0x80] sm:$0xff]  ;;  %v7188_v45 = vld [vmem:[%s8480_s1 + $0x88] sm:$0xff] }
   0xa   :  { %v7197_v53 = vld [vmem:[%s8480_s1 + $0x90] sm:$0xff]  ;;  %v7202_v54 = vld [vmem:[%s8480_s1 + $0x98] sm:$0xff]  ;;  %v7981_v19 = vld [vmem:[%s8480_s1 + $0x20] sm:$0xff] }
   0xb   :  { %v7212_v60 = vld [vmem:[%s8480_s1 + $0x10] sm:$0xff]  ;;  %v7218_v0 = vld [vmem:[%s8480_s1 + $0x18] sm:$0xff] }
   0xc   :  { %6087 = vmatmul.mubr.msk.f32.vlgmr.msra.gmra.mrb[0].mxu0 %vm67_vm0, %v22_v7  ;;  %6904 = vset.pattern.permute.xlu1 %v7060_v13  ;;  %v5458_v1 = vadd.f32 -1.0, %v7212_v60  ;;  %v5459_v6 = vadd.f32 -1.0, %v7218_v0 }
   0xd   :  { %259 = vperm.xlu1 %6904, %v5485_v10  }
  0x11   :  { %6906 = vset.pattern.permute.xlu1 %v7061_v14 }
  0x12   :  { %275 = vperm.xlu1 %6906, %v5485_v10  }
  0x16   :  { %6907 = vset.pattern.permute.xlu1 %v7058_v11 }
  0x87   :  { %v254_v32 = vpop.permute.xlu1 %253 }
  0x88   :  { %v256_v40 = vmul.f32 %v7159_v33, %v254_v32  ;;  %v257_v41 = vmul.f32 %v7164_v35, %v254_v32 }
  0x8c   :  { %v260_v36 = vpop.permute.xlu1 %259 }
  0x8d   :  { %v262_v42 = vmul.f32 %v7169_v37, %v260_v36  ;;  %v263_v43 = vmul.f32 %v7174_v38, %v260_v36 }
  0x8f   :  { %v264_v48 = vadd.f32 %v262_v42, %v256_v40  ;;  %v265_v49 = vadd.f32 %v263_v43, %v257_v41  ;;  %v5499_v40 = vld [vmem:[%s8483_s4 + $0x3] ss:$0 sm:$0xff] }
  0x91   :  { %v276_v52 = vpop.permute.xlu1 %275 }
  0x92   :  { %v278_v58 = vmul.f32 %v7197_v53, %v276_v52  ;;  %v279_v59 = vmul.f32 %v7202_v54, %v276_v52 }
  0xdf   :  { %v6088_v16 = vpop.f32.mrb[0].mxu0 }
  0xe0   :  { %v140_v17 = vpop.f32.mrb[1].mxu0  ;;  %v158_v18 = vmul.f32 %v6088_v16, %v5480_v15 }
  0xe1   :  { %v6570_v20 = vpack.c.bf16 %v6088_v16, %v140_v17  ;;  %v157_v21 = vmul.f32 %v5480_v15, %v140_v17  ;;  %v7222_v15 = vmul.f32 1e+30, %v5458_v1 }
  0xe2   :  { %v162_v22 = vsel %vm67_vm0, %v158_v18, 0.0  ;;  %v7224_v18 = vmul.f32 1e+30, %v5459_v6 }
  0xe3   :  { %163 = vadd.xlane.f32.xlu0 %v162_v22  ;;  %6572 = vmatpush3.bf16.xpose.msk.msra.mxu1 %vm7129_vm2, %v6570_v20  ;;  %v159_v23 = vsel %vm67_vm0, %v157_v21, 0.0 }
  0xe4   :  { %6574 = vmatprep.subr.bf16.mxu0 %v6570_v20  ;;  %6578 = vmatprep.subr.bf16.mxu1 %v6577_v28 }
  0xe5   :  { %6576 = vmatpush3.bf16.msra.mxu0 %v6570_v20 }
  0xe6   :  { %6585 = vmatprep.subr.bf16.mxu0 %v7055_v8 }
  0xe7   :  { %160 = vadd.xlane.f32.xlu0 %v159_v23 }
  0xea   :  { %6094 = vmatmul.mubr.msk.f32.vlgmr.msra.gmra.mrb[0].mxu1 %vm67_vm0, %v165_v24 }
  0xeb   :  { %6111 = vmatprep.mubr.msk.f32.mxu1 %vm67_vm0, %v21_v5  ;;  %6580 = vmatpush3.bf16.msra.mxu1 %v6577_v28 }
  0xec   :  { %6582 = vmatprep.subr.bf16.mxu1 %v6581_v30 }
  0xef   :  { %6584 = vmatpush3.bf16.msra.mxu1 %v6581_v30 }
  0xf2   :  { %6112 = vmatmul.mubr.msk.f32.vlgmr.msra.gmra.mrb[2].mxu1 %vm67_vm0, %v22_v7 }
  0xfd   :  { %267 = vperm.xlu0 %6905, %v5485_v10  }
 0x170   :  { %v164_v31 = vpop.xlane.xlu0 %163 }
 0x174   :  { %v161_v34 = vpop.xlane.xlu0 %160 }
 0x17c   :  { %v268_v46 = vpop.permute.xlu0 %267 }
 0x17d   :  { %v270_v50 = vmul.f32 %v7183_v44, %v268_v46  ;;  %v271_v51 = vmul.f32 %v7188_v45, %v268_v46 }
 0x17f   :  { %v272_v56 = vadd.f32 %v270_v50, %v264_v48  ;;  %v273_v57 = vadd.f32 %v271_v51, %v265_v49  ;;  %v5505_v51 = vld [vmem:[%s8483_s4 + $0x5] ss:$0 sm:$0xff] }
 0x181   :  { %v280_v2 = vadd.f32 %v278_v58, %v272_v56  ;;  %v281_v3 = vadd.f32 %v279_v59, %v273_v57 }
 0x1bd   :  { %v241_v61 = vpop.f32.mrb[0].mxu1 }
 0x1be   :  { %v285_v62 = vrot.slane %v241_v61, %v7205_v55  ;;  %v6095_v63 = vpop.f32.mrb[1].mxu1 }
 0x1c0   :  { %v286_v4 = vadd.f32 %v285_v62, %v161_v34  ;;  %v287_v5 = vadd.f32 %v285_v62, %v164_v31 }
 0x1c2   :  { %v288_v7 = vadd.f32 %v286_v4, %v280_v2  ;;  %v289_v10 = vadd.f32 %v287_v5, %v281_v3  ;;  %v5500_v3 = vld [vmem:[%s8483_s4 + $0x1] sm:$0x1] }
 0x1c4   :  { %vm290_vm3 = vcmp.gt.f32.partialorder %v288_v7, 0.0  ;;  %v292_v16 = vmul.f32 0.2, %v288_v7  ;;  %vm291_vm4 = vcmp.gt.f32.partialorder %v289_v10, 0.0  ;;  %v293_v17 = vmul.f32 0.2, %v289_v10 }
 0x1c5   :  { %v6113_v26 = vpop.f32.mrb[2].mxu1 }
 0x1c6   :  { %v294_v20 = vsel %vm290_vm3, %v288_v7, %v292_v16  ;;  %v295_v21 = vsel %vm291_vm4, %v289_v10, %v293_v17  ;;  %v482_v27 = vpop.f32.mrb[3].mxu1  ;;  %v500_v48 = vmul.f32 %v6113_v26, %v5499_v40  ;;  %vm5438_vm3 = vcmask 17408  }
 0x1c7   :  { %v296_v22 = vadd.f32 %v294_v20, %v7222_v15  ;;  %v297_v24 = vadd.f32 %v295_v21, %v7224_v18  ;;  %v6586_v28 = vpack.c.bf16 %v6113_v26, %v482_v27  ;;  %v499_v42 = vmul.f32 %v5499_v40, %v482_v27 }
 0x1c8   :  { %v504_v50 = vsel %vm67_vm0, %v500_v48, 0.0 }
 0x1c9   :  { %v299_v23 = vsel %vm298_vm5, %v296_v22, -inf  ;;  %v302_v25 = vsel %vm298_vm5, %v297_v24, -inf  ;;  %6590 = vmatprep.subr.bf16.mxu1 %v6586_v28  ;;  %v501_v49 = vsel %vm67_vm0, %v499_v42, 0.0 }
 0x1ca   :  { %300 = vmax.xlane.f32.xlu1 %v299_v23  ;;  %6592 = vmatpush3.bf16.msra.mxu1 %v6586_v28 }
 0x1ce   :  { %303 = vmax.xlane.f32.xlu1 %v302_v25 }
 0x257   :  { %v301_v29 = vpop.xlane.xlu1 %300 }
 0x258   :  { %v305_v30 = vsub.f32 %v296_v22, %v301_v29 }
 0x25a   :  { %v307_v31 = vmul.f32 1.442695, %v305_v30 }
 0x25b   :  { %v304_v32 = vpop.xlane.xlu1 %303 }
 0x25c   :  { %6938 = vpow2.f32 %v307_v31  ;;  %v306_v34 = vsub.f32 %v297_v24, %v304_v32 }
 0x25e   :  { %v309_v36 = vmul.f32 1.442695, %v306_v34 }
 0x260   :  { %6940 = vpow2.f32 %v309_v36 }
 0x266   :  { %v6939_v39 = vpop.eup %6938 }
 0x267   :  { %v311_v41 = vsel %vm298_vm5, %v6939_v39, 0.0 }
 0x268   :  { %312 = vadd.xlane.f32.xlu0 %v311_v41 }
 0x26a   :  { %v6941_v43 = vpop.eup %6940 }
 0x26b   :  { %v314_v46 = vsel %vm298_vm5, %v6941_v43, 0.0 }
 0x26c   :  { %315 = vadd.xlane.f32.xlu1 %v314_v46 }
 0x270   :  { %502 = vadd.xlane.f32.xlu1 %v501_v49 }
 0x274   :  { %505 = vadd.xlane.f32.xlu1 %v504_v50 }
 0x27e   :  { %610 = vperm.xlu0 %6905, %v5505_v51  }
 0x282   :  { %6910 = vset.pattern.permute.xlu0 %v7058_v11 }
 0x285   :  { %596 = vperm.xlu1 %6907, %v5505_v51  }
 0x289   :  { %6908 = vset.pattern.permute.xlu1 %v7060_v13 }
 0x28a   :  { %602 = vperm.xlu1 %6908, %v5505_v51  }
 0x28e   :  { %6909 = vset.pattern.permute.xlu1 %v7061_v14 }
 0x28f   :  { %618 = vperm.xlu1 %6909, %v5505_v51  }
 0x293   :  { %6911 = vset.pattern.permute.xlu1 %v7060_v13 }
 0x2f5   :  { %v313_v52 = vpop.xlane.xlu0 %312 }
 0x2f6   :  { %v317_v56 = vmax.f32 %v313_v52, 1e-20 }
 0x2f8   :  { %6942 = vrcp.f32 %v317_v56 }
 0x2f9   :  { %v316_v57 = vpop.xlane.xlu1 %315 }
 0x2fa   :  { %v318_v58 = vmax.f32 %v316_v57, 1e-20 }
 0x2fc   :  { %6944 = vrcp.f32 %v318_v58 }
 0x2fd   :  { %v503_v4 = vpop.xlane.xlu1 %502  ;;  %v611_v23 = vpop.permute.xlu0 %610 }
 0x2fe   :  { %v613_v27 = vmul.f32 %v7183_v44, %v611_v23 }
 0x301   :  { %v506_v5 = vpop.xlane.xlu1 %505 }
 0x302   :  { %v6943_v59 = vpop.eup %6942 }
 0x303   :  { %v321_v61 = vmul.f32 %v6943_v59, %v6939_v39 }
 0x305   :  { %v323_v62 = vmul.f32 %v7212_v60, %v321_v61  ;;  %v597_v6 = vpop.permute.xlu1 %596  ;;  %v5508_v61 = vld [vmem:[%s8482_s3 + $0x60] sm:$0xff] }
 0x306   :  { %v6945_v63 = vpop.eup %6944  ;;  %v599_v10 = vmul.f32 %v7159_v33, %v597_v6  ;;  %v600_v16 = vmul.f32 %v7164_v35, %v597_v6 }
 0x307   :  { %v322_v1 = vmul.f32 %v6945_v63, %v6941_v43  ;;  %6100 = vmatprep.mubr.msk.f32.mxu0 %vm298_vm5, %v323_v62  ;;  %v5509_v62 = vld [vmem:[%s8482_s3 + $0x68] sm:$0xff]  ;;  %v5510_v63 = vld [vmem:[%s8482_s3 + $0x70] sm:$0xff] }
 0x309   :  { %v324_v2 = vmul.f32 %v7218_v0, %v322_v1  ;;  %v603_v7 = vpop.permute.xlu1 %602  ;;  %v6593_v1 = vpack.c.bf16 %v5509_v62, %v5508_v61  ;;  %v5543_v61 = vld [vmem:[%s8482_s3 + $0xe8] sm:$0xff] }
 0x30a   :  { %v605_v17 = vmul.f32 %v7169_v37, %v603_v7  ;;  %v606_v20 = vmul.f32 %v7174_v38, %v603_v7 }
 0x30b   :  { %6101 = vmatmul.mubr.msk.f32.vlgmr.msra.gmra.mrb[2].mxu0 %vm298_vm5, %v324_v2  ;;  %v5511_v2 = vld [vmem:[%s8482_s3 + $0x78] sm:$0xff] }
 0x30c   :  { %6588 = vmatpush3.bf16.xpose.msk.msra.mxu0 %vm7129_vm2, %v6586_v28  ;;  %6118 = vmatprep.mubr.msk.f32.mxu0 %vm7056_vm1, %v7057_v9  ;;  %v607_v24 = vadd.f32 %v605_v17, %v599_v10  ;;  %v608_v25 = vadd.f32 %v606_v20, %v600_v16  ;;  %v614_v28 = vmul.f32 %v7188_v45, %v611_v23 }
 0x30d   :  { %6594 = vmatprep.subr.bf16.mxu0 %v6593_v1 }
 0x30e   :  { %v619_v26 = vpop.permute.xlu1 %618  ;;  %v615_v29 = vadd.f32 %v613_v27, %v607_v24  ;;  %v616_v33 = vadd.f32 %v614_v28, %v608_v25  ;;  %v5488_v25 = vld [vmem:[%s8482_s3 + $0x40] sm:$0xff] }
 0x30f   :  { %v621_v35 = vmul.f32 %v7197_v53, %v619_v26  ;;  %v622_v37 = vmul.f32 %v7202_v54, %v619_v26  ;;  %v5489_v26 = vld [vmem:[%s8482_s3 + $0x48] sm:$0xff] }
 0x310   :  { %v6601_v27 = vpack.c.bf16 %v5489_v26, %v5488_v25 }
 0x311   :  { %v623_v32 = vadd.f32 %v621_v35, %v615_v29  ;;  %v624_v34 = vadd.f32 %v622_v37, %v616_v33  ;;  %v5490_v29 = vld [vmem:[%s8482_s3 + $0x50] sm:$0xff]  ;;  %v5491_v33 = vld [vmem:[%s8482_s3 + $0x58] sm:$0xff] }
 0x313   :  { %6119 = vmatmul.mubr.msk.f32.vlgmr.msra.gmra.mrb[4].mxu0 %vm67_vm0, %v5500_v3  ;;  %v6597_v3 = vpack.c.bf16 %v5511_v2, %v5510_v63  ;;  %v5544_v63 = vld [vmem:[%s8482_s3 + $0xf0] sm:$0xff] }
 0x314   :  { %6596 = vmatpush3.bf16.msra.mxu0 %v6593_v1  ;;  %v5545_v1 = vld [vmem:[%s8482_s3 + $0xf8] sm:$0xff] }
 0x315   :  { %6598 = vmatprep.subr.bf16.mxu0 %v6597_v3  ;;  %v6637_v2 = vpack.c.bf16 %v5545_v1, %v5544_v63 }
 0x318   :  { %6600 = vmatpush3.bf16.msra.mxu0 %v6597_v3  ;;  %v5552_v3 = vld [vmem:[%s8482_s3 + $0x110] sm:$0xff] }
 0x319   :  { %6602 = vmatprep.subr.bf16.mxu0 %v6601_v27 }
 0x3de   :  { %v7260_v21 = vpop.f32.mrb[2].mxu0 }
 0x3df   :  { %v7262_v22 = vpop.f32.mrb[3].mxu0 }
 0x3e6   :  { %v584_v30 = vpop.f32.mrb[4].mxu0 }
 0x3e7   :  { %v628_v38 = vrot.slane %v584_v30, %v7205_v55  ;;  %v6120_v31 = vpop.f32.mrb[5].mxu0  ;;  %v6605_v30 = vpack.c.bf16 %v5491_v33, %v5490_v29  ;;  %v5576_v33 = vld [vmem:[%s8482_s3 + $0x140] sm:$0xff] }
 0x3e8   :  { %v5535_v31 = vld [vmem:[%s8482_s3 + $0xc8] sm:$0xff] }
 0x3e9   :  { %v629_v36 = vadd.f32 %v628_v38, %v503_v4  ;;  %v630_v39 = vadd.f32 %v628_v38, %v506_v5  ;;  %v5534_v38 = vld [vmem:[%s8482_s3 + $0xc0] sm:$0xff] }
 0x3eb   :  { %v631_v40 = vadd.f32 %v629_v36, %v623_v32  ;;  %v632_v41 = vadd.f32 %v630_v39, %v624_v34  ;;  %v6625_v32 = vpack.c.bf16 %v5535_v31, %v5534_v38  ;;  %v5520_v34 = vld [vmem:[%s8482_s3 + $0x90] sm:$0xff]  ;;  %v5537_v39 = vld [vmem:[%s8482_s3 + $0xd8] sm:$0xff] }
 0x3ec   :  { %v5536_v36 = vld [vmem:[%s8482_s3 + $0xd0] sm:$0xff] }
 0x3ed   :  { %vm634_vm6 = vcmp.gt.f32.partialorder %v632_v41, 0.0  ;;  %v636_v44 = vmul.f32 0.2, %v632_v41  ;;  %vm633_vm7 = vcmp.gt.f32.partialorder %v631_v40, 0.0  ;;  %v635_v45 = vmul.f32 0.2, %v631_v40 }
 0x3ef   :  { %v638_v42 = vsel %vm634_vm6, %v632_v41, %v636_v44  ;;  %v637_v43 = vsel %vm633_vm7, %v631_v40, %v635_v45  ;;  %v6629_v40 = vpack.c.bf16 %v5537_v39, %v5536_v36  ;;  %v5526_v41 = vld [vmem:[%s8482_s3 + $0xa0] sm:$0xff]  ;;  %v5527_v44 = vld [vmem:[%s8482_s3 + $0xa8] sm:$0xff] }
 0x3f0   :  { %v640_v53 = vadd.f32 %v638_v42, %v7224_v18  ;;  %v639_v54 = vadd.f32 %v637_v43, %v7222_v15  ;;  %v6617_v45 = vpack.c.bf16 %v5527_v44, %v5526_v41  ;;  %v5550_v42 = vld [vmem:[%s8482_s3 + $0x100] sm:$0xff]  ;;  %v5551_v43 = vld [vmem:[%s8482_s3 + $0x108] sm:$0xff]  ;;  %v5594_v41 = vld [vmem:[%s8482_s3 + $0x190] sm:$0xff] }
 0x3f1   :  { %v5592_v36 = vld [vmem:[%s8482_s3 + $0x180] sm:$0xff]  ;;  %v5593_v39 = vld [vmem:[%s8482_s3 + $0x188] sm:$0xff]  ;;  %v5595_v44 = vld [vmem:[%s8482_s3 + $0x198] sm:$0xff] }
 0x3f2   :  { %v644_v46 = vsel %vm298_vm5, %v640_v53, -inf  ;;  %v641_v48 = vsel %vm298_vm5, %v639_v54, -inf }
 0x3f3   :  { %645 = vmax.xlane.f32.xlu0 %v644_v46  ;;  %642 = vmax.xlane.f32.xlu1 %v641_v48 }
 0x480   :  { %v646_v49 = vpop.xlane.xlu0 %645  ;;  %v643_v50 = vpop.xlane.xlu1 %642 }
 0x481   :  { %v648_v51 = vsub.f32 %v640_v53, %v646_v49  ;;  %v647_v52 = vsub.f32 %v639_v54, %v643_v50  ;;  %v6641_v53 = vpack.c.bf16 %v5551_v43, %v5550_v42  ;;  %v5517_v54 = vld [vmem:[%s8483_s4 + $0x6] ss:$0 sm:$0xff]  ;;  %v5609_v43 = vld [vmem:[%s8482_s3 + $0x1c8] sm:$0xff] }
 0x482   :  { %v5608_v42 = vld [vmem:[%s8482_s3 + $0x1c0] sm:$0xff] }
 0x483   :  { %v649_v56 = vmul.f32 1.442695, %v647_v52  ;;  %v651_v57 = vmul.f32 1.442695, %v648_v51  ;;  %v5528_v52 = vld [vmem:[%s8482_s3 + $0xb0] sm:$0xff] }
 0x485   :  { %6946 = vpow2.f32 %v649_v56  ;;  %v5529_v56 = vld [vmem:[%s8482_s3 + $0xb8] sm:$0xff] }
 0x486   :  { %6948 = vpow2.f32 %v651_v57 }
 0x48f   :  { %v6947_v58 = vpop.eup %6946 }
 0x490   :  { %v653_v59 = vsel %vm298_vm5, %v6947_v58, 0.0  ;;  %v6949_v18 = vpop.eup %6948 }
 0x491   :  { %654 = vadd.xlane.f32.xlu1 %v653_v59  ;;  %v656_v15 = vsel %vm298_vm5, %v6949_v18, 0.0  ;;  %v6621_v59 = vpack.c.bf16 %v5529_v56, %v5528_v52  ;;  %v5581_v56 = vld [vmem:[%s8483_s4 + $0x12] ss:$0 sm:$0xff] }
 0x495   :  { %657 = vadd.xlane.f32.xlu1 %v656_v15  ;;  %v5542_v15 = vld [vmem:[%s8482_s3 + $0xe0] sm:$0xff] }
 0x496   :  { %v6633_v62 = vpack.c.bf16 %v5543_v61, %v5542_v15 }
 0x51e   :  { %v655_v4 = vpop.xlane.xlu1 %654 }
 0x51f   :  { %v659_v5 = vmax.f32 %v655_v4, 1e-20  ;;  %v5553_v4 = vld [vmem:[%s8482_s3 + $0x118] sm:$0xff] }
 0x521   :  { %6950 = vrcp.f32 %v659_v5  ;;  %v6645_v5 = vpack.c.bf16 %v5553_v4, %v5552_v3 }
 0x522   :  { %v658_v6 = vpop.xlane.xlu1 %657 }
 0x523   :  { %v660_v7 = vmax.f32 %v658_v6, 1e-20  ;;  %v5539_v6 = vld [vmem:[%s8483_s4 + $0x9] ss:$0 sm:$0xff] }
 0x525   :  { %6952 = vrcp.f32 %v660_v7  ;;  %v5523_v7 = vld [vmem:[%s8483_s4 + $0x7] ss:$0 sm:$0xff] }
 0x52b   :  { %v6951_v10 = vpop.eup %6950 }
 0x52c   :  { %v663_v16 = vmul.f32 %v6951_v10, %v6947_v58 }
 0x52e   :  { %v665_v17 = vmul.f32 %v7212_v60, %v663_v16  ;;  %v5518_v60 = vld [vmem:[%s8482_s3 + $0x80] sm:$0xff] }
 0x52f   :  { %v6953_v20 = vpop.eup %6952 }
 0x530   :  { %v664_v23 = vmul.f32 %v6953_v20, %v6949_v18  ;;  %6125 = vmatprep.mubr.msk.f32.mxu1 %vm298_vm5, %v665_v17 }
 0x532   :  { %v666_v24 = vmul.f32 %v7218_v0, %v664_v23  ;;  %v5519_v0 = vld [vmem:[%s8482_s3 + $0x88] sm:$0xff] }
 0x533   :  { %v6609_v28 = vpack.c.bf16 %v5519_v0, %v5518_v60  ;;  %v5531_v60 = vld [vmem:[%s8483_s4 + $0x8] ss:$0 sm:$0xff] }
 0x534   :  { %6126 = vmatmul.mubr.msk.f32.vlgmr.msra.gmra.mrb[4].mxu1 %vm298_vm5, %v666_v24 }
 0x535   :  { %6610 = vmatprep.subr.bf16.mxu1 %v6609_v28 }
 0x536   :  { %6612 = vmatpush3.bf16.msra.mxu1 %v6609_v28 }
 0x607   :  { %v6127_v35 = vpop.f32.mrb[4].mxu1 }
 0x608   :  { %v739_v37 = vpop.f32.mrb[5].mxu1 }
 0x609   :  { %6136 = vmatprep.mubr.msk.f32.mxu0 %vm67_vm0, %v739_v37 }
 0x60a   :  { %6137 = vmatmul.mubr.msk.f32.vlgmr.msra.gmra.mrb[6].mxu0 %vm67_vm0, %v6127_v35  ;;  %v5577_v35 = vld [vmem:[%s8482_s3 + $0x148] sm:$0xff] }
 0x60b   :  { %6604 = vmatpush3.bf16.msra.mxu0 %v6601_v27  ;;  %6147 = vmatprep.mubr.msk.f32.mxu0 %vm67_vm0, %v7262_v22  ;;  %v5521_v22 = vld [vmem:[%s8482_s3 + $0x98] sm:$0xff]  ;;  %v6659_v38 = vpack.c.bf16 %v5577_v35, %v5576_v33 }
 0x60c   :  { %6606 = vmatprep.subr.bf16.mxu0 %v6605_v30 }
 0x60f   :  { %6608 = vmatpush3.bf16.msra.mxu0 %v6605_v30 }
 0x610   :  { %6626 = vmatprep.subr.bf16.mxu0 %v6625_v32 }
 0x612   :  { %6148 = vmatmul.mubr.msk.f32.vlgmr.msra.gmra.mrb[6].mxu0 %vm67_vm0, %v7260_v21  ;;  %v6613_v21 = vpack.c.bf16 %v5521_v22, %v5520_v34  ;;  %v5578_v34 = vld [vmem:[%s8482_s3 + $0x150] sm:$0xff]  ;;  %v5579_v22 = vld [vmem:[%s8482_s3 + $0x158] sm:$0xff] }
 0x613   :  { %6628 = vmatpush3.bf16.msra.mxu0 %v6625_v32 }
 0x614   :  { %6614 = vmatprep.subr.bf16.mxu1 %v6613_v21  ;;  %6630 = vmatprep.subr.bf16.mxu0 %v6629_v40 }
 0x615   :  { %6616 = vmatpush3.bf16.msra.mxu1 %v6613_v21  ;;  %v6663_v21 = vpack.c.bf16 %v5579_v22, %v5578_v34  ;;  %v7526_v34 = vld [vmem:[%s8480_s1 + $0x50] sm:$0xff] }
 0x616   :  { %6618 = vmatprep.subr.bf16.mxu1 %v6617_v45 }
 0x617   :  { %6632 = vmatpush3.bf16.msra.mxu0 %v6629_v40  ;;  %v6675_v40 = vpack.c.bf16 %v5593_v39, %v5592_v36 }
 0x618   :  { %6642 = vmatprep.subr.bf16.mxu0 %v6641_v53 }
 0x6e5   :  { %v6149_v46 = vpop.f32.mrb[6].mxu0 }
 0x6e6   :  { %v924_v48 = vadd.f32 %v6149_v46, %v5517_v54  ;;  %v906_v49 = vpop.f32.mrb[7].mxu0  ;;  %v5611_v46 = vld [vmem:[%s8482_s3 + $0x1d8] sm:$0xff] }
 0x6e7   :  { %v923_v50 = vadd.f32 %v5517_v54, %v906_v49  ;;  %v5610_v54 = vld [vmem:[%s8482_s3 + $0x1d0] sm:$0xff] }
 0x6e8   :  { %v928_v51 = vmul.f32 0.01, %v924_v48  ;;  %vm926_vm8 = vcmp.gt.f32.partialorder %v924_v48, 0.0 }
 0x6e9   :  { %vm925_vm9 = vcmp.gt.f32.partialorder %v923_v50, 0.0  ;;  %v927_v57 = vmul.f32 0.01, %v923_v50 }
 0x6ea   :  { %v7356_v18 = vsel %vm926_vm8, %v924_v48, %v928_v51  ;;  %v6695_v48 = vpack.c.bf16 %v5611_v46, %v5610_v54 }
 0x6eb   :  { %v7354_v58 = vsel %vm925_vm9, %v923_v50, %v927_v57 }
 0x6ec   :  { %6158 = vmatprep.mubr.msk.f32.mxu1 %vm67_vm0, %v7354_v58  ;;  %6180 = vmatprep.mubr.msk.f32.mxu0 %vm67_vm0, %v7354_v58 }
 0x6ed   :  { %6159 = vmatmul.mubr.msk.f32.vlgmr.msra.gmra.mrb[6].mxu1 %vm67_vm0, %v7356_v18  ;;  %6181 = vmatmul.mubr.msk.f32.vlgmr.msra.gmra.mrb[8].mxu0 %vm67_vm0, %v7356_v18 }
 0x6ee   :  { %6620 = vmatpush3.bf16.msra.mxu1 %v6617_v45  ;;  %6169 = vmatprep.mubr.msk.f32.mxu1 %vm67_vm0, %v7354_v58  ;;  %v6679_v45 = vpack.c.bf16 %v5595_v44, %v5594_v41 }
 0x6ef   :  { %6622 = vmatprep.subr.bf16.mxu1 %v6621_v59  ;;  %6644 = vmatpush3.bf16.msra.mxu0 %v6641_v53  ;;  %v6691_v53 = vpack.c.bf16 %v5609_v43, %v5608_v42  ;;  %v7537_v43 = vld [vmem:[%s8480_s1 + $0x58] sm:$0xff] }
 0x6f0   :  { %6646 = vmatprep.subr.bf16.mxu0 %v6645_v5 }
 0x6f2   :  { %6624 = vmatpush3.bf16.msra.mxu1 %v6621_v59 }
 0x6f3   :  { %6634 = vmatprep.subr.bf16.mxu1 %v6633_v62  ;;  %6648 = vmatpush3.bf16.msra.mxu0 %v6645_v5 }
 0x6f5   :  { %6170 = vmatmul.mubr.msk.f32.vlgmr.msra.gmra.mrb[8].mxu1 %vm67_vm0, %v7356_v18 }
 0x6f6   :  { %6636 = vmatpush3.bf16.msra.mxu1 %v6633_v62  ;;  %6191 = vmatprep.mubr.msk.f32.mxu1 %vm67_vm0, %v7354_v58  ;;  %v5597_v62 = vld [vmem:[%s8483_s4 + $0x14] ss:$0 sm:$0xff] }
 0x6f7   :  { %6638 = vmatprep.subr.bf16.mxu1 %v6637_v2 }
 0x6fa   :  { %6640 = vmatpush3.bf16.msra.mxu1 %v6637_v2 }
 0x6fd   :  { %6192 = vmatmul.mubr.msk.f32.vlgmr.msra.gmra.mrb[10].mxu1 %vm67_vm0, %v7356_v18 }
 0x7c0   :  { %v6160_v10 = vpop.f32.mrb[6].mxu1  ;;  %v6182_v16 = vpop.f32.mrb[8].mxu0 }
 0x7c1   :  { %v1198_v17 = vadd.f32 %v6182_v16, %v5539_v6  ;;  %v1016_v20 = vpop.f32.mrb[7].mxu1  ;;  %v1192_v23 = vpop.f32.mrb[9].mxu0  ;;  %v1022_v26 = vadd.f32 %v6160_v10, %v5523_v7  ;;  %v7481_v10 = vld [vmem:[%s8480_s1 + $0x28] sm:$0xff] }
 0x7c2   :  { %v1017_v24 = vadd.f32 %v5523_v7, %v1016_v20  ;;  %v1193_v25 = vadd.f32 %v5539_v6, %v1192_v23  ;;  %v7491_v23 = vld [vmem:[%s8480_s1 + $0x30] sm:$0xff] }
 0x7c4   :  { %v6655_v27 = vpack.c.bf16 %v1198_v17, %v1193_v25  ;;  %6202 = vmatprep.mubr.msk.f32.mxu0 %vm67_vm0, %v1017_v24  ;;  %6209 = vmatprep.mubr.msk.f32.mxu1 %vm67_vm0, %v1017_v24  ;;  %v7486_v17 = vld [vmem:[%s8480_s1 + $0x20] sm:$0xff] }
 0x7c5   :  { %6203 = vmatmul.mubr.msk.f32.vlgmr.msra.gmra.mrb[10].mxu0 %vm67_vm0, %v1022_v26 }
 0x7c6   :  { %6656 = vmatprep.subr.bf16.mxu0 %v6655_v27 }
 0x7c7   :  { %6658 = vmatpush3.bf16.msra.mxu0 %v6655_v27  ;;  %v7503_v27 = vld [vmem:[%s8480_s1 + $0x40] sm:$0xff] }
 0x7c8   :  { %v6171_v0 = vpop.f32.mrb[8].mxu1 }
 0x7c9   :  { %v1110_v28 = vadd.f32 %v6171_v0, %v5531_v60  ;;  %v1104_v29 = vpop.f32.mrb[9].mxu1 }
 0x7ca   :  { %v1105_v37 = vadd.f32 %v5531_v60, %v1104_v29 }
 0x7cc   :  { %v6649_v30 = vpack.c.bf16 %v1110_v28, %v1105_v37  ;;  %v7509_v28 = vld [vmem:[%s8480_s1 + $0x38] sm:$0xff] }
 0x7ce   :  { %6651 = vmatprep.subr.msk.bf16.mxu1 %vm7129_vm2, %v6649_v30 }
 0x7cf   :  { %6654 = vmatpush3.bf16.xpose.msk.msra.mxu1 %vm7129_vm2, %v6649_v30  ;;  %v7516_v30 = vld [vmem:[%s8480_s1 + $0x8] sm:$0xff] }
 0x7d0   :  { %v7414_v31 = vpop.f32.mrb[10].mxu1  ;;  %6660 = vmatprep.subr.bf16.mxu1 %v6659_v38 }
 0x7d1   :  { %v7416_v32 = vpop.f32.mrb[11].mxu1 }
 0x7d6   :  { %6210 = vmatmul.mubr.msk.f32.vlgmr.msra.gmra.mrb[12].mxu1 %vm67_vm0, %v1022_v26  ;;  %v7498_v26 = vld [vmem:[%s8480_s1] sm:$0xff] }
 0x7d7   :  { %6662 = vmatpush3.bf16.msra.mxu1 %v6659_v38  ;;  %6227 = vmatprep.mubr.msk.f32.mxu1 %vm67_vm0, %v7354_v58  ;;  %v5456_v29 = vadd.f32 -1.0, %v7498_v26  ;;  %v7521_v38 = vld [vmem:[%s8480_s1 + $0x48] sm:$0xff] }
 0x7d8   :  { %6664 = vmatprep.subr.bf16.mxu1 %v6663_v21 }
 0x7d9   :  { %v7529_v39 = vmul.f32 1e+30, %v5456_v29 }
 0x7db   :  { %6666 = vmatpush3.bf16.msra.mxu1 %v6663_v21 }
 0x7dc   :  { %6676 = vmatprep.subr.bf16.mxu1 %v6675_v40 }
 0x7de   :  { %6228 = vmatmul.mubr.msk.f32.vlgmr.msra.gmra.mrb[14].mxu1 %vm67_vm0, %v7356_v18 }
 0x7df   :  { %6678 = vmatpush3.bf16.msra.mxu1 %v6675_v40  ;;  %6249 = vmatprep.mubr.msk.f32.mxu1 %vm67_vm0, %v7354_v58  ;;  %v5457_v40 = vadd.f32 -1.0, %v7516_v30 }
 0x7e0   :  { %6680 = vmatprep.subr.bf16.mxu1 %v6679_v45 }
 0x7e3   :  { %6682 = vmatpush3.bf16.msra.mxu1 %v6679_v45 }
 0x7e4   :  { %6692 = vmatprep.subr.bf16.mxu1 %v6691_v53 }
 0x7e6   :  { %6250 = vmatmul.mubr.msk.f32.vlgmr.msra.gmra.mrb[16].mxu1 %vm67_vm0, %v7356_v18 }
 0x7e7   :  { %6694 = vmatpush3.bf16.msra.mxu1 %v6691_v53 }
 0x7e8   :  { %6696 = vmatprep.subr.bf16.mxu1 %v6695_v48 }
 0x7eb   :  { %6698 = vmatpush3.bf16.msra.mxu1 %v6695_v48 }
 0x898   :  { %v6204_v49 = vpop.f32.mrb[10].mxu0 }
 0x899   :  { %1473 = vperm.xlu1 %6911, %v6204_v49   ;;  %1382 = vperm.xlu0 %6910, %v6204_v49   ;;  %v1366_v50 = vpop.f32.mrb[11].mxu0 }
 0x89d   :  { %6912 = vset.pattern.permute.xlu1 %v7059_v12 }
 0x89e   :  { %1485 = vperm.xlu1 %6912, %v6204_v49  }
 0x8a2   :  { %6913 = vset.pattern.permute.xlu1 %v7058_v11 }
 0x8a3   :  { %1377 = vperm.xlu1 %6913, %v1366_v50  }
 0x8a7   :  { %6914 = vset.pattern.permute.xlu1 %v7060_v13 }
 0x8a8   :  { %1469 = vperm.xlu1 %6914, %v1366_v50  }
 0x8a9   :  { %v6211_v51 = vpop.f32.mrb[12].mxu1 }
 0x8aa   :  { %v1459_v52 = vpop.f32.mrb[13].mxu1 }
 0x8ac   :  { %6915 = vset.pattern.permute.xlu1 %v7059_v12 }
 0x8ad   :  { %1481 = vperm.xlu1 %6915, %v1366_v50  }
 0x8b1   :  { %v6229_v57 = vpop.f32.mrb[14].mxu1  ;;  %6916 = vset.pattern.permute.xlu1 %v7061_v14 }
 0x8b2   :  { %v1824_v59 = vpop.f32.mrb[15].mxu1  ;;  %1493 = vperm.xlu1 %6916, %v1366_v50   ;;  %v7467_v61 = vadd.f32 %v6229_v57, %v5581_v56  ;;  %v7541_v50 = vmul.f32 1e+30, %v5457_v40  ;;  %v5586_v40 = vld [vmem:[%s8482_s3 + $0x170] sm:$0xff] }
 0x8b3   :  { %v7465_v15 = vadd.f32 %v5581_v56, %v1824_v59 }
 0x8b5   :  { %6271 = vmatprep.mubr.msk.f32.mxu1 %vm67_vm0, %v7465_v15 }
 0x8b6   :  { %6272 = vmatmul.mubr.msk.f32.vlgmr.msra.gmra.mrb[18].mxu1 %vm67_vm0, %v7467_v61  ;;  %1497 = vperm.xlu1 %6916, %v6204_v49  }
 0x8b9   :  { %v6251_v63 = vpop.f32.mrb[16].mxu1 }
 0x8ba   :  { %v2006_v1 = vadd.f32 %v6251_v63, %v5597_v62  ;;  %v2000_v2 = vpop.f32.mrb[17].mxu1  ;;  %6917 = vset.pattern.permute.xlu1 %v7058_v11 }
 0x8bb   :  { %v2001_v3 = vadd.f32 %v5597_v62, %v2000_v2 }
 0x8bd   :  { %v6705_v4 = vpack.c.bf16 %v2006_v1, %v2001_v3 }
 0x8bf   :  { %6706 = vmatprep.subr.bf16.mxu1 %v6705_v4 }
 0x8c0   :  { %6708 = vmatpush3.bf16.msra.mxu1 %v6705_v4 }
 0x8c1   :  { %6725 = vmatprep.subr.bf16.mxu1 %v7055_v8 }
 0x918   :  { %v1474_v5 = vpop.permute.xlu1 %1473  ;;  %v1383_v16 = vpop.permute.xlu0 %1382 }
 0x919   :  { %v1386_v24 = vmul.f32 %v7481_v10, %v1383_v16  ;;  %v1477_v22 = vmul.f32 %v7509_v28, %v1474_v5 }
 0x91b   :  { %v1465_v33 = vadd.f32 %v6211_v51, %v1386_v24  ;;  %v5584_v24 = vld [vmem:[%s8482_s3 + $0x160] sm:$0xff] }
 0x91d   :  { %v1486_v6 = vpop.permute.xlu1 %1485  ;;  %v1479_v41 = vadd.f32 %v1477_v22, %v1465_v33 }
 0x91e   :  { %v1489_v44 = vmul.f32 %v7521_v38, %v1486_v6 }
 0x920   :  { %v1491_v46 = vadd.f32 %v1489_v44, %v1479_v41  ;;  %v5587_v41 = vld [vmem:[%s8482_s3 + $0x178] sm:$0xff] }
 0x922   :  { %v1378_v7 = vpop.permute.xlu1 %1377 }
 0x923   :  { %v1385_v25 = vmul.f32 %v7486_v17, %v1378_v7 }
 0x925   :  { %v1460_v35 = vadd.f32 %v1459_v52, %v1385_v25  ;;  %v5585_v25 = vld [vmem:[%s8482_s3 + $0x168] sm:$0xff] }
 0x927   :  { %v1470_v20 = vpop.permute.xlu1 %1469 }
 0x928   :  { %v1476_v60 = vmul.f32 %v7491_v23, %v1470_v20 }
 0x92a   :  { %v1478_v21 = vadd.f32 %v1476_v60, %v1460_v35  ;;  %v6667_v60 = vpack.c.bf16 %v5585_v25, %v5584_v24 }
 0x92c   :  { %v1482_v0 = vpop.permute.xlu1 %1481  ;;  %6668 = vmatprep.subr.bf16.mxu0 %v6667_v60 }
 0x92d   :  { %v1488_v37 = vmul.f32 %v7503_v27, %v1482_v0 }
 0x92f   :  { %v1490_v45 = vadd.f32 %v1488_v37, %v1478_v21 }
 0x931   :  { %v1494_v36 = vpop.permute.xlu1 %1493 }
 0x932   :  { %v1500_v42 = vmul.f32 %v7526_v34, %v1494_v36 }
 0x934   :  { %v1502_v53 = vadd.f32 %v1500_v42, %v1490_v45  ;;  %v6671_v42 = vpack.c.bf16 %v5587_v41, %v5586_v40 }
 0x935   :  { %v1498_v54 = vpop.permute.xlu1 %1497 }
 0x936   :  { %v1501_v48 = vmul.f32 %v7537_v43, %v1498_v54  ;;  %v1504_v49 = vadd.f32 %v1502_v53, %v7529_v39  ;;  %v5600_v53 = vld [vmem:[%s8482_s3 + $0x1a0] sm:$0xff]  ;;  %v5601_v54 = vld [vmem:[%s8482_s3 + $0x1a8] sm:$0xff] }
 0x938   :  { %v1503_v51 = vadd.f32 %v1501_v48, %v1491_v46  ;;  %v1506_v52 = vsel %vm298_vm5, %v1504_v49, -inf  ;;  %v6683_v46 = vpack.c.bf16 %v5601_v54, %v5600_v53  ;;  %v5602_v48 = vld [vmem:[%s8482_s3 + $0x1b0] sm:$0xff] }
 0x939   :  { %1507 = vmax.xlane.f32.xlu1 %v1506_v52 }
 0x93a   :  { %v1505_v56 = vadd.f32 %v1503_v51, %v7541_v50 }
 0x93c   :  { %v1509_v57 = vsel %vm298_vm5, %v1505_v56, -inf }
 0x93d   :  { %1510 = vmax.xlane.f32.xlu0 %v1509_v57  ;;  %v5589_v57 = vld [vmem:[%s8483_s4 + $0x13] ss:$0 sm:$0xff] }
 0x989   :  { %v6273_v59 = vpop.f32.mrb[18].mxu1 }
 0x98a   :  { %v2174_v62 = vpop.f32.mrb[19].mxu1 }
 0x9c6   :  { %v1508_v63 = vpop.xlane.xlu1 %1507 }
 0x9c7   :  { %v1512_v1 = vsub.f32 %v1504_v49, %v1508_v63  ;;  %v5603_v49 = vld [vmem:[%s8482_s3 + $0x1b8] sm:$0xff] }
 0x9c8   :  { %v6687_v51 = vpack.c.bf16 %v5603_v49, %v5602_v48 }
 0x9c9   :  { %v1514_v2 = vmul.f32 1.442695, %v1512_v1 }
 0x9ca   :  { %v1511_v3 = vpop.xlane.xlu0 %1510 }
 0x9cb   :  { %6954 = vpow2.f32 %v1514_v2  ;;  %v1513_v4 = vsub.f32 %v1505_v56, %v1511_v3 }
 0x9cd   :  { %v1516_v5 = vmul.f32 1.442695, %v1513_v4 }
 0x9cf   :  { %6956 = vpow2.f32 %v1516_v5 }
 0x9d5   :  { %v6955_v6 = vpop.eup %6954 }
 0x9d6   :  { %v1518_v7 = vsel %vm298_vm5, %v6955_v6, 0.0 }
 0x9d7   :  { %1519 = vadd.xlane.f32.xlu1 %v1518_v7 }
 0x9d9   :  { %v6957_v16 = vpop.eup %6956 }
 0x9da   :  { %v1521_v20 = vsel %vm298_vm5, %v6957_v16, 0.0 }
 0x9db   :  { %1522 = vadd.xlane.f32.xlu0 %v1521_v20 }
 0x9e8   :  { %2185 = vperm.xlu1 %6917, %v2174_v62  }
 0x9ec   :  { %6918 = vset.pattern.permute.xlu1 %v7060_v13 }
 0x9ed   :  { %2277 = vperm.xlu1 %6918, %v2174_v62  }
 0x9f1   :  { %2190 = vperm.xlu0 %6910, %v6273_v59   ;;  %2281 = vperm.xlu1 %6918, %v6273_v59  }
 0x9f5   :  { %6919 = vset.pattern.permute.xlu0 %v7059_v12  ;;  %6920 = vset.pattern.permute.xlu1 %v7059_v12 }
 0x9f6   :  { %2289 = vperm.xlu0 %6919, %v2174_v62   ;;  %2293 = vperm.xlu1 %6920, %v6273_v59  }
 0x9fa   :  { %6922 = vset.pattern.permute.xlu0 %v7061_v14  ;;  %6921 = vset.pattern.permute.xlu1 %v7061_v14 }
 0x9fb   :  { %2305 = vperm.xlu0 %6922, %v6273_v59   ;;  %2301 = vperm.xlu1 %6921, %v2174_v62  }
 0x9ff   :  { %6923 = vset.pattern.permute.xlu0 %v7058_v11  ;;  %6924 = vset.pattern.permute.xlu1 %v7060_v13 }
 0xa64   :  { %v1520_v0 = vpop.xlane.xlu1 %1519 }
 0xa65   :  { %v1524_v29 = vmax.f32 %v1520_v0, 1e-20 }
 0xa67   :  { %6958 = vrcp.f32 %v1524_v29 }
 0xa68   :  { %v1523_v33 = vpop.xlane.xlu0 %1522  ;;  %v2186_v2 = vpop.permute.xlu1 %2185 }
 0xa69   :  { %v1525_v35 = vmax.f32 %v1523_v33, 1e-20  ;;  %v2193_v20 = vmul.f32 %v7486_v17, %v2186_v2 }
 0xa6b   :  { %6960 = vrcp.f32 %v1525_v35 }
 0xa6c   :  { %v2278_v3 = vpop.permute.xlu1 %2277 }
 0xa6d   :  { %v2284_v29 = vmul.f32 %v7491_v23, %v2278_v3 }
 0xa70   :  { %v2191_v4 = vpop.permute.xlu0 %2190  ;;  %v2282_v5 = vpop.permute.xlu1 %2281 }
 0xa71   :  { %v6959_v37 = vpop.eup %6958  ;;  %v2285_v25 = vmul.f32 %v7509_v28, %v2282_v5 }
 0xa72   :  { %v1528_v22 = vmul.f32 %v6959_v37, %v6955_v6 }
 0xa74   :  { %v7562_v21 = vmul.f32 %v1528_v22, %v7498_v26 }
 0xa75   :  { %v6961_v36 = vpop.eup %6960  ;;  %v2290_v6 = vpop.permute.xlu0 %2289 }
 0xa76   :  { %v1529_v44 = vmul.f32 %v6961_v36, %v6957_v16  ;;  %6216 = vmatprep.mubr.msk.f32.mxu0 %vm298_vm5, %v7562_v21  ;;  %v2294_v7 = vpop.permute.xlu1 %2293  ;;  %v2194_v16 = vmul.f32 %v7481_v10, %v2191_v4  ;;  %v2296_v36 = vmul.f32 %v7503_v27, %v2290_v6 }
 0xa78   :  { %v7573_v45 = vmul.f32 %v1529_v44, %v7516_v30 }
 0xa7a   :  { %6217 = vmatmul.mubr.msk.f32.vlgmr.msra.gmra.mrb[12].mxu0 %vm298_vm5, %v7573_v45  ;;  %v2306_v33 = vpop.permute.xlu0 %2305  ;;  %v2302_v37 = vpop.permute.xlu1 %2301 }
 0xa7b   :  { %6670 = vmatpush3.bf16.msra.mxu0 %v6667_v60  ;;  %6238 = vmatprep.mubr.msk.f32.mxu0 %vm67_vm0, %v7354_v58  ;;  %v2309_v41 = vmul.f32 %v7537_v43, %v2306_v33  ;;  %v1651_v33 = vmul.f32 %v7503_v27, %v7562_v21 }
 0xa7c   :  { %6672 = vmatprep.subr.bf16.mxu0 %v6671_v42 }
 0xa7f   :  { %6674 = vmatpush3.bf16.msra.mxu0 %v6671_v42  ;;  %v2308_v42 = vmul.f32 %v7526_v34, %v2302_v37 }
 0xa80   :  { %6684 = vmatprep.subr.bf16.mxu0 %v6683_v46 }
 0xa82   :  { %6239 = vmatmul.mubr.msk.f32.vlgmr.msra.gmra.mrb[14].mxu0 %vm67_vm0, %v7356_v18 }
 0xa83   :  { %6686 = vmatpush3.bf16.msra.mxu0 %v6683_v46  ;;  %6260 = vmatprep.mubr.msk.f32.mxu0 %vm67_vm0, %v7354_v58 }
 0xa84   :  { %6688 = vmatprep.subr.bf16.mxu0 %v6687_v51 }
 0xa87   :  { %6690 = vmatpush3.bf16.msra.mxu0 %v6687_v51 }
 0xa8a   :  { %6261 = vmatmul.mubr.msk.f32.vlgmr.msra.gmra.mrb[16].mxu0 %vm67_vm0, %v7356_v18 }
 0xa8b   :  { %6278 = vmatprep.mubr.msk.f32.mxu0 %vm67_vm0, %v7465_v15 }
 0xb4d   :  { %v7599_v52 = vpop.f32.mrb[12].mxu0 }
 0xb4e   :  { %v7601_v56 = vpop.f32.mrb[13].mxu0 }
 0xb55   :  { %v6240_v59 = vpop.f32.mrb[14].mxu0 }
 0xb56   :  { %v1918_v62 = vadd.f32 %v6240_v59, %v5589_v57  ;;  %v1912_v63 = vpop.f32.mrb[15].mxu0 }
 0xb57   :  { %v1913_v58 = vadd.f32 %v5589_v57, %v1912_v63 }
 0xb59   :  { %v6699_v1 = vpack.c.bf16 %v1918_v62, %v1913_v58 }
 0xb5b   :  { %6701 = vmatprep.subr.msk.bf16.mxu0 %vm7129_vm2, %v6699_v1 }
 0xb5c   :  { %6704 = vmatpush3.bf16.xpose.msk.msra.mxu0 %vm7129_vm2, %v6699_v1 }
 0xb5d   :  { %v7610_v18 = vpop.f32.mrb[16].mxu0 }
 0xb5e   :  { %v7612_v15 = vpop.f32.mrb[17].mxu0 }
 0xb63   :  { %6279 = vmatmul.mubr.msk.f32.vlgmr.msra.gmra.mrb[18].mxu0 %vm67_vm0, %v7467_v61  ;;  %v2297_v61 = vmul.f32 %v7521_v38, %v2294_v7  ;;  %v1532_v7 = vmul.f32 %v7486_v17, %v7562_v21 }
 0xc36   :  { %v6280_v24 = vpop.f32.mrb[18].mxu0 }
 0xc37   :  { %v2273_v60 = vadd.f32 %v6280_v24, %v2194_v16  ;;  %v2267_v0 = vpop.f32.mrb[19].mxu0  ;;  %v1534_v16 = vsel %vm298_vm5, %v1532_v7, 0.0 }
 0xc38   :  { %v2268_v35 = vadd.f32 %v2267_v0, %v2193_v20  ;;  %v1533_v20 = vmul.f32 %v7481_v10, %v7573_v45  ;;  %v1632_v0 = vmul.f32 %v7509_v28, %v7573_v45 }
 0xc39   :  { %v2287_v22 = vadd.f32 %v2285_v25, %v2273_v60  ;;  %v1631_v25 = vmul.f32 %v7491_v23, %v7562_v21 }
 0xc3a   :  { %v2286_v40 = vadd.f32 %v2284_v29, %v2268_v35  ;;  %v1537_v24 = vsel %vm298_vm5, %v1533_v20, 0.0  ;;  %v1636_v29 = vsel %vm298_vm5, %v1632_v0, 0.0  ;;  %v1653_v35 = vsel %vm298_vm5, %v1651_v33, 0.0  ;;  %v5561_v33 = vld [vmem:[%s8483_s4 + $0xe] ss:$0 sm:$0xff] }
 0xc3b   :  { %v2299_v44 = vadd.f32 %v2297_v61, %v2287_v22  ;;  %v1633_v60 = vsel %vm298_vm5, %v1631_v25, 0.0  ;;  %v1652_v61 = vmul.f32 %v7521_v38, %v7573_v45  ;;  %v1671_v22 = vmul.f32 %v7526_v34, %v7562_v21  ;;  %v5571_v21 = vld [vmem:[%s8483_s4 + $0xb] ss:$0 sm:$0xff] }
 0xc3c   :  { %v2298_v53 = vadd.f32 %v2296_v36, %v2286_v40  ;;  %v5547_v36 = vld [vmem:[%s8483_s4 + $0xa] ss:$0 sm:$0xff] }
 0xc3d   :  { %v2311_v54 = vadd.f32 %v2309_v41, %v2299_v44  ;;  %v1656_v37 = vsel %vm298_vm5, %v1652_v61, 0.0  ;;  %v7654_v40 = vadd.f32 %v5547_v36, %v7416_v32  ;;  %v1673_v41 = vsel %vm298_vm5, %v1671_v22, 0.0 }
 0xc3e   :  { %v2310_v46 = vadd.f32 %v2308_v42, %v2298_v53  ;;  %v1672_v44 = vmul.f32 %v7537_v43, %v7573_v45  ;;  %v5605_v42 = vld [vmem:[%s8483_s4 + $0x15] ss:$0 sm:$0xff]  ;;  %v5629_v45 = vld [vmem:[%s8483_s4 + $0x16] ss:$0 sm:$0xff] }
 0xc3f   :  { %v2313_v48 = vadd.f32 %v2311_v54, %v7541_v50  ;;  %v7666_v53 = vadd.f32 %v5605_v42, %v7612_v15  ;;  %v1699_v54 = vmul.f32 %v5571_v21, %v7654_v40  ;;  %v7679_v15 = vadd.f32 %v7610_v18, %v5605_v42  ;;  %v5569_v42 = vld [vmem:[%s8483_s4 + $0x11] ss:$0 sm:$0xff] }
 0xc40   :  { %v2312_v49 = vadd.f32 %v2310_v46, %v7529_v39  ;;  %v1676_v32 = vsel %vm298_vm5, %v1672_v44, 0.0  ;;  %v7674_v46 = vadd.f32 %v7414_v31, %v5547_v36 }
 0xc41   :  { %v2317_v51 = vsel %vm298_vm5, %v2313_v48, -inf }
 0xc42   :  { %2318 = vmax.xlane.f32.xlu0 %v2317_v51  ;;  %v2314_v57 = vsel %vm298_vm5, %v2312_v49, -inf }
 0xc43   :  { %2315 = vmax.xlane.f32.xlu1 %v2314_v57  ;;  %v1700_v57 = vmul.f32 %v5571_v21, %v7674_v46 }
 0xccf   :  { %v2319_v59 = vpop.xlane.xlu0 %2318 }
 0xcd0   :  { %v2321_v62 = vsub.f32 %v2313_v48, %v2319_v59  ;;  %v2316_v63 = vpop.xlane.xlu1 %2315  ;;  %v1701_v48 = vsel %vm67_vm0, %v1699_v54, 0.0  ;;  %v1704_v59 = vsel %vm67_vm0, %v1700_v57, 0.0 }
 0xcd1   :  { %v2320_v58 = vsub.f32 %v2312_v49, %v2316_v63  ;;  %v2507_v49 = vmul.f32 %v5629_v45, %v7666_v53 }
 0xcd2   :  { %v2324_v1 = vmul.f32 1.442695, %v2321_v62  ;;  %v2508_v62 = vmul.f32 %v5629_v45, %v7679_v15 }
 0xcd3   :  { %v2322_v2 = vmul.f32 1.442695, %v2320_v58  ;;  %v2509_v51 = vsel %vm67_vm0, %v2507_v49, 0.0 }
 0xcd4   :  { %6962 = vpow2.f32 %v2324_v1  ;;  %v2512_v31 = vsel %vm67_vm0, %v2508_v62, 0.0 }
 0xcd5   :  { %6964 = vpow2.f32 %v2322_v2 }
 0xcde   :  { %v6963_v3 = vpop.eup %6962 }
 0xcdf   :  { %v6965_v4 = vpop.eup %6964  ;;  %v2329_v5 = vsel %vm298_vm5, %v6963_v3, 0.0 }
 0xce0   :  { %2330 = vadd.xlane.f32.xlu0 %v2329_v5  ;;  %v2326_v6 = vsel %vm298_vm5, %v6965_v4, 0.0 }
 0xce1   :  { %2327 = vadd.xlane.f32.xlu1 %v2326_v6 }
 0xce5   :  { %1535 = vadd.xlane.f32.xlu1 %v1534_v16 }
 0xce9   :  { %1538 = vadd.xlane.f32.xlu1 %v1537_v24 }
 0xced   :  { %1634 = vadd.xlane.f32.xlu1 %v1633_v60 }
 0xcf1   :  { %1637 = vadd.xlane.f32.xlu1 %v1636_v29 }
 0xcf5   :  { %1654 = vadd.xlane.f32.xlu1 %v1653_v35 }
 0xcf9   :  { %1657 = vadd.xlane.f32.xlu1 %v1656_v37 }
 0xcfd   :  { %1674 = vadd.xlane.f32.xlu1 %v1673_v41 }
 0xd01   :  { %1677 = vadd.xlane.f32.xlu1 %v1676_v32 }
 0xd05   :  { %1702 = vadd.xlane.f32.xlu1 %v1701_v48 }
 0xd09   :  { %2510 = vadd.xlane.f32.xlu1 %v2509_v51 }
 0xd0d   :  { %1705 = vadd.xlane.f32.xlu1 %v1704_v59 }
 0xd11   :  { %2513 = vadd.xlane.f32.xlu1 %v2512_v31 }
 0xd6d   :  { %v2331_v63 = vpop.xlane.xlu0 %2330 }
 0xd6e   :  { %v2333_v58 = vmax.f32 %v2331_v63, 1e-20  ;;  %v2328_v1 = vpop.xlane.xlu1 %2327 }
 0xd6f   :  { %v2332_v2 = vmax.f32 %v2328_v1, 1e-20 }
 0xd70   :  { %6966 = vrcp.f32 %v2333_v58 }
 0xd71   :  { %6968 = vrcp.f32 %v2332_v2 }
 0xd72   :  { %v1536_v18 = vpop.xlane.xlu1 %1535 }
 0xd76   :  { %v1539_v5 = vpop.xlane.xlu1 %1538 }
 0xd77   :  { %v1549_v41 = vmul.f32 %v5561_v33, %v1539_v5 }
 0xd7a   :  { %v6967_v6 = vpop.eup %6966  ;;  %v1635_v7 = vpop.xlane.xlu1 %1634 }
 0xd7b   :  { %v6969_v16 = vpop.eup %6968  ;;  %v2337_v20 = vmul.f32 %v6967_v6, %v6963_v3 }
 0xd7c   :  { %v2336_v24 = vmul.f32 %v6969_v16, %v6965_v4  ;;  %v5567_v4 = vld [vmem:[%s8483_s4 + $0x10] ss:$0 sm:$0xff] }
 0xd7d   :  { %v2339_v25 = vmul.f32 %v2337_v20, %v7516_v30  ;;  %v5565_v30 = vld [vmem:[%s8483_s4 + $0xf] ss:$0 sm:$0xff] }
 0xd7e   :  { %v1638_v60 = vpop.xlane.xlu1 %1637  ;;  %v2338_v0 = vmul.f32 %v2336_v24, %v7498_v26  ;;  %v1647_v61 = vmul.f32 %v5565_v30, %v1635_v7 }
 0xd7f   :  { %v2341_v29 = vmul.f32 %v7481_v10, %v2339_v25  ;;  %v2440_v3 = vmul.f32 %v7509_v28, %v2339_v25  ;;  %v1548_v10 = vmul.f32 %v5561_v33, %v1536_v18  ;;  %v2460_v22 = vmul.f32 %v7521_v38, %v2339_v25  ;;  %v5573_v33 = vld [vmem:[%s8483_s4 + $0xc] ss:$0 sm:$0xff] }
 0xd80   :  { %6285 = vmatprep.mubr.msk.f32.mxu1 %vm298_vm5, %v2338_v0  ;;  %v1648_v32 = vmul.f32 %v5565_v30, %v1638_v60  ;;  %v2340_v45 = vmul.f32 %v7486_v17, %v2338_v0  ;;  %v1628_v38 = vadd.f32 %v7599_v52, %v1549_v41  ;;  %v2439_v31 = vmul.f32 %v7491_v23, %v2338_v0  ;;  %v5575_v17 = vld [vmem:[%s8483_s4 + $0xd] ss:$0 sm:$0xff]  ;;  %v5625_v41 = vld [vmem:[%s8483_s4 + $0x1b] ss:$0 sm:$0xff] }
 0xd81   :  { %6286 = vmatmul.mubr.msk.f32.vlgmr.msra.gmra.mrb[20].mxu1 %vm298_vm5, %v2339_v25  ;;  %v2345_v35 = vsel %vm298_vm5, %v2341_v29, 0.0  ;;  %v2444_v37 = vsel %vm298_vm5, %v2440_v3, 0.0  ;;  %v1623_v36 = vadd.f32 %v7601_v56, %v1548_v10  ;;  %v2464_v54 = vsel %vm298_vm5, %v2460_v22, 0.0 }
 0xd82   :  { %2346 = vadd.xlane.f32.xlu0 %v2345_v35  ;;  %v1655_v26 = vpop.xlane.xlu1 %1654  ;;  %6314 = vmatprep.mubr.msk.f32.mxu1 %vm7056_vm1, %v7057_v9  ;;  %v1650_v56 = vadd.f32 %v1648_v32, %v1628_v38  ;;  %v2342_v62 = vsel %vm298_vm5, %v2340_v45, 0.0  ;;  %v2441_v18 = vsel %vm298_vm5, %v2439_v31, 0.0  ;;  %v2459_v6 = vmul.f32 %v7503_v27, %v2338_v0 }
 0xd83   :  { %v1667_v44 = vmul.f32 %v5567_v4, %v1655_v26  ;;  %v1649_v21 = vadd.f32 %v1647_v61, %v1623_v36  ;;  %v2479_v24 = vmul.f32 %v7526_v34, %v2338_v0  ;;  %v2480_v27 = vmul.f32 %v7537_v43, %v2339_v25 }
 0xd84   :  { %v2461_v16 = vsel %vm298_vm5, %v2459_v6, 0.0 }
 0xd85   :  { %v1669_v49 = vadd.f32 %v1667_v44, %v1649_v21  ;;  %v2481_v29 = vsel %vm298_vm5, %v2479_v24, 0.0  ;;  %v2484_v35 = vsel %vm298_vm5, %v2480_v27, 0.0 }
 0xd86   :  { %2445 = vadd.xlane.f32.xlu0 %v2444_v37  ;;  %v1658_v28 = vpop.xlane.xlu1 %1657  ;;  %v5619_v37 = vld [vmem:[%s8483_s4 + $0x19] ss:$0 sm:$0xff] }
 0xd87   :  { %v1668_v51 = vmul.f32 %v5567_v4, %v1658_v28  ;;  %v5623_v28 = vld [vmem:[%s8483_s4 + $0x1a] ss:$0 sm:$0xff] }
 0xd89   :  { %v1670_v58 = vadd.f32 %v1668_v51, %v1650_v56  ;;  %v5627_v51 = vld [vmem:[%s8483_s4 + $0x1c] ss:$0 sm:$0xff] }
 0xd8a   :  { %2465 = vadd.xlane.f32.xlu0 %v2464_v54  ;;  %v1675_v48 = vpop.xlane.xlu1 %1674 }
 0xd8b   :  { %v1687_v57 = vmul.f32 %v5569_v42, %v1675_v48 }
 0xd8d   :  { %v7713_v59 = vadd.f32 %v1687_v57, %v1669_v49 }
 0xd8e   :  { %2343 = vadd.xlane.f32.xlu0 %v2342_v62  ;;  %v1678_v63 = vpop.xlane.xlu1 %1677 }
 0xd8f   :  { %v1688_v1 = vmul.f32 %v5569_v42, %v1678_v63  ;;  %v1725_v52 = vsub.f32 %v7654_v40, %v7713_v59  ;;  %v1715_v3 = vmul.f32 %v5573_v33, %v7713_v59 }
 0xd91   :  { %v7722_v2 = vadd.f32 %v1688_v1, %v1670_v58  ;;  %v1735_v5 = vmul.f32 %v5575_v17, %v1725_v52  ;;  %v1717_v34 = vsel %vm67_vm0, %v1715_v3, 0.0  ;;  %v5631_v1 = vld [vmem:[%s8483_s4 + $0x17] ss:$0 sm:$0xff]  ;;  %v5639_v3 = vld [vmem:[%s8482_s3 + $0x1e8] sm:$0xff] }
 0xd92   :  { %2442 = vadd.xlane.f32.xlu0 %v2441_v18 }
 0xd93   :  { %v1737_v23 = vsel %vm67_vm0, %v1735_v5, 0.0  ;;  %v1726_v7 = vsub.f32 %v7674_v46, %v7722_v2  ;;  %v1716_v0 = vmul.f32 %v5573_v33, %v7722_v2 }
 0xd94   :  { %1738 = vadd.xlane.f32.xlu1 %v1737_v23 }
 0xd95   :  { %v1736_v20 = vmul.f32 %v5575_v17, %v1726_v7  ;;  %v1720_v30 = vsel %vm67_vm0, %v1716_v0, 0.0 }
 0xd96   :  { %2462 = vadd.xlane.f32.xlu0 %v2461_v16  ;;  %v5633_v16 = vld [vmem:[%s8483_s4 + $0x18] ss:$0 sm:$0xff] }
 0xd97   :  { %v1740_v60 = vsel %vm67_vm0, %v1736_v20, 0.0 }
 0xd98   :  { %1741 = vadd.xlane.f32.xlu1 %v1740_v60 }
 0xd9a   :  { %2482 = vadd.xlane.f32.xlu0 %v2481_v29 }
 0xd9e   :  { %2485 = vadd.xlane.f32.xlu0 %v2484_v35  ;;  %v5638_v35 = vld [vmem:[%s8482_s3 + $0x1e0] sm:$0xff] }
 0xd9f   :  { %v6709_v0 = vpack.c.bf16 %v5639_v3, %v5638_v35 }
 0xda1   :  { %6710 = vmatprep.subr.bf16.mxu0 %v6709_v0 }
 0xda2   :  { %1718 = vadd.xlane.f32.xlu0 %v1717_v34  ;;  %v5640_v34 = vld [vmem:[%s8482_s3 + $0x1f0] sm:$0xff]  ;;  %6712 = vmatpush3.bf16.msra.mxu0 %v6709_v0  ;;  %v5637_v0 = vld [vmem:[%s8482_s3 + $0x138] sm:$0xff] }
 0xda6   :  { %1721 = vadd.xlane.f32.xlu0 %v1720_v30  ;;  %v5641_v30 = vld [vmem:[%s8482_s3 + $0x1f8] sm:$0xff] }
 0xe0f   :  { %v2347_v26 = vpop.xlane.xlu0 %2346 }
 0xe10   :  { %v2357_v36 = vmul.f32 %v5619_v37, %v2347_v26  ;;  %v6713_v26 = vpack.c.bf16 %v5641_v30, %v5640_v34  ;;  %v5636_v34 = vld [vmem:[%s8482_s3 + $0x130] sm:$0xff] }
 0xe12   :  { %6714 = vmatprep.subr.bf16.mxu0 %v6713_v26 }
 0xe13   :  { %v2446_v43 = vpop.xlane.xlu0 %2445  ;;  %6716 = vmatpush3.bf16.msra.mxu0 %v6713_v26 }
 0xe14   :  { %v2456_v21 = vmul.f32 %v5623_v28, %v2446_v43  ;;  %v5634_v43 = vld [vmem:[%s8482_s3 + $0x120] sm:$0xff] }
 0xe17   :  { %v2466_v25 = vpop.xlane.xlu0 %2465 }
 0xe18   :  { %v2476_v49 = vmul.f32 %v5625_v41, %v2466_v25  ;;  %v5635_v25 = vld [vmem:[%s8482_s3 + $0x128] sm:$0xff] }
 0xe1b   :  { %v2344_v10 = vpop.xlane.xlu0 %2343 }
 0xe1c   :  { %v2356_v44 = vmul.f32 %v5619_v37, %v2344_v10  ;;  %v6717_v10 = vpack.c.bf16 %v5635_v25, %v5634_v43  ;;  %v6721_v43 = vpack.c.bf16 %v5637_v0, %v5636_v34 }
 0xe1e   :  { %6718 = vmatprep.subr.bf16.mxu0 %v6717_v10 }
 0xe1f   :  { %v2443_v4 = vpop.xlane.xlu0 %2442 }
 0xe20   :  { %v2455_v45 = vmul.f32 %v5623_v28, %v2443_v4  ;;  %v1703_v4 = vpop.xlane.xlu1 %1702 }
 0xe23   :  { %v2463_v61 = vpop.xlane.xlu0 %2462 }
 0xe24   :  { %v2475_v56 = vmul.f32 %v5625_v41, %v2463_v61  ;;  %v2511_v61 = vpop.xlane.xlu1 %2510 }
 0xe27   :  { %v2483_v22 = vpop.xlane.xlu0 %2482 }
 0xe28   :  { %v2495_v17 = vmul.f32 %v5627_v51, %v2483_v22  ;;  %v1706_v22 = vpop.xlane.xlu1 %1705 }
 0xe2b   :  { %v2486_v48 = vpop.xlane.xlu0 %2485 }
 0xe2c   :  { %v2496_v31 = vmul.f32 %v5627_v51, %v2486_v48  ;;  %v2514_v41 = vpop.xlane.xlu1 %2513 }
 0xe2f   :  { %v1719_v37 = vpop.xlane.xlu0 %1718 }
 0xe33   :  { %v1722_v28 = vpop.xlane.xlu0 %1721 }
 0xe34   :  { %v1724_v48 = vadd.f32 %v1722_v28, %v1706_v22 }
 0xe54   :  { %v6287_v42 = vpop.f32.mrb[20].mxu1 }
 0xe55   :  { %v2436_v32 = vadd.f32 %v6287_v42, %v2357_v36  ;;  %v2430_v54 = vpop.f32.mrb[21].mxu1  ;;  %v1723_v42 = vadd.f32 %v1719_v37, %v1703_v4  ;;  %v5647_v37 = vld [vmem:[%s8483_s4 + $0x33] ss:$0 sm:$0xff] }
 0xe56   :  { %v2431_v38 = vadd.f32 %v2430_v54, %v2356_v44 }
 0xe57   :  { %v2458_v57 = vadd.f32 %v2456_v21, %v2436_v32  ;;  %v1739_v21 = vpop.xlane.xlu1 %1738 }
 0xe58   :  { %v2457_v62 = vadd.f32 %v2455_v45, %v2431_v38  ;;  %v1743_v45 = vadd.f32 %v1739_v21, %v1723_v42  ;;  %v5649_v42 = vld [vmem:[%s8482_s3 + $0x200] sm:$0xff]  ;;  %v5650_v21 = vld [vmem:[%s8482_s3 + $0x208] sm:$0xff] }
 0xe59   :  { %v2478_v63 = vadd.f32 %v2476_v49, %v2458_v57 }
 0xe5a   :  { %v2477_v58 = vadd.f32 %v2475_v56, %v2457_v62 }
 0xe5b   :  { %v7757_v52 = vadd.f32 %v2496_v31, %v2478_v63  ;;  %v1742_v57 = vpop.xlane.xlu1 %1741 }
 0xe5c   :  { %v7759_v18 = vadd.f32 %v2495_v17, %v2477_v58  ;;  %v1744_v62 = vadd.f32 %v1742_v57, %v1724_v48  ;;  %v6728_v48 = vpack.c.bf16 %v5650_v21, %v5649_v42  ;;  %v60_v57 = vld [vmem:[%s8481_s2] sm:$0x3]  ;;  %v5717_v42 = vld [vmem:[%s8482_s3 + $0x2f0] sm:$0xff]  ;;  %v5718_v21 = vld [vmem:[%s8482_s3 + $0x2f8] sm:$0xff] }
 0xe5d   :  { %v2524_v5 = vmul.f32 %v5631_v1, %v7757_v52  ;;  %v2534_v60 = vsub.f32 %v7679_v15, %v7757_v52 }
 0xe5e   :  { %v2523_v23 = vmul.f32 %v5631_v1, %v7759_v18  ;;  %v2533_v7 = vsub.f32 %v7666_v53, %v7759_v18 }
 0xe5f   :  { %v2528_v6 = vsel %vm67_vm0, %v2524_v5, 0.0  ;;  %v2544_v27 = vmul.f32 %v5633_v16, %v2534_v60 }
 0xe60   :  { %2529 = vadd.xlane.f32.xlu0 %v2528_v6  ;;  %v2525_v20 = vsel %vm67_vm0, %v2523_v23, 0.0  ;;  %v2543_v24 = vmul.f32 %v5633_v16, %v2533_v7 }
 0xe61   :  { %v2548_v33 = vsel %vm67_vm0, %v2544_v27, 0.0 }
 0xe62   :  { %v2545_v29 = vsel %vm67_vm0, %v2543_v24, 0.0 }
 0xe64   :  { %2526 = vadd.xlane.f32.xlu0 %v2525_v20 }
 0xe68   :  { %2546 = vadd.xlane.f32.xlu0 %v2545_v29 }
 0xe6c   :  { %2549 = vadd.xlane.f32.xlu0 %v2548_v33 }
 0xeed   :  { %v2530_v36 = vpop.xlane.xlu0 %2529 }
 0xeee   :  { %v2532_v49 = vadd.f32 %v2530_v36, %v2514_v41 }
 0xef1   :  { %v2527_v44 = vpop.xlane.xlu0 %2526 }
 0xef2   :  { %v2531_v32 = vadd.f32 %v2527_v44, %v2511_v61 }
 0xef5   :  { %v2547_v54 = vpop.xlane.xlu0 %2546 }
 0xef6   :  { %v2551_v38 = vadd.f32 %v2547_v54, %v2531_v32 }
 0xef8   :  { %v2553_v51 = vadd.f32 %v2551_v38, %v1743_v45 }
 0xef9   :  { %v2550_v56 = vpop.xlane.xlu0 %2549 }
 0xefa   :  { %v2555_v31 = vsub.f32 0.0, %v2553_v51  ;;  %v2552_v63 = vadd.f32 %v2550_v56, %v2532_v49  ;;  %v5651_v49 = vld [vmem:[%s8482_s3 + $0x210] sm:$0xff]  ;;  %v5652_v51 = vld [vmem:[%s8482_s3 + $0x218] sm:$0xff] }
 0xefb   :  { %v6732_v56 = vpack.c.bf16 %v5652_v51, %v5651_v49  ;;  %v5733_v51 = vld [vmem:[%s8482_s3 + $0x330] sm:$0xff] }
 0xefc   :  { %v2557_v17 = vmul.f32 1.442695, %v2555_v31  ;;  %v2554_v58 = vadd.f32 %v2552_v63, %v1744_v62  ;;  %v5657_v62 = vld [vmem:[%s8482_s3 + $0x220] sm:$0xff]  ;;  %v5658_v31 = vld [vmem:[%s8482_s3 + $0x228] sm:$0xff] }
 0xefd   :  { %v6736_v63 = vpack.c.bf16 %v5658_v31, %v5657_v62 }
 0xefe   :  { %6970 = vpow2.f32 %v2557_v17  ;;  %v2556_v1 = vsub.f32 0.0, %v2554_v58  ;;  %v5659_v17 = vld [vmem:[%s8482_s3 + $0x230] sm:$0xff]  ;;  %v5660_v58 = vld [vmem:[%s8482_s3 + $0x238] sm:$0xff] }
 0xf00   :  { %v2559_v5 = vmul.f32 1.442695, %v2556_v1  ;;  %v6740_v1 = vpack.c.bf16 %v5660_v58, %v5659_v17  ;;  %v5720_v58 = vld [vmem:[%s8483_s4 + $0x29] ss:$0 sm:$0xff] }
 0xf02   :  { %6972 = vpow2.f32 %v2559_v5  ;;  %v5673_v5 = vld [vmem:[%s8482_s3 + $0x260] sm:$0xff] }
 0xf08   :  { %v6971_v6 = vpop.eup %6970 }
 0xf09   :  { %v2561_v23 = vadd.f32 1.0, %v6971_v6  ;;  %v5674_v6 = vld [vmem:[%s8482_s3 + $0x268] sm:$0xff] }
 0xf0b   :  { %6974 = vrcp.f32 %v2561_v23  ;;  %v6752_v23 = vpack.c.bf16 %v5674_v6, %v5673_v5 }
 0xf0c   :  { %v6973_v7 = vpop.eup %6972 }
 0xf0d   :  { %v2562_v16 = vadd.f32 1.0, %v6973_v7  ;;  %v5675_v7 = vld [vmem:[%s8482_s3 + $0x270] sm:$0xff] }
 0xf0f   :  { %6976 = vrcp.f32 %v2562_v16  ;;  %v5676_v16 = vld [vmem:[%s8482_s3 + $0x278] sm:$0xff] }
 0xf15   :  { %v6975_v20 = vpop.eup %6974 }
 0xf16   :  { %v2567_v24 = vsub.f32 1.0, %v6975_v20  ;;  %v2578_v60 = vmul.f32 %v6975_v20, %v7666_v53 }
 0xf18   :  { %v2580_v29 = vmul.f32 %v2567_v24, %v7759_v18  ;;  %v2569_v3 = vmul.f32 %v2567_v24, %v7713_v59  ;;  %v2565_v18 = vmul.f32 %v6975_v20, %v7654_v40  ;;  %v5665_v40 = vld [vmem:[%s8482_s3 + $0x240] sm:$0xff]  ;;  %v6756_v20 = vpack.c.bf16 %v5676_v16, %v5675_v7 }
 0xf19   :  { %v6977_v27 = vpop.eup %6976  ;;  %v5681_v24 = vld [vmem:[%s8482_s3 + $0x280] sm:$0xff] }
 0xf1a   :  { %v2582_v33 = vadd.f32 %v2580_v29, %v2578_v60  ;;  %v2568_v35 = vsub.f32 1.0, %v6977_v27  ;;  %v2579_v30 = vmul.f32 %v6977_v27, %v7679_v15  ;;  %v2571_v25 = vadd.f32 %v2569_v3, %v2565_v18  ;;  %v5666_v15 = vld [vmem:[%s8482_s3 + $0x248] sm:$0xff]  ;;  %v5670_v3 = vld [vmem:[%s8483_s4 + $0x1f] ss:$0 sm:$0xff] }
 0xf1b   :  { %v2566_v4 = vmul.f32 %v6977_v27, %v7674_v46  ;;  %v5668_v46 = vld [vmem:[%s8482_s3 + $0x258] sm:$0xff]  ;;  %v5682_v60 = vld [vmem:[%s8482_s3 + $0x288] sm:$0xff]  ;;  %v5683_v27 = vld [vmem:[%s8482_s3 + $0x290] sm:$0xff] }
 0xf1c   :  { %6296 = vmatprep.mubr.msk.f32.mxu0 %vm67_vm0, %v2582_v33  ;;  %v2581_v53 = vmul.f32 %v2568_v35, %v7757_v52  ;;  %v2570_v59 = vmul.f32 %v2568_v35, %v7722_v2  ;;  %v6744_v52 = vpack.c.bf16 %v5666_v15, %v5665_v40  ;;  %v5667_v2 = vld [vmem:[%s8482_s3 + $0x250] sm:$0xff]  ;;  %v6760_v29 = vpack.c.bf16 %v5682_v60, %v5681_v24  ;;  %v5684_v33 = vld [vmem:[%s8482_s3 + $0x298] sm:$0xff] }
 0xf1d   :  { %v6764_v35 = vpack.c.bf16 %v5684_v33, %v5683_v27  ;;  %v5662_v15 = vld [vmem:[%s8483_s4 + $0x1e] ss:$0 sm:$0xff] }
 0xf1e   :  { %v2583_v26 = vadd.f32 %v2581_v53, %v2579_v30  ;;  %v2572_v61 = vadd.f32 %v2570_v59, %v2566_v4 }
 0xf20   :  { %6297 = vmatmul.mubr.msk.f32.vlgmr.msra.gmra.mrb[20].mxu0 %vm67_vm0, %v2583_v26 }
 0xf21   :  { %6720 = vmatpush3.bf16.msra.mxu0 %v6717_v10  ;;  %6307 = vmatprep.mubr.msk.f32.mxu0 %vm67_vm0, %v2571_v25  ;;  %v6748_v10 = vpack.c.bf16 %v5668_v46, %v5667_v2  ;;  %v5654_v25 = vld [vmem:[%s8483_s4 + $0x1d] ss:$0 sm:$0xff] }
 0xf22   :  { %6722 = vmatprep.subr.bf16.mxu0 %v6721_v43 }
 0xf25   :  { %6724 = vmatpush3.bf16.msra.mxu0 %v6721_v43 }
 0xf26   :  { %6745 = vmatprep.subr.bf16.mxu0 %v6744_v52 }
 0xf28   :  { %6308 = vmatmul.mubr.msk.f32.vlgmr.msra.gmra.mrb[20].mxu0 %vm67_vm0, %v2572_v61 }
 0xf29   :  { %6747 = vmatpush3.bf16.msra.mxu0 %v6744_v52 }
 0xf2a   :  { %6749 = vmatprep.subr.bf16.mxu0 %v6748_v10 }
 0xf2d   :  { %6751 = vmatpush3.bf16.msra.mxu0 %v6748_v10  ;;  %v5715_v10 = vld [vmem:[%s8482_s3 + $0x2e0] sm:$0xff] }
 0xf2e   :  { %6761 = vmatprep.subr.bf16.mxu0 %v6760_v29 }
 0xffb   :  { %v6309_v22 = vpop.f32.mrb[20].mxu0 }
 0xffc   :  { %v2760_v28 = vadd.f32 %v6309_v22, %v5647_v37  ;;  %v2742_v36 = vpop.f32.mrb[21].mxu0 }
 0xffd   :  { %v2759_v41 = vadd.f32 %v5647_v37, %v2742_v36  ;;  %v5716_v37 = vld [vmem:[%s8482_s3 + $0x2e8] sm:$0xff] }
 0xffe   :  { %vm2762_vm10 = vcmp.gt.f32.partialorder %v2760_v28, 0.0  ;;  %v2764_v44 = vmul.f32 0.01, %v2760_v28  ;;  %v6786_v36 = vpack.c.bf16 %v5716_v37, %v5715_v10  ;;  %v8011_v37 = vld [vmem:[%s8480_s1 + $0x50] sm:$0xff] }
 0xfff   :  { %vm2761_vm11 = vcmp.gt.f32.partialorder %v2759_v41, 0.0  ;;  %v2763_v32 = vmul.f32 0.01, %v2759_v41 }
0x1000   :  { %v7831_v54 = vsel %vm2762_vm10, %v2760_v28, %v2764_v44 }
0x1001   :  { %v7833_v45 = vsel %vm2761_vm11, %v2759_v41, %v2763_v32  ;;  %v6790_v32 = vpack.c.bf16 %v5718_v21, %v5717_v42  ;;  %v8017_v21 = vld [vmem:[%s8480_s1 + $0x58] sm:$0xff] }
0x1002   :  { %6347 = vmatprep.mubr.msk.f32.mxu0 %vm67_vm0, %v7833_v45  ;;  %v6726_v38 = vpack.c.bf16 %v7831_v54, %v7833_v45 }
0x1003   :  { %6348 = vmatmul.mubr.msk.f32.vlgmr.msra.gmra.mrb[22].mxu0 %vm67_vm0, %v7831_v54 }
0x1004   :  { %6727 = vmatpush3.bf16.msra.mxu1 %v6726_v38  ;;  %6763 = vmatpush3.bf16.msra.mxu0 %v6760_v29  ;;  %v5732_v38 = vld [vmem:[%s8482_s3 + $0x328] sm:$0xff] }
0x1005   :  { %6729 = vmatprep.subr.bf16.mxu1 %v6728_v48  ;;  %6765 = vmatprep.subr.bf16.mxu0 %v6764_v35 }
0x1007   :  { %6315 = vmatmul.mubr.msk.f32.vlgmr.msra.gmra.mrb[22].mxu1 %vm298_vm5, %v60_v57  ;;  %v5734_v57 = vld [vmem:[%s8482_s3 + $0x338] sm:$0xff] }
0x1008   :  { %6731 = vmatpush3.bf16.msra.mxu1 %v6728_v48  ;;  %6325 = vmatprep.mubr.msk.f32.mxu1 %vm67_vm0, %v7833_v45  ;;  %v5731_v48 = vld [vmem:[%s8482_s3 + $0x320] sm:$0xff] }
0x1009   :  { %6733 = vmatprep.subr.bf16.mxu1 %v6732_v56  ;;  %6767 = vmatpush3.bf16.msra.mxu0 %v6764_v35  ;;  %v6802_v49 = vpack.c.bf16 %v5732_v38, %v5731_v48  ;;  %v7975_v35 = vld [vmem:[%s8480_s1 + $0x28] sm:$0xff] }
0x100c   :  { %6735 = vmatpush3.bf16.msra.mxu1 %v6732_v56  ;;  %v6806_v56 = vpack.c.bf16 %v5734_v57, %v5733_v51 }
0x100d   :  { %6737 = vmatprep.subr.bf16.mxu1 %v6736_v63 }
0x100f   :  { %6326 = vmatmul.mubr.msk.f32.vlgmr.msra.gmra.mrb[24].mxu1 %vm67_vm0, %v7831_v54 }
0x1010   :  { %6739 = vmatpush3.bf16.msra.mxu1 %v6736_v63  ;;  %6336 = vmatprep.mubr.msk.f32.mxu1 %vm67_vm0, %v7833_v45 }
0x1011   :  { %6741 = vmatprep.subr.bf16.mxu1 %v6740_v1 }
0x1014   :  { %6743 = vmatpush3.bf16.msra.mxu1 %v6740_v1 }
0x1015   :  { %6753 = vmatprep.subr.bf16.mxu1 %v6752_v23 }
0x1017   :  { %6337 = vmatmul.mubr.msk.f32.vlgmr.msra.gmra.mrb[26].mxu1 %vm67_vm0, %v7831_v54 }
0x1018   :  { %6755 = vmatpush3.bf16.msra.mxu1 %v6752_v23  ;;  %6358 = vmatprep.mubr.msk.f32.mxu1 %vm67_vm0, %v7833_v45 }
0x1019   :  { %6757 = vmatprep.subr.bf16.mxu1 %v6756_v20 }
0x101c   :  { %6759 = vmatpush3.bf16.msra.mxu1 %v6756_v20 }
0x101f   :  { %6359 = vmatmul.mubr.msk.f32.vlgmr.msra.gmra.mrb[28].mxu1 %vm67_vm0, %v7831_v54 }
0x10d6   :  { %v6349_v34 = vpop.f32.mrb[22].mxu0 }
0x10d7   :  { %v3151_v0 = vadd.f32 %v6349_v34, %v5670_v3  ;;  %v3145_v30 = vpop.f32.mrb[23].mxu0 }
0x10d8   :  { %v3146_v53 = vadd.f32 %v5670_v3, %v3145_v30 }
0x10da   :  { %v6774_v18 = vpack.c.bf16 %v3151_v0, %v3146_v53  ;;  %v7902_v26 = vpop.f32.mrb[22].mxu1  ;;  %v7987_v0 = vld [vmem:[%s8480_s1 + $0x30] sm:$0xff] }
0x10db   :  { %v6316_v43 = vpop.f32.mrb[23].mxu1 }
0x10dc   :  { %6775 = vmatprep.subr.bf16.mxu0 %v6774_v18 }
0x10e2   :  { %v6327_v59 = vpop.f32.mrb[24].mxu1 }
0x10e3   :  { %v2969_v4 = vpop.f32.mrb[25].mxu1  ;;  %v2975_v40 = vadd.f32 %v6327_v59, %v5654_v25 }
0x10e4   :  { %v2970_v61 = vadd.f32 %v5654_v25, %v2969_v4  ;;  %v7993_v25 = vld [vmem:[%s8480_s1 + $0x40] sm:$0xff]  ;;  %v7999_v4 = vld [vmem:[%s8480_s1 + $0x38] sm:$0xff] }
0x10e6   :  { %6369 = vmatprep.mubr.msk.f32.mxu0 %vm67_vm0, %v2970_v61  ;;  %6376 = vmatprep.mubr.msk.f32.mxu1 %vm67_vm0, %v2970_v61 }
0x10e7   :  { %6370 = vmatmul.mubr.msk.f32.vlgmr.msra.gmra.mrb[24].mxu0 %vm67_vm0, %v2975_v40 }
0x10e8   :  { %6777 = vmatpush3.bf16.msra.mxu0 %v6774_v18 }
0x10ea   :  { %v6338_v52 = vpop.f32.mrb[26].mxu1 }
0x10eb   :  { %v3063_v2 = vadd.f32 %v6338_v52, %v5662_v15  ;;  %v3057_v46 = vpop.f32.mrb[27].mxu1 }
0x10ec   :  { %v3058_v22 = vadd.f32 %v5662_v15, %v3057_v46 }
0x10ee   :  { %v6768_v28 = vpack.c.bf16 %v3063_v2, %v3058_v22  ;;  %v8005_v2 = vld [vmem:[%s8480_s1 + $0x48] sm:$0xff] }
0x10f0   :  { %6770 = vmatprep.subr.msk.bf16.mxu1 %vm7129_vm2, %v6768_v28 }
0x10f1   :  { %6773 = vmatpush3.bf16.xpose.msk.msra.mxu1 %vm7129_vm2, %v6768_v28 }
0x10f2   :  { %v7923_v41 = vpop.f32.mrb[28].mxu1  ;;  %6787 = vmatprep.subr.bf16.mxu1 %v6786_v36 }
0x10f3   :  { %v7925_v44 = vpop.f32.mrb[29].mxu1 }
0x10f8   :  { %6377 = vmatmul.mubr.msk.f32.vlgmr.msra.gmra.mrb[30].mxu1 %vm67_vm0, %v2975_v40 }
0x10f9   :  { %6789 = vmatpush3.bf16.msra.mxu1 %v6786_v36  ;;  %6405 = vmatprep.mubr.msk.f32.mxu1 %vm67_vm0, %v7833_v45 }
0x10fa   :  { %6791 = vmatprep.subr.bf16.mxu1 %v6790_v32 }
0x10fd   :  { %6793 = vmatpush3.bf16.msra.mxu1 %v6790_v32 }
0x10fe   :  { %6803 = vmatprep.subr.bf16.mxu1 %v6802_v49 }
0x1100   :  { %6406 = vmatmul.mubr.msk.f32.vlgmr.msra.gmra.mrb[32].mxu1 %vm67_vm0, %v7831_v54 }
0x1101   :  { %6805 = vmatpush3.bf16.msra.mxu1 %v6802_v49  ;;  %6427 = vmatprep.mubr.msk.f32.mxu1 %vm67_vm0, %v7833_v45 }
0x1102   :  { %6807 = vmatprep.subr.bf16.mxu1 %v6806_v56 }
0x1105   :  { %6809 = vmatpush3.bf16.msra.mxu1 %v6806_v56 }
0x1108   :  { %6428 = vmatmul.mubr.msk.f32.vlgmr.msra.gmra.mrb[34].mxu1 %vm67_vm0, %v7831_v54 }
0x11ba   :  { %v6371_v62 = vpop.f32.mrb[24].mxu0 }
0x11bb   :  { %3426 = vperm.xlu1 %6924, %v6371_v62   ;;  %3335 = vperm.xlu0 %6923, %v6371_v62   ;;  %v3319_v31 = vpop.f32.mrb[25].mxu0 }
0x11bf   :  { %6925 = vset.pattern.permute.xlu1 %v7059_v12  ;;  %6931 = vset.pattern.permute.xlu0 %v7060_v13 }
0x11c0   :  { %3438 = vperm.xlu1 %6925, %v6371_v62  }
0x11c4   :  { %6926 = vset.pattern.permute.xlu1 %v7058_v11 }
0x11c5   :  { %3330 = vperm.xlu1 %6926, %v3319_v31  }
0x11c9   :  { %6927 = vset.pattern.permute.xlu1 %v7060_v13 }
0x11ca   :  { %3422 = vperm.xlu1 %6927, %v3319_v31  }
0x11cb   :  { %v6378_v63 = vpop.f32.mrb[30].mxu1 }
0x11cc   :  { %v3412_v17 = vpop.f32.mrb[31].mxu1 }
0x11ce   :  { %6928 = vset.pattern.permute.xlu1 %v7059_v12 }
0x11cf   :  { %3434 = vperm.xlu1 %6928, %v3319_v31  }
0x11d3   :  { %v6407_v1 = vpop.f32.mrb[32].mxu1  ;;  %6929 = vset.pattern.permute.xlu1 %v7061_v14 }
0x11d4   :  { %v3871_v5 = vadd.f32 %v6407_v1, %v5720_v58  ;;  %v3865_v6 = vpop.f32.mrb[33].mxu1  ;;  %3446 = vperm.xlu1 %6929, %v3319_v31  }
0x11d5   :  { %v3866_v23 = vadd.f32 %v5720_v58, %v3865_v6 }
0x11d7   :  { %v6818_v7 = vpack.c.bf16 %v3871_v5, %v3866_v23 }
0x11d8   :  { %3450 = vperm.xlu1 %6929, %v6371_v62  }
0x11d9   :  { %6820 = vmatprep.subr.msk.bf16.mxu1 %vm7129_vm2, %v6818_v7 }
0x11da   :  { %6823 = vmatpush3.bf16.xpose.msk.msra.mxu1 %vm7129_vm2, %v6818_v7  ;;  %v5707_v7 = vld [vmem:[%s8482_s3 + $0x2c0] sm:$0xff] }
0x11db   :  { %v7967_v16 = vpop.f32.mrb[34].mxu1 }
0x11dc   :  { %v7969_v20 = vpop.f32.mrb[35].mxu1  ;;  %6930 = vset.pattern.permute.xlu1 %v7058_v11 }
0x123a   :  { %v3427_v24 = vpop.permute.xlu1 %3426  ;;  %v3336_v27 = vpop.permute.xlu0 %3335 }
0x123b   :  { %v3339_v3 = vmul.f32 %v7975_v35, %v3336_v27  ;;  %v3430_v61 = vmul.f32 %v7999_v4, %v3427_v24  ;;  %v5708_v24 = vld [vmem:[%s8482_s3 + $0x2c8] sm:$0xff] }
0x123d   :  { %v3418_v18 = vadd.f32 %v6378_v63, %v3339_v3 }
0x123f   :  { %v3439_v60 = vpop.permute.xlu1 %3438  ;;  %v3432_v52 = vadd.f32 %v3430_v61, %v3418_v18  ;;  %v5710_v61 = vld [vmem:[%s8482_s3 + $0x2d8] sm:$0xff] }
0x1240   :  { %v3442_v46 = vmul.f32 %v8005_v2, %v3439_v60  ;;  %v6778_v60 = vpack.c.bf16 %v5708_v24, %v5707_v7 }
0x1242   :  { %v3444_v42 = vadd.f32 %v3442_v46, %v3432_v52  ;;  %6779 = vmatprep.subr.bf16.mxu0 %v6778_v60 }
0x1244   :  { %v3331_v29 = vpop.permute.xlu1 %3330 }
0x1245   :  { %v3338_v34 = vmul.f32 %v7981_v19, %v3331_v29 }
0x1247   :  { %v3413_v43 = vadd.f32 %v3412_v17, %v3338_v34 }
0x1249   :  { %v3423_v33 = vpop.permute.xlu1 %3422 }
0x124a   :  { %v3429_v30 = vmul.f32 %v7987_v0, %v3423_v33 }
0x124c   :  { %v3431_v40 = vadd.f32 %v3429_v30, %v3413_v43 }
0x124e   :  { %v3435_v53 = vpop.permute.xlu1 %3434 }
0x124f   :  { %v3441_v59 = vmul.f32 %v7993_v25, %v3435_v53  ;;  %v8035_v53 = vld [vmem:[%s8480_s1] sm:$0xff] }
0x1251   :  { %v3443_v10 = vadd.f32 %v3441_v59, %v3431_v40  ;;  %v5709_v59 = vld [vmem:[%s8482_s3 + $0x2d0] sm:$0xff] }
0x1252   :  { %v6782_v46 = vpack.c.bf16 %v5710_v61, %v5709_v59 }
0x1253   :  { %v3447_v15 = vpop.permute.xlu1 %3446 }
0x1254   :  { %v3453_v22 = vmul.f32 %v8011_v37, %v3447_v15  ;;  %v8051_v15 = vld [vmem:[%s8480_s1 + $0x8] sm:$0xff] }
0x1256   :  { %v3455_v28 = vadd.f32 %v3453_v22, %v3443_v10  ;;  %v5723_v10 = vld [vmem:[%s8482_s3 + $0x300] sm:$0xff]  ;;  %v5724_v22 = vld [vmem:[%s8482_s3 + $0x308] sm:$0xff] }
0x1257   :  { %v3451_v36 = vpop.permute.xlu1 %3450 }
0x1258   :  { %v3454_v32 = vmul.f32 %v8017_v21, %v3451_v36  ;;  %v3457_v48 = vadd.f32 %v3455_v28, %v7529_v39  ;;  %v6794_v28 = vpack.c.bf16 %v5724_v22, %v5723_v10  ;;  %v5725_v36 = vld [vmem:[%s8482_s3 + $0x310] sm:$0xff] }
0x125a   :  { %v3456_v38 = vadd.f32 %v3454_v32, %v3444_v42  ;;  %v3459_v49 = vsel %vm298_vm5, %v3457_v48, -inf  ;;  %v5726_v42 = vld [vmem:[%s8482_s3 + $0x318] sm:$0xff] }
0x125b   :  { %3460 = vmax.xlane.f32.xlu1 %v3459_v49  ;;  %v6798_v32 = vpack.c.bf16 %v5726_v42, %v5725_v36 }
0x125c   :  { %v3458_v51 = vadd.f32 %v3456_v38, %v7541_v50  ;;  %v5740_v38 = vld [vmem:[%s8482_s3 + $0x348] sm:$0xff] }
0x125e   :  { %v3462_v57 = vsel %vm298_vm5, %v3458_v51, -inf }
0x125f   :  { %3463 = vmax.xlane.f32.xlu0 %v3462_v57  ;;  %v5742_v57 = vld [vmem:[%s8482_s3 + $0x358] sm:$0xff] }
0x12e8   :  { %v3461_v56 = vpop.xlane.xlu1 %3460 }
0x12e9   :  { %v3465_v62 = vsub.f32 %v3457_v48, %v3461_v56  ;;  %v5739_v48 = vld [vmem:[%s8482_s3 + $0x340] sm:$0xff] }
0x12ea   :  { %v6810_v49 = vpack.c.bf16 %v5740_v38, %v5739_v48 }
0x12eb   :  { %v3467_v31 = vmul.f32 1.442695, %v3465_v62 }
0x12ec   :  { %v3464_v63 = vpop.xlane.xlu0 %3463 }
0x12ed   :  { %6978 = vpow2.f32 %v3467_v31  ;;  %v3466_v17 = vsub.f32 %v3458_v51, %v3464_v63  ;;  %v5741_v51 = vld [vmem:[%s8482_s3 + $0x350] sm:$0xff]  ;;  %v5712_v63 = vld [vmem:[%s8483_s4 + $0x28] ss:$0 sm:$0xff] }
0x12ee   :  { %v6814_v56 = vpack.c.bf16 %v5742_v57, %v5741_v51 }
0x12ef   :  { %v3469_v58 = vmul.f32 1.442695, %v3466_v17 }
0x12f1   :  { %6980 = vpow2.f32 %v3469_v58 }
0x12f7   :  { %v6979_v1 = vpop.eup %6978 }
0x12f8   :  { %v3471_v5 = vsel %vm298_vm5, %v6979_v1, 0.0 }
0x12f9   :  { %3472 = vadd.xlane.f32.xlu0 %v3471_v5 }
0x12fb   :  { %v6981_v6 = vpop.eup %6980 }
0x12fc   :  { %v3474_v23 = vsel %vm298_vm5, %v6981_v6, 0.0 }
0x12fd   :  { %3475 = vadd.xlane.f32.xlu1 %v3474_v23 }
0x1386   :  { %v3473_v29 = vpop.xlane.xlu0 %3472 }
0x1387   :  { %v3477_v27 = vmax.f32 %v3473_v29, 1e-20 }
0x1389   :  { %6982 = vrcp.f32 %v3477_v27 }
0x138a   :  { %v3476_v33 = vpop.xlane.xlu1 %3475 }
0x138b   :  { %v3478_v3 = vmax.f32 %v3476_v33, 1e-20 }
0x138d   :  { %6984 = vrcp.f32 %v3478_v3 }
0x1393   :  { %v6983_v34 = vpop.eup %6982 }
0x1394   :  { %v3481_v30 = vmul.f32 %v6983_v34, %v6979_v1 }
0x1396   :  { %v8038_v18 = vmul.f32 %v8035_v53, %v3481_v30 }
0x1397   :  { %v6985_v43 = vpop.eup %6984 }
0x1398   :  { %v3482_v40 = vmul.f32 %v6985_v43, %v6981_v6  ;;  %6383 = vmatprep.mubr.msk.f32.mxu0 %vm298_vm5, %v8038_v18  ;;  %v5728_v6 = vld [vmem:[%s8483_s4 + $0x2a] ss:$0 sm:$0xff] }
0x139a   :  { %v8054_v52 = vmul.f32 %v8051_v15, %v3482_v40 }
0x139c   :  { %6384 = vmatmul.mubr.msk.f32.vlgmr.msra.gmra.mrb[26].mxu0 %vm298_vm5, %v8054_v52 }
0x139d   :  { %6781 = vmatpush3.bf16.msra.mxu0 %v6778_v60  ;;  %6394 = vmatprep.mubr.msk.f32.mxu0 %vm67_vm0, %v7833_v45 }
0x139e   :  { %6783 = vmatprep.subr.bf16.mxu0 %v6782_v46 }
0x13a1   :  { %6785 = vmatpush3.bf16.msra.mxu0 %v6782_v46 }
0x13a2   :  { %6795 = vmatprep.subr.bf16.mxu0 %v6794_v28 }
0x13a4   :  { %6395 = vmatmul.mubr.msk.f32.vlgmr.msra.gmra.mrb[28].mxu0 %vm67_vm0, %v7831_v54 }
0x13a5   :  { %6797 = vmatpush3.bf16.msra.mxu0 %v6794_v28  ;;  %6416 = vmatprep.mubr.msk.f32.mxu0 %vm67_vm0, %v7833_v45 }
0x13a6   :  { %6799 = vmatprep.subr.bf16.mxu0 %v6798_v32 }
0x13a9   :  { %6801 = vmatpush3.bf16.msra.mxu0 %v6798_v32 }
0x13aa   :  { %6811 = vmatprep.subr.bf16.mxu0 %v6810_v49 }
0x13ac   :  { %6417 = vmatmul.mubr.msk.f32.vlgmr.msra.gmra.mrb[30].mxu0 %vm67_vm0, %v7831_v54 }
0x13ad   :  { %6813 = vmatpush3.bf16.msra.mxu0 %v6810_v49 }
0x13ae   :  { %6815 = vmatprep.subr.bf16.mxu0 %v6814_v56 }
0x13b1   :  { %6817 = vmatpush3.bf16.msra.mxu0 %v6814_v56 }
0x146f   :  { %v8090_v62 = vpop.f32.mrb[26].mxu0 }
0x1470   :  { %v8092_v31 = vpop.f32.mrb[27].mxu0 }
0x1477   :  { %v6396_v17 = vpop.f32.mrb[28].mxu0 }
0x1478   :  { %v3777_v58 = vpop.f32.mrb[29].mxu0  ;;  %v3783_v5 = vadd.f32 %v6396_v17, %v5712_v63 }
0x1479   :  { %v3778_v1 = vadd.f32 %v5712_v63, %v3777_v58 }
0x147b   :  { %6438 = vmatprep.mubr.msk.f32.mxu0 %vm67_vm0, %v3778_v1  ;;  %6445 = vmatprep.mubr.msk.f32.mxu1 %vm67_vm0, %v3778_v1 }
0x147c   :  { %6439 = vmatmul.mubr.msk.f32.vlgmr.msra.gmra.mrb[32].mxu0 %vm67_vm0, %v3783_v5  ;;  %6446 = vmatmul.mubr.msk.f32.vlgmr.msra.gmra.mrb[36].mxu1 %vm67_vm0, %v3783_v5 }
0x147f   :  { %v6418_v23 = vpop.f32.mrb[30].mxu0 }
0x1480   :  { %v3959_v7 = vadd.f32 %v6418_v23, %v5728_v6  ;;  %v3953_v24 = vpop.f32.mrb[31].mxu0 }
0x1481   :  { %v3954_v60 = vadd.f32 %v5728_v6, %v3953_v24 }
0x1483   :  { %v6824_v29 = vpack.c.bf16 %v3959_v7, %v3954_v60 }
0x1485   :  { %6825 = vmatprep.subr.bf16.mxu0 %v6824_v29 }
0x1486   :  { %6827 = vmatpush3.bf16.msra.mxu0 %v6824_v29 }
0x1487   :  { %6844 = vmatprep.subr.bf16.mxu0 %v7055_v8 }
0x154f   :  { %v6440_v27 = vpop.f32.mrb[32].mxu0  ;;  %v6447_v33 = vpop.f32.mrb[36].mxu1 }
0x1550   :  { %v4220_v3 = vpop.f32.mrb[37].mxu1  ;;  %4234 = vperm.xlu0 %6931, %v6440_v27   ;;  %4143 = vperm.xlu1 %6930, %v6440_v27   ;;  %v4127_v34 = vpop.f32.mrb[33].mxu0 }
0x1554   :  { %6933 = vset.pattern.permute.xlu0 %v7058_v11  ;;  %6932 = vset.pattern.permute.xlu1 %v7059_v12 }
0x1555   :  { %4246 = vperm.xlu1 %6932, %v6440_v27   ;;  %4138 = vperm.xlu0 %6933, %v4127_v34  }
0x1559   :  { %6934 = vset.pattern.permute.xlu1 %v7060_v13  ;;  %6936 = vset.pattern.permute.xlu0 %v7061_v14 }
0x155a   :  { %4230 = vperm.xlu1 %6934, %v4127_v34   ;;  %4254 = vperm.xlu0 %6936, %v4127_v34  }
0x155e   :  { %6935 = vset.pattern.permute.xlu1 %v7059_v12 }
0x155f   :  { %4242 = vperm.xlu1 %6935, %v4127_v34  }
0x1563   :  { %6937 = vset.pattern.permute.xlu1 %v7061_v14 }
0x1564   :  { %4258 = vperm.xlu1 %6937, %v6440_v27  }
0x15cf   :  { %v4144_v30 = vpop.permute.xlu1 %4143  ;;  %v4235_v43 = vpop.permute.xlu0 %4234 }
0x15d0   :  { %v4147_v61 = vmul.f32 %v7975_v35, %v4144_v30  ;;  %v4238_v28 = vmul.f32 %v7999_v4, %v4235_v43  ;;  %v3486_v43 = vmul.f32 %v7975_v35, %v8054_v52 }
0x15d2   :  { %v4226_v10 = vadd.f32 %v6447_v33, %v4147_v61 }
0x15d4   :  { %v4247_v59 = vpop.permute.xlu1 %4246  ;;  %v4139_v11 = vpop.permute.xlu0 %4138  ;;  %v4240_v32 = vadd.f32 %v4238_v28, %v4226_v10 }
0x15d5   :  { %v4146_v40 = vmul.f32 %v7981_v19, %v4139_v11  ;;  %v4250_v48 = vmul.f32 %v8005_v2, %v4247_v59  ;;  %v3490_v59 = vsel %vm298_vm5, %v3486_v43, 0.0  ;;  %v3584_v11 = vmul.f32 %v7987_v0, %v8038_v18  ;;  %v5692_v43 = vld [vmem:[%s8483_s4 + $0x24] ss:$0 sm:$0xff] }
0x15d7   :  { %v4221_v22 = vadd.f32 %v4220_v3, %v4146_v40  ;;  %v4252_v56 = vadd.f32 %v4250_v48, %v4240_v32  ;;  %v3485_v3 = vmul.f32 %v7981_v19, %v8038_v18  ;;  %v3586_v61 = vsel %vm298_vm5, %v3584_v11, 0.0  ;;  %v5736_v48 = vld [vmem:[%s8483_s4 + $0x2b] ss:$0 sm:$0xff]  ;;  %v5696_v11 = vld [vmem:[%s8483_s4 + $0x25] ss:$0 sm:$0xff] }
0x15d8   :  { %v3585_v40 = vmul.f32 %v7999_v4, %v8054_v52  ;;  %v3625_v32 = vmul.f32 %v8017_v21, %v8054_v52 }
0x15d9   :  { %v4231_v46 = vpop.permute.xlu1 %4230  ;;  %v4255_v12 = vpop.permute.xlu0 %4254  ;;  %v3487_v30 = vsel %vm298_vm5, %v3485_v3, 0.0 }
0x15da   :  { %v4237_v13 = vmul.f32 %v7987_v0, %v4231_v46  ;;  %v4261_v38 = vmul.f32 %v8011_v37, %v4255_v12  ;;  %v3589_v46 = vsel %vm298_vm5, %v3585_v40, 0.0  ;;  %v3624_v12 = vmul.f32 %v8011_v37, %v8038_v18 }
0x15dc   :  { %v4239_v42 = vadd.f32 %v4237_v13, %v4221_v22  ;;  %v3604_v13 = vmul.f32 %v7993_v25, %v8038_v18  ;;  %v3605_v22 = vmul.f32 %v8005_v2, %v8054_v52  ;;  %v5702_v18 = vld [vmem:[%s8483_s4 + $0x21] ss:$0 sm:$0xff]  ;;  %v5760_v52 = vld [vmem:[%s8483_s4 + $0x2c] ss:$0 sm:$0xff] }
0x15de   :  { %v4243_v36 = vpop.permute.xlu1 %4242  ;;  %v3606_v10 = vsel %vm298_vm5, %v3604_v13, 0.0  ;;  %v3609_v28 = vsel %vm298_vm5, %v3605_v22, 0.0 }
0x15df   :  { %v4249_v14 = vmul.f32 %v7993_v25, %v4243_v36  ;;  %v5678_v36 = vld [vmem:[%s8483_s4 + $0x20] ss:$0 sm:$0xff] }
0x15e1   :  { %v4251_v49 = vadd.f32 %v4249_v14, %v4239_v42  ;;  %v8149_v42 = vadd.f32 %v5678_v36, %v7925_v44  ;;  %v3626_v14 = vsel %vm298_vm5, %v3624_v12, 0.0  ;;  %v3629_v44 = vsel %vm298_vm5, %v3625_v32, 0.0 }
0x15e3   :  { %v4263_v51 = vadd.f32 %v4261_v38, %v4251_v49  ;;  %v4259_v57 = vpop.permute.xlu1 %4258  ;;  %v8161_v38 = vadd.f32 %v5736_v48, %v7969_v20  ;;  %v3652_v49 = vmul.f32 %v5702_v18, %v8149_v42  ;;  %v8174_v20 = vadd.f32 %v7967_v16, %v5736_v48 }
0x15e4   :  { %v4262_v63 = vmul.f32 %v8017_v21, %v4259_v57 }
0x15e5   :  { %v4265_v17 = vadd.f32 %v4263_v51, %v7529_v39  ;;  %v8169_v51 = vadd.f32 %v7923_v41, %v5678_v36  ;;  %v3654_v57 = vsel %vm67_vm0, %v3652_v49, 0.0 }
0x15e6   :  { %v4264_v58 = vadd.f32 %v4262_v63, %v4252_v56  ;;  %v4460_v56 = vmul.f32 %v5760_v52, %v8161_v38 }
0x15e7   :  { %v4267_v1 = vsel %vm298_vm5, %v4265_v17, -inf }
0x15e8   :  { %4268 = vmax.xlane.f32.xlu1 %v4267_v1  ;;  %v4266_v5 = vadd.f32 %v4264_v58, %v7541_v50  ;;  %v4462_v63 = vsel %vm67_vm0, %v4460_v56, 0.0  ;;  %v4461_v1 = vmul.f32 %v5760_v52, %v8174_v20 }
0x15ea   :  { %v4270_v6 = vsel %vm298_vm5, %v4266_v5, -inf  ;;  %v4465_v41 = vsel %vm67_vm0, %v4461_v1, 0.0 }
0x15eb   :  { %4271 = vmax.xlane.f32.xlu0 %v4270_v6 }
0x1675   :  { %v4269_v23 = vpop.xlane.xlu1 %4268 }
0x1676   :  { %v4273_v7 = vsub.f32 %v4265_v17, %v4269_v23  ;;  %v3653_v17 = vmul.f32 %v5702_v18, %v8169_v51 }
0x1678   :  { %v4275_v24 = vmul.f32 1.442695, %v4273_v7  ;;  %v4272_v60 = vpop.xlane.xlu0 %4271  ;;  %v3657_v58 = vsel %vm67_vm0, %v3653_v17, 0.0 }
0x1679   :  { %v4274_v29 = vsub.f32 %v4266_v5, %v4272_v60 }
0x167a   :  { %6986 = vpow2.f32 %v4275_v24 }
0x167b   :  { %v4277_v27 = vmul.f32 1.442695, %v4274_v29 }
0x167d   :  { %6988 = vpow2.f32 %v4277_v27 }
0x1684   :  { %v6987_v33 = vpop.eup %6986 }
0x1685   :  { %v4279_v39 = vsel %vm298_vm5, %v6987_v33, 0.0 }
0x1686   :  { %4280 = vadd.xlane.f32.xlu0 %v4279_v39 }
0x1687   :  { %v6989_v34 = vpop.eup %6988 }
0x1688   :  { %v4282_v50 = vsel %vm298_vm5, %v6989_v34, 0.0 }
0x1689   :  { %4283 = vadd.xlane.f32.xlu1 %v4282_v50 }
0x168a   :  { %3488 = vadd.xlane.f32.xlu0 %v3487_v30 }
0x168e   :  { %3491 = vadd.xlane.f32.xlu0 %v3490_v59 }
0x1692   :  { %3587 = vadd.xlane.f32.xlu0 %v3586_v61 }
0x1696   :  { %3590 = vadd.xlane.f32.xlu0 %v3589_v46 }
0x169a   :  { %3607 = vadd.xlane.f32.xlu0 %v3606_v10 }
0x169e   :  { %3610 = vadd.xlane.f32.xlu0 %v3609_v28 }
0x16a2   :  { %3627 = vadd.xlane.f32.xlu0 %v3626_v14 }
0x16a6   :  { %3630 = vadd.xlane.f32.xlu0 %v3629_v44 }
0x16aa   :  { %3655 = vadd.xlane.f32.xlu0 %v3654_v57 }
0x16ae   :  { %4463 = vadd.xlane.f32.xlu0 %v4462_v63 }
0x16b2   :  { %3658 = vadd.xlane.f32.xlu0 %v3657_v58 }
0x16b6   :  { %4466 = vadd.xlane.f32.xlu0 %v4465_v41 }
0x1713   :  { %v4281_v5 = vpop.xlane.xlu0 %4280 }
0x1714   :  { %v4285_v6 = vmax.f32 %v4281_v5, 1e-20 }
0x1716   :  { %6990 = vrcp.f32 %v4285_v6  ;;  %v4284_v23 = vpop.xlane.xlu1 %4283 }
0x1717   :  { %v4286_v7 = vmax.f32 %v4284_v23, 1e-20  ;;  %v3489_v16 = vpop.xlane.xlu0 %3488 }
0x1718   :  { %v3501_v40 = vmul.f32 %v5692_v43, %v3489_v16 }
0x1719   :  { %6992 = vrcp.f32 %v4286_v7 }
0x171a   :  { %v3576_v10 = vadd.f32 %v8092_v31, %v3501_v40 }
0x171b   :  { %v3492_v24 = vpop.xlane.xlu0 %3491 }
0x171c   :  { %v3502_v22 = vmul.f32 %v5692_v43, %v3492_v24 }
0x171f   :  { %v3588_v60 = vpop.xlane.xlu0 %3587 }
0x1720   :  { %v6991_v29 = vpop.eup %6990 }
0x1721   :  { %v4289_v27 = vmul.f32 %v6991_v29, %v6987_v33 }
0x1723   :  { %v6993_v39 = vpop.eup %6992  ;;  %v3591_v3 = vpop.xlane.xlu0 %3590  ;;  %v4291_v50 = vmul.f32 %v8035_v53, %v4289_v27  ;;  %v5698_v53 = vld [vmem:[%s8483_s4 + $0x26] ss:$0 sm:$0xff] }
0x1724   :  { %v4290_v30 = vmul.f32 %v6993_v39, %v6989_v34  ;;  %v3600_v34 = vmul.f32 %v5696_v11, %v3588_v60  ;;  %v3601_v36 = vmul.f32 %v5696_v11, %v3591_v3  ;;  %v5704_v3 = vld [vmem:[%s8483_s4 + $0x22] ss:$0 sm:$0xff] }
0x1725   :  { %6452 = vmatprep.mubr.msk.f32.mxu0 %vm298_vm5, %v4291_v50  ;;  %v4293_v56 = vmul.f32 %v7981_v19, %v4291_v50  ;;  %v4392_v6 = vmul.f32 %v7987_v0, %v4291_v50  ;;  %v4412_v24 = vmul.f32 %v7993_v25, %v4291_v50  ;;  %v4432_v0 = vmul.f32 %v8011_v37, %v4291_v50  ;;  %v5476_v37 = vld [vmem:[%s8481_s2 + $0x2] sm:$0x3] }
0x1726   :  { %v4292_v59 = vmul.f32 %v8051_v15, %v4290_v30  ;;  %v3602_v12 = vadd.f32 %v3600_v34, %v3576_v10  ;;  %v2843_v50 = vrot.slane %v5476_v37, %v7205_v55  ;;  %v5754_v55 = vld [vmem:[%s8483_s4 + $0x30] ss:$0 sm:$0xff] }
0x1727   :  { %v3608_v61 = vpop.xlane.xlu0 %3607  ;;  %v4295_v41 = vsel %vm298_vm5, %v4293_v56, 0.0  ;;  %v4394_v7 = vsel %vm298_vm5, %v4392_v6, 0.0  ;;  %v4414_v29 = vsel %vm298_vm5, %v4412_v24, 0.0  ;;  %v4434_v27 = vsel %vm298_vm5, %v4432_v0, 0.0 }
0x1728   :  { %6453 = vmatmul.mubr.msk.f32.vlgmr.msra.gmra.mrb[34].mxu0 %vm298_vm5, %v4292_v59  ;;  %v4294_v33 = vmul.f32 %v7975_v35, %v4292_v59  ;;  %v4393_v46 = vmul.f32 %v7999_v4, %v4292_v59  ;;  %v3620_v28 = vmul.f32 %v5698_v53, %v3608_v61  ;;  %v5700_v35 = vld [vmem:[%s8483_s4 + $0x27] ss:$0 sm:$0xff]  ;;  %v4413_v32 = vmul.f32 %v8005_v2, %v4292_v59  ;;  %v5706_v2 = vld [vmem:[%s8483_s4 + $0x23] ss:$0 sm:$0xff] }
0x1729   :  { %6481 = vmatprep.mubr.msk.f32.mxu0 %vm7056_vm1, %v7057_v9  ;;  %v3581_v4 = vadd.f32 %v8090_v62, %v3502_v22  ;;  %v4433_v39 = vmul.f32 %v8017_v21, %v4292_v59  ;;  %v2853_v59 = vsub.s32 1, %v7190_v47  ;;  %v5756_v47 = vld [vmem:[%s8483_s4 + $0x31] ss:$0 sm:$0xff] }
0x172a   :  { %v4298_v15 = vsel %vm298_vm5, %v4294_v33, 0.0  ;;  %v4397_v14 = vsel %vm298_vm5, %v4393_v46, 0.0  ;;  %v3622_v18 = vadd.f32 %v3620_v28, %v3602_v12  ;;  %v4417_v57 = vsel %vm298_vm5, %v4413_v32, 0.0 }
0x172b   :  { %4299 = vadd.xlane.f32.xlu1 %v4298_v15  ;;  %v3611_v13 = vpop.xlane.xlu0 %3610  ;;  %v3603_v31 = vadd.f32 %v3601_v36, %v3581_v4  ;;  %v4437_v25 = vsel %vm298_vm5, %v4433_v39, 0.0  ;;  %v2854_v61 = vrot.slane %v5476_v37, %v2853_v59  ;;  %v5769_v39 = vld [vmem:[%s8482_s3 + $0x360] sm:$0xff] }
0x172c   :  { %v3621_v44 = vmul.f32 %v5698_v53, %v3611_v13  ;;  %v5750_v13 = vld [vmem:[%s8483_s4 + $0x2f] ss:$0 sm:$0xff]  ;;  %v5765_v37 = vld [vmem:[%s8482_s3 + $0x2a0] sm:$0xff] }
0x172e   :  { %v3623_v17 = vadd.f32 %v3621_v44, %v3603_v31  ;;  %v5758_v44 = vld [vmem:[%s8483_s4 + $0x32] ss:$0 sm:$0xff] }
0x172f   :  { %4398 = vadd.xlane.f32.xlu1 %v4397_v14  ;;  %v3628_v48 = vpop.xlane.xlu0 %3627 }
0x1730   :  { %v3640_v49 = vmul.f32 %v5700_v35, %v3628_v48 }
0x1732   :  { %v8206_v52 = vadd.f32 %v3640_v49, %v3622_v18 }
0x1733   :  { %4418 = vadd.xlane.f32.xlu1 %v4417_v57  ;;  %v3631_v63 = vpop.xlane.xlu0 %3630 }
0x1734   :  { %v3641_v58 = vmul.f32 %v5700_v35, %v3631_v63  ;;  %v3678_v62 = vsub.f32 %v8149_v42, %v8206_v52  ;;  %v3668_v30 = vmul.f32 %v5704_v3, %v8206_v52 }
0x1736   :  { %v8215_v1 = vadd.f32 %v3641_v58, %v3623_v17  ;;  %v3688_v5 = vmul.f32 %v5706_v2, %v3678_v62  ;;  %v3670_v43 = vsel %vm67_vm0, %v3668_v30, 0.0  ;;  %v5762_v58 = vld [vmem:[%s8483_s4 + $0x2d] ss:$0 sm:$0xff] }
0x1737   :  { %4296 = vadd.xlane.f32.xlu1 %v4295_v41  ;;  %v3656_v59 = vpop.xlane.xlu0 %3655 }
0x1738   :  { %v3690_v19 = vsel %vm67_vm0, %v3688_v5, 0.0  ;;  %v3679_v23 = vsub.f32 %v8169_v51, %v8215_v1  ;;  %v3669_v11 = vmul.f32 %v5704_v3, %v8215_v1  ;;  %v5770_v3 = vld [vmem:[%s8482_s3 + $0x368] sm:$0xff] }
0x1739   :  { %3691 = vadd.xlane.f32.xlu0 %v3690_v19  ;;  %v6828_v30 = vpack.c.bf16 %v5770_v3, %v5769_v39 }
0x173a   :  { %v3689_v16 = vmul.f32 %v5706_v2, %v3679_v23  ;;  %v3673_v21 = vsel %vm67_vm0, %v3669_v11, 0.0 }
0x173b   :  { %4395 = vadd.xlane.f32.xlu1 %v4394_v7  ;;  %v5764_v7 = vld [vmem:[%s8483_s4 + $0x2e] ss:$0 sm:$0xff]  ;;  %6829 = vmatprep.subr.bf16.mxu1 %v6828_v30 }
0x173c   :  { %v3693_v60 = vsel %vm67_vm0, %v3689_v16, 0.0  ;;  %6831 = vmatpush3.bf16.msra.mxu1 %v6828_v30 }
0x173d   :  { %3694 = vadd.xlane.f32.xlu0 %v3693_v60 }
0x173f   :  { %4415 = vadd.xlane.f32.xlu1 %v4414_v29 }
0x1743   :  { %4435 = vadd.xlane.f32.xlu1 %v4434_v27 }
0x1747   :  { %4438 = vadd.xlane.f32.xlu1 %v4437_v25  ;;  %v5771_v25 = vld [vmem:[%s8482_s3 + $0x370] sm:$0xff] }
0x174b   :  { %3671 = vadd.xlane.f32.xlu1 %v3670_v43  ;;  %v5772_v43 = vld [vmem:[%s8482_s3 + $0x378] sm:$0xff] }
0x174c   :  { %v6832_v11 = vpack.c.bf16 %v5772_v43, %v5771_v25 }
0x174e   :  { %6833 = vmatprep.subr.bf16.mxu1 %v6832_v11 }
0x174f   :  { %3674 = vadd.xlane.f32.xlu1 %v3673_v21  ;;  %6835 = vmatpush3.bf16.msra.mxu1 %v6832_v11  ;;  %v5766_v21 = vld [vmem:[%s8482_s3 + $0x2a8] sm:$0xff] }
0x1753   :  { %2845 = vbcast.lane.b32.xlu0 %v2843_v50, 256 }
0x1757   :  { %2860 = vbcast.lane.b32.xlu0 %v2854_v61, 264 }
0x17b8   :  { %v4300_v40 = vpop.xlane.xlu1 %4299 }
0x17b9   :  { %v4310_v22 = vmul.f32 %v5750_v13, %v4300_v40 }
0x17bc   :  { %v4399_v33 = vpop.xlane.xlu1 %4398 }
0x17bd   :  { %v4409_v12 = vmul.f32 %v5754_v55, %v4399_v33 }
0x17c0   :  { %v4419_v53 = vpop.xlane.xlu1 %4418 }
0x17c1   :  { %v4429_v18 = vmul.f32 %v5756_v47, %v4419_v53 }
0x17c4   :  { %v4297_v34 = vpop.xlane.xlu1 %4296 }
0x17c5   :  { %v4309_v28 = vmul.f32 %v5750_v13, %v4297_v34 }
0x17c8   :  { %v4396_v15 = vpop.xlane.xlu1 %4395 }
0x17c9   :  { %v4408_v32 = vmul.f32 %v5754_v55, %v4396_v15 }
0x17cc   :  { %v4416_v46 = vpop.xlane.xlu1 %4415 }
0x17cd   :  { %v4428_v31 = vmul.f32 %v5756_v47, %v4416_v46 }
0x17d0   :  { %v4436_v10 = vpop.xlane.xlu1 %4435 }
0x17d1   :  { %v4448_v2 = vmul.f32 %v5758_v44, %v4436_v10 }
0x17d4   :  { %v4439_v48 = vpop.xlane.xlu1 %4438 }
0x17d5   :  { %v4449_v56 = vmul.f32 %v5758_v44, %v4439_v48 }
0x17d8   :  { %v3672_v40 = vpop.xlane.xlu1 %3671 }
0x17d9   :  { %v3676_v13 = vadd.f32 %v3672_v40, %v3656_v59 }
0x17dc   :  { %v3675_v53 = vpop.xlane.xlu1 %3674 }
0x17fb   :  { %v6454_v35 = vpop.f32.mrb[34].mxu0 }
0x17fc   :  { %v4389_v36 = vadd.f32 %v6454_v35, %v4310_v22  ;;  %v4383_v14 = vpop.f32.mrb[35].mxu0 }
0x17fd   :  { %v4384_v4 = vadd.f32 %v4383_v14, %v4309_v28 }
0x17fe   :  { %v4411_v49 = vadd.f32 %v4409_v12, %v4389_v36 }
0x17ff   :  { %v4410_v57 = vadd.f32 %v4408_v32, %v4384_v4 }
0x1800   :  { %v4431_v63 = vadd.f32 %v4429_v18, %v4411_v49 }
0x1801   :  { %v4430_v17 = vadd.f32 %v4428_v31, %v4410_v57 }
0x1802   :  { %v8257_v62 = vadd.f32 %v4449_v56, %v4431_v63 }
0x1803   :  { %v8259_v41 = vadd.f32 %v4448_v2, %v4430_v17 }
0x1804   :  { %v4477_v5 = vmul.f32 %v5762_v58, %v8257_v62  ;;  %v4487_v60 = vsub.f32 %v8174_v20, %v8257_v62 }
0x1805   :  { %v4476_v19 = vmul.f32 %v5762_v58, %v8259_v41  ;;  %v4486_v23 = vsub.f32 %v8161_v38, %v8259_v41 }
0x1806   :  { %v4481_v6 = vsel %vm67_vm0, %v4477_v5, 0.0  ;;  %v4497_v0 = vmul.f32 %v5764_v7, %v4487_v60  ;;  %v5767_v60 = vld [vmem:[%s8482_s3 + $0x2b0] sm:$0xff] }
0x1807   :  { %4482 = vadd.xlane.f32.xlu1 %v4481_v6  ;;  %v4478_v16 = vsel %vm67_vm0, %v4476_v19, 0.0  ;;  %v4496_v24 = vmul.f32 %v5764_v7, %v4486_v23 }
0x1808   :  { %v4501_v27 = vsel %vm67_vm0, %v4497_v0, 0.0 }
0x1809   :  { %v4498_v29 = vsel %vm67_vm0, %v4496_v24, 0.0 }
0x180b   :  { %4479 = vadd.xlane.f32.xlu1 %v4478_v16 }
0x180f   :  { %4499 = vadd.xlane.f32.xlu1 %v4498_v29  ;;  %v5768_v29 = vld [vmem:[%s8482_s3 + $0x2b8] sm:$0xff] }
0x1810   :  { %v6840_v39 = vpack.c.bf16 %v5768_v29, %v5767_v60 }
0x1813   :  { %4502 = vadd.xlane.f32.xlu1 %v4501_v27 }
0x1824   :  { %2849 = vbcast.lane.b32.xlu1 %v2843_v50, 264  ;;  %v6836_v50 = vpack.c.bf16 %v5766_v21, %v5765_v37 }
0x1826   :  { %6837 = vmatprep.subr.bf16.mxu1 %v6836_v50 }
0x1828   :  { %2856 = vbcast.lane.b32.xlu1 %v2854_v61, 256  ;;  %v4464_v61 = vpop.xlane.xlu0 %4463 }
0x182c   :  { %v3659_v33 = vpop.xlane.xlu0 %3658 }
0x182d   :  { %v3677_v28 = vadd.f32 %v3675_v53, %v3659_v33  ;;  %v5778_v53 = vld [vmem:[%s8483_s4 + $0x34] ss:$0 sm:$0xff] }
0x1830   :  { %v4467_v15 = vpop.xlane.xlu0 %4466 }
0x1834   :  { %v3692_v10 = vpop.xlane.xlu0 %3691 }
0x1835   :  { %v3696_v47 = vadd.f32 %v3692_v10, %v3676_v13 }
0x1838   :  { %v3695_v14 = vpop.xlane.xlu0 %3694 }
0x1839   :  { %v3697_v48 = vadd.f32 %v3695_v14, %v3677_v28 }
0x1894   :  { %v4483_v34 = vpop.xlane.xlu1 %4482 }
0x1895   :  { %v4485_v12 = vadd.f32 %v4483_v34, %v4467_v15 }
0x1898   :  { %v4480_v46 = vpop.xlane.xlu1 %4479 }
0x1899   :  { %v4484_v55 = vadd.f32 %v4480_v46, %v4464_v61 }
0x189c   :  { %v4500_v22 = vpop.xlane.xlu1 %4499 }
0x189d   :  { %v4504_v35 = vadd.f32 %v4500_v22, %v4484_v55 }
0x189f   :  { %v4506_v36 = vadd.f32 %v4504_v35, %v3696_v47 }
0x18a0   :  { %v4503_v32 = vpop.xlane.xlu1 %4502 }
0x18a1   :  { %v4508_v4 = vsub.f32 0.0, %v4506_v36  ;;  %v4505_v18 = vadd.f32 %v4503_v32, %v4485_v12 }
0x18a3   :  { %v4510_v44 = vmul.f32 1.442695, %v4508_v4  ;;  %v4507_v49 = vadd.f32 %v4505_v18, %v3697_v48 }
0x18a5   :  { %6994 = vpow2.f32 %v4510_v44  ;;  %v4509_v31 = vsub.f32 0.0, %v4507_v49 }
0x18a7   :  { %v4512_v57 = vmul.f32 1.442695, %v4509_v31 }
0x18a9   :  { %6996 = vpow2.f32 %v4512_v57 }
0x18af   :  { %v6995_v56 = vpop.eup %6994 }
0x18b0   :  { %v4514_v63 = vadd.f32 1.0, %v6995_v56 }
0x18b2   :  { %6998 = vrcp.f32 %v4514_v63 }
0x18b3   :  { %v6997_v2 = vpop.eup %6996 }
0x18b4   :  { %v4515_v17 = vadd.f32 1.0, %v6997_v2 }
0x18b6   :  { %7000 = vrcp.f32 %v4515_v17 }
0x18bc   :  { %v6999_v58 = vpop.eup %6998 }
0x18bd   :  { %v4520_v5 = vsub.f32 1.0, %v6999_v58  ;;  %v4531_v6 = vmul.f32 %v6999_v58, %v8161_v38 }
0x18bf   :  { %v4533_v19 = vmul.f32 %v4520_v5, %v8259_v41  ;;  %v4522_v24 = vmul.f32 %v4520_v5, %v8206_v52  ;;  %v4518_v41 = vmul.f32 %v6999_v58, %v8149_v42  ;;  %v2850_v42 = vpop.permute.xlu1 %2849  ;;  %v7030_v58 = vld [vmem:[%s8481_s2] sm:$0x3] }
0x18c0   :  { %v7001_v23 = vpop.eup %7000  ;;  %v2863_v11 = vadd.f32 %v2850_v42, %v7831_v54 }
0x18c1   :  { %v4535_v7 = vadd.f32 %v4533_v19, %v4531_v6  ;;  %v4521_v16 = vsub.f32 1.0, %v7001_v23  ;;  %v4532_v0 = vmul.f32 %v7001_v23, %v8174_v20  ;;  %v4524_v3 = vadd.f32 %v4522_v24, %v4518_v41  ;;  %v2846_v20 = vpop.permute.xlu0 %2845 }
0x18c2   :  { %v4519_v25 = vmul.f32 %v7001_v23, %v8169_v51  ;;  %v2867_v21 = vsel %vm67_vm0, %v2863_v11, -inf }
0x18c3   :  { %6463 = vmatprep.mubr.msk.f32.mxu1 %vm67_vm0, %v4535_v7  ;;  %v4534_v38 = vmul.f32 %v4521_v16, %v8257_v62  ;;  %v4523_v52 = vmul.f32 %v4521_v16, %v8215_v1  ;;  %v2857_v62 = vpop.permute.xlu1 %2856  ;;  %v2862_v1 = vadd.f32 %v2846_v20, %v7833_v45 }
0x18c4   :  { %v2864_v37 = vadd.f32 %v2857_v62, %v7833_v45 }
0x18c5   :  { %v4536_v27 = vadd.f32 %v4534_v38, %v4532_v0  ;;  %v4525_v30 = vadd.f32 %v4523_v52, %v4519_v25  ;;  %v2861_v43 = vpop.permute.xlu0 %2860  ;;  %v2866_v59 = vsel %vm67_vm0, %v2862_v1, -inf }
0x18c6   :  { %v2865_v51 = vadd.f32 %v2861_v43, %v7831_v54  ;;  %v2868_v40 = vmax.f32 %v2866_v59, %v2867_v21 }
0x18c7   :  { %6464 = vmatmul.mubr.msk.f32.vlgmr.msra.gmra.mrb[38].mxu1 %vm67_vm0, %v4536_v27 }
0x18c8   :  { %6839 = vmatpush3.bf16.msra.mxu1 %v6836_v50  ;;  %6474 = vmatprep.mubr.msk.f32.mxu1 %vm67_vm0, %v4524_v3  ;;  %v2875_v50 = vsel %vm67_vm0, %v2864_v37, -inf  ;;  %v2876_v61 = vsel %vm67_vm0, %v2865_v51, -inf  ;;  %v2869_v15 = vrot.slane %v2868_v40, 4 }
0x18c9   :  { %6841 = vmatprep.subr.bf16.mxu1 %v6840_v39  ;;  %v2877_v33 = vmax.f32 %v2875_v50, %v2876_v61 }
0x18ca   :  { %v2870_v22 = vmax.f32 %v2868_v40, %v2869_v15 }
0x18cb   :  { %v2878_v13 = vrot.slane %v2877_v33, 4 }
0x18cc   :  { %6843 = vmatpush3.bf16.msra.mxu1 %v6840_v39  ;;  %v2871_v31 = vrot.slane %v2870_v22, 2 }
0x18cd   :  { %6859 = vmatprep.subr.bf16.mxu1 %v7055_v8  ;;  %v2879_v28 = vmax.f32 %v2877_v33, %v2878_v13 }
0x18ce   :  { %v2872_v5 = vmax.f32 %v2870_v22, %v2871_v31 }
0x18cf   :  { %6475 = vmatmul.mubr.msk.f32.vlgmr.msra.gmra.mrb[38].mxu1 %vm67_vm0, %v4525_v30  ;;  %v2880_v57 = vrot.slane %v2879_v28, 2 }
0x18d0   :  { %6514 = vmatprep.mubr.msk.f32.mxu1 %vm7056_vm1, %v7057_v9  ;;  %v2873_v24 = vrot.slane %v2872_v5, 1 }
0x18d1   :  { %v2881_v6 = vmax.f32 %v2879_v28, %v2880_v57  ;;  %v5784_v28 = vld [vmem:[%s8482_s3 + $0x3c0] sm:$0xff] }
0x18d2   :  { %v2874_v27 = vmax.f32 %v2872_v5, %v2873_v24 }
0x18d3   :  { %v2882_v60 = vrot.slane %v2881_v6, 1 }
0x18d5   :  { %v2883_v39 = vmax.f32 %v2881_v6, %v2882_v60  ;;  %v5780_v60 = vld [vmem:[%s8482_s3 + $0x380] sm:$0xff] }
0x19a2   :  { %v6476_v34 = vpop.f32.mrb[38].mxu1 }
0x19a3   :  { %v4713_v46 = vadd.f32 %v6476_v34, %v5778_v53  ;;  %v4695_v45 = vpop.f32.mrb[39].mxu1 }
0x19a4   :  { %v4712_v54 = vadd.f32 %v5778_v53, %v4695_v45 }
0x19a5   :  { %vm4715_vm12 = vcmp.gt.f32.partialorder %v4713_v46, 0.0  ;;  %v4717_v10 = vmul.f32 0.01, %v4713_v46 }
0x19a6   :  { %vm4714_vm13 = vcmp.gt.f32.partialorder %v4712_v54, 0.0  ;;  %v4716_v55 = vmul.f32 0.01, %v4712_v54 }
0x19a7   :  { %v4719_v47 = vsel %vm4715_vm12, %v4713_v46, %v4717_v10 }
0x19a8   :  { %v4791_v35 = vadd.f32 %v4719_v47, %v2850_v42  ;;  %v4793_v12 = vadd.f32 %v4719_v47, %v2861_v43  ;;  %v4718_v36 = vsel %vm4714_vm13, %v4712_v54, %v4716_v55 }
0x19a9   :  { %v6845_v14 = vpack.c.bf16 %v4719_v47, %v4718_v36  ;;  %v4790_v32 = vadd.f32 %v4718_v36, %v2846_v20  ;;  %v4792_v48 = vadd.f32 %v4718_v36, %v2857_v62  ;;  %v5796_v36 = vld [vmem:[%s8482_s3 + $0x3e0] sm:$0xff] }
0x19aa   :  { %v4795_v4 = vsel %vm67_vm0, %v4791_v35, -inf  ;;  %v4804_v18 = vsel %vm67_vm0, %v4793_v12, -inf  ;;  %v5785_v35 = vld [vmem:[%s8482_s3 + $0x3c8] sm:$0xff] }
0x19ab   :  { %v4794_v44 = vsel %vm67_vm0, %v4790_v32, -inf  ;;  %v4803_v49 = vsel %vm67_vm0, %v4792_v48, -inf  ;;  %6846 = vmatpush3.bf16.msra.mxu0 %v6845_v14  ;;  %v6848_v12 = vpack.c.bf16 %v5785_v35, %v5784_v28  ;;  %v5797_v14 = vld [vmem:[%s8482_s3 + $0x3e8] sm:$0xff]  ;;  %v5786_v48 = vld [vmem:[%s8482_s3 + $0x3d0] sm:$0xff] }
0x19ac   :  { %v4796_v56 = vmax.f32 %v4794_v44, %v4795_v4  ;;  %v4805_v63 = vmax.f32 %v4803_v49, %v4804_v18  ;;  %6847 = vmatprep.subr.bf16.mxu0 %v7055_v8  ;;  %v6860_v32 = vpack.c.bf16 %v5797_v14, %v5796_v36  ;;  %v5787_v4 = vld [vmem:[%s8482_s3 + $0x3d8] sm:$0xff]  ;;  %v5798_v44 = vld [vmem:[%s8482_s3 + $0x3f0] sm:$0xff] }
0x19ad   :  { %v6851_v18 = vpack.c.bf16 %v5787_v4, %v5786_v48  ;;  %v5799_v49 = vld [vmem:[%s8482_s3 + $0x3f8] sm:$0xff]  ;;  %v5803_v35 = vld [vmem:[%s8483_s4 + $0x36] ss:$0 sm:$0xff]  ;;  %v5816_v4 = vld [vmem:[%s8482_s3 + $0x440] sm:$0xff] }
0x19ae   :  { %v4797_v2 = vrot.slane %v4796_v56, 4  ;;  %v4806_v17 = vrot.slane %v4805_v63, 4  ;;  %6482 = vmatmul.mubr.msk.f32.vlgmr.msra.gmra.mrb[36].mxu0 %vm298_vm5, %v7030_v58  ;;  %6861 = vmatpush3.bf16.msra.mxu1 %v6860_v32  ;;  %v6863_v31 = vpack.c.bf16 %v5799_v49, %v5798_v44  ;;  %v5818_v49 = vld [vmem:[%s8482_s3 + $0x450] sm:$0xff] }
0x19af   :  { %6492 = vmatprep.mubr.msk.f32.mxu0 %vm7056_vm1, %v7057_v9  ;;  %6849 = vmatpush3.bf16.msra.mxu0 %v6848_v12 }
0x19b0   :  { %v4798_v19 = vmax.f32 %v4796_v56, %v4797_v2  ;;  %v4807_v23 = vmax.f32 %v4805_v63, %v4806_v17  ;;  %6850 = vmatprep.subr.bf16.mxu0 %v7055_v8  ;;  %6862 = vmatprep.subr.bf16.mxu1 %v7055_v8 }
0x19b2   :  { %v4799_v7 = vrot.slane %v4798_v19, 2  ;;  %v4808_v16 = vrot.slane %v4807_v23, 2  ;;  %6864 = vmatpush3.bf16.msra.mxu1 %v6863_v31 }
0x19b3   :  { %6852 = vmatpush3.bf16.msra.mxu0 %v6851_v18  ;;  %6871 = vmatprep.subr.bf16.mxu1 %v7055_v8  ;;  %v5817_v18 = vld [vmem:[%s8482_s3 + $0x448] sm:$0xff] }
0x19b4   :  { %v4800_v29 = vmax.f32 %v4798_v19, %v4799_v7  ;;  %v4809_v0 = vmax.f32 %v4807_v23, %v4808_v16  ;;  %6853 = vmatprep.subr.bf16.mxu0 %v7055_v8  ;;  %v6884_v44 = vpack.c.bf16 %v5817_v18, %v5816_v4 }
0x19b6   :  { %v4801_v38 = vrot.slane %v4800_v29, 1  ;;  %v4810_v41 = vrot.slane %v4809_v0, 1 }
0x19b8   :  { %v4802_v3 = vmax.f32 %v4800_v29, %v4801_v38  ;;  %v4811_v52 = vmax.f32 %v4809_v0, %v4810_v41  ;;  %v5781_v29 = vld [vmem:[%s8482_s3 + $0x388] sm:$0xff] }
0x19b9   :  { %v6854_v38 = vpack.c.bf16 %v5781_v29, %v5780_v60 }
0x19ba   :  { %v4812_v25 = vmax.f32 %v2874_v27, %v4802_v3  ;;  %v4813_v30 = vmax.f32 %v2883_v39, %v4811_v52 }
0x19bc   :  { %v4814_v42 = vsub.f32 %v2874_v27, %v4812_v25  ;;  %v4815_v20 = vsub.f32 %v2883_v39, %v4813_v30  ;;  %v4820_v62 = vsub.f32 %v4802_v3, %v4812_v25  ;;  %v4821_v43 = vsub.f32 %v4811_v52, %v4813_v30  ;;  %v5794_v30 = vld [vmem:[%s8482_s3 + $0x3b0] sm:$0xff] }
0x19be   :  { %v4816_v11 = vmul.f32 1.442695, %v4814_v42  ;;  %v4818_v37 = vmul.f32 1.442695, %v4815_v20  ;;  %v4822_v1 = vmul.f32 1.442695, %v4820_v62 }
0x19bf   :  { %v4824_v51 = vmul.f32 1.442695, %v4821_v43  ;;  %v5795_v42 = vld [vmem:[%s8482_s3 + $0x3b8] sm:$0xff]  ;;  %v5804_v62 = vld [vmem:[%s8482_s3 + $0x400] sm:$0xff]  ;;  %v5805_v43 = vld [vmem:[%s8482_s3 + $0x408] sm:$0xff] }
0x19c0   :  { %7002 = vpow2.f32 %v4816_v11  ;;  %v6869_v20 = vpack.c.bf16 %v5795_v42, %v5794_v30  ;;  %v6878_v11 = vpack.c.bf16 %v5805_v43, %v5804_v62 }
0x19c1   :  { %7004 = vpow2.f32 %v4818_v37  ;;  %v5806_v37 = vld [vmem:[%s8482_s3 + $0x410] sm:$0xff] }
0x19c2   :  { %7006 = vpow2.f32 %v4822_v1  ;;  %v5807_v1 = vld [vmem:[%s8482_s3 + $0x418] sm:$0xff] }
0x19c3   :  { %7008 = vpow2.f32 %v4824_v51  ;;  %v6881_v51 = vpack.c.bf16 %v5807_v1, %v5806_v37 }
0x19ca   :  { %v7003_v21 = vpop.eup %7002 }
0x19cb   :  { %v7005_v50 = vpop.eup %7004  ;;  %v4828_v53 = vmul.f32 %v7003_v21, %v2874_v27  ;;  %v5782_v27 = vld [vmem:[%s8482_s3 + $0x390] sm:$0xff] }
0x19cc   :  { %v7007_v59 = vpop.eup %7006  ;;  %v4829_v15 = vmul.f32 %v7005_v50, %v2883_v39 }
0x19cd   :  { %v7009_v61 = vpop.eup %7008  ;;  %v4826_v40 = vadd.f32 %v7007_v59, %v7003_v21  ;;  %v4830_v34 = vmul.f32 %v7007_v59, %v4802_v3  ;;  %v5792_v3 = vld [vmem:[%s8482_s3 + $0x3a0] sm:$0xff] }
0x19ce   :  { %v4827_v33 = vadd.f32 %v7009_v61, %v7005_v50  ;;  %v4831_v46 = vmul.f32 %v7009_v61, %v4811_v52  ;;  %v5793_v52 = vld [vmem:[%s8482_s3 + $0x3a8] sm:$0xff]  ;;  %v5808_v21 = vld [vmem:[%s8482_s3 + $0x420] sm:$0xff]  ;;  %v5810_v61 = vld [vmem:[%s8482_s3 + $0x430] sm:$0xff] }
0x19cf   :  { %7010 = vrcp.f32 %v4826_v40  ;;  %v4832_v45 = vadd.f32 %v4830_v34, %v4828_v53  ;;  %v6866_v25 = vpack.c.bf16 %v5793_v52, %v5792_v3  ;;  %v5809_v50 = vld [vmem:[%s8482_s3 + $0x428] sm:$0xff]  ;;  %v5811_v40 = vld [vmem:[%s8482_s3 + $0x438] sm:$0xff] }
0x19d0   :  { %7012 = vrcp.f32 %v4827_v33  ;;  %v4833_v54 = vadd.f32 %v4831_v46, %v4829_v15  ;;  %v6872_v59 = vpack.c.bf16 %v5809_v50, %v5808_v21  ;;  %v6875_v33 = vpack.c.bf16 %v5811_v40, %v5810_v61 }
0x19d9   :  { %v7011_v13 = vpop.eup %7010 }
0x19da   :  { %v7013_v10 = vpop.eup %7012  ;;  %v4836_v55 = vmul.f32 %v7011_v13, %v4832_v45  ;;  %v5791_v13 = vld [vmem:[%s8483_s4 + $0x35] ss:$0 sm:$0xff] }
0x19db   :  { %v4837_v22 = vmul.f32 %v7013_v10, %v4833_v54 }
0x19dd   :  { %v8335_v47 = vsel %vm4936_vm14, %v4837_v22, %v4836_v55 }
0x1a81   :  { %v4786_v57 = vpop.f32.mrb[36].mxu0 }
0x1a82   :  { %v4838_v56 = vmax.f32 %v7902_v26, %v4786_v57  ;;  %v6483_v63 = vpop.f32.mrb[37].mxu0 }
0x1a84   :  { %v4839_v2 = vsub.f32 %v7902_v26, %v4838_v56  ;;  %v4842_v17 = vsub.f32 %v4786_v57, %v4838_v56 }
0x1a86   :  { %v4840_v58 = vmul.f32 1.442695, %v4839_v2  ;;  %v4843_v5 = vmul.f32 1.442695, %v4842_v17  ;;  %v5815_v2 = vld [vmem:[%s8483_s4 + $0x37] ss:$0 sm:$0xff] }
0x1a88   :  { %7014 = vpow2.f32 %v4840_v58 }
0x1a89   :  { %7016 = vpow2.f32 %v4843_v5 }
0x1a92   :  { %v7015_v6 = vpop.eup %7014 }
0x1a93   :  { %v7017_v19 = vpop.eup %7016  ;;  %v4846_v23 = vmul.f32 %v7015_v6, %v7902_v26  ;;  %v5783_v26 = vld [vmem:[%s8482_s3 + $0x398] sm:$0xff] }
0x1a94   :  { %v4845_v7 = vadd.f32 %v7017_v19, %v7015_v6  ;;  %v4847_v16 = vmul.f32 %v7017_v19, %v4786_v57  ;;  %v6857_v39 = vpack.c.bf16 %v5783_v26, %v5782_v27  ;;  %v5821_v19 = vld [vmem:[%s8483_s4 + $0x38] ss:$0 sm:$0xff] }
0x1a96   :  { %v4848_v24 = vadd.f32 %v4847_v16, %v4846_v23  ;;  %7018 = vrcp.f32 %v4845_v7 }
0x1aa0   :  { %v7019_v0 = vpop.eup %7018 }
0x1aa1   :  { %v4850_v41 = vmul.f32 %v7019_v0, %v4848_v24 }
0x1aa3   :  { %6493 = vmatmul.mubr.msk.f32.vlgmr.msra.gmra.mrb[38].mxu0 %vm67_vm0, %v4850_v41  ;;  %6515 = vmatmul.mubr.msk.f32.vlgmr.msra.gmra.mrb[40].mxu1 %vm67_vm0, %v4850_v41 }
0x1aa4   :  { %6855 = vmatpush3.bf16.msra.mxu0 %v6854_v38  ;;  %6503 = vmatprep.mubr.msk.f32.mxu0 %vm7056_vm1, %v7057_v9 }
0x1aa5   :  { %6856 = vmatprep.subr.bf16.mxu0 %v7055_v8  ;;  %6536 = vmatprep.mubr.msk.f32.mxu1 %vm7056_vm1, %v7057_v9 }
0x1aa6   :  { %6873 = vmatpush3.bf16.msra.mxu1 %v6872_v59 }
0x1aa7   :  { %6874 = vmatprep.subr.bf16.mxu1 %v7055_v8 }
0x1aa8   :  { %6858 = vmatpush3.bf16.msra.mxu0 %v6857_v39 }
0x1aa9   :  { %6865 = vmatprep.subr.bf16.mxu0 %v7055_v8 }
0x1aaa   :  { %6876 = vmatpush3.bf16.msra.mxu1 %v6875_v33 }
0x1aab   :  { %6504 = vmatmul.mubr.msk.f32.vlgmr.msra.gmra.mrb[40].mxu0 %vm67_vm0, %v8335_v47  ;;  %6883 = vmatprep.subr.bf16.mxu1 %v7055_v8 }
0x1aac   :  { %6867 = vmatpush3.bf16.msra.mxu0 %v6866_v25  ;;  %6525 = vmatprep.mubr.msk.f32.mxu0 %vm7056_vm1, %v7057_v9 }
0x1aad   :  { %6868 = vmatprep.subr.bf16.mxu0 %v7055_v8 }
0x1ab0   :  { %6870 = vmatpush3.bf16.msra.mxu0 %v6869_v20 }
0x1ab1   :  { %6877 = vmatprep.subr.bf16.mxu0 %v7055_v8 }
0x1ab3   :  { %6526 = vmatmul.mubr.msk.f32.vlgmr.msra.gmra.mrb[42].mxu0 %vm67_vm0, %v8335_v47 }
0x1ab4   :  { %6547 = vmatprep.mubr.msk.f32.mxu0 %vm7056_vm1, %v7057_v9  ;;  %6879 = vmatpush3.bf16.msra.mxu0 %v6878_v11 }
0x1ab5   :  { %6880 = vmatprep.subr.bf16.mxu0 %v7055_v8 }
0x1ab8   :  { %6882 = vmatpush3.bf16.msra.mxu0 %v6881_v51 }
0x1b76   :  { %v4930_v53 = vpop.f32.mrb[38].mxu0  ;;  %v5098_v34 = vpop.f32.mrb[40].mxu1 }
0x1b77   :  { %v6494_v15 = vpop.f32.mrb[39].mxu0  ;;  %v6516_v46 = vpop.f32.mrb[41].mxu1 }
0x1b7e   :  { %v5006_v45 = vpop.f32.mrb[40].mxu0 }
0x1b7f   :  { %v5007_v54 = vadd.f32 %v5006_v45, %v4930_v53  ;;  %v6505_v10 = vpop.f32.mrb[41].mxu0 }
0x1b81   :  { %v5018_v55 = vadd.f32 %v5791_v13, %v5007_v54 }
0x1b83   :  { %vm5019_vm15 = vcmp.gt.f32.partialorder %v5018_v55, 0.0  ;;  %v5020_v22 = vmul.f32 0.01, %v5018_v55 }
0x1b85   :  { %v5021_v47 = vsel %vm5019_vm15, %v5018_v55, %v5020_v22 }
0x1b86   :  { %v5168_v28 = vpop.f32.mrb[42].mxu0  ;;  %6548 = vmatmul.mubr.msk.f32.vlgmr.msra.gmra.mrb[44].mxu0 %vm67_vm0, %v5021_v47 }
0x1b87   :  { %v5169_v12 = vadd.f32 %v5168_v28, %v5098_v34  ;;  %v6527_v36 = vpop.f32.mrb[43].mxu0 }
0x1b89   :  { %v5180_v14 = vadd.f32 %v5803_v35, %v5169_v12 }
0x1b8b   :  { %vm5181_vm2 = vcmp.gt.f32.partialorder %v5180_v14, 0.0  ;;  %v5182_v32 = vmul.f32 0.01, %v5180_v14 }
0x1b8d   :  { %v5183_v48 = vsel %vm5181_vm2, %v5180_v14, %v5182_v32 }
0x1b8e   :  { %6537 = vmatmul.mubr.msk.f32.vlgmr.msra.gmra.mrb[42].mxu1 %vm67_vm0, %v5183_v48 }
0x1b8f   :  { %6558 = vmatprep.mubr.msk.f32.mxu1 %vm7056_vm1, %v7057_v9  ;;  %6885 = vmatpush3.bf16.msra.mxu1 %v6884_v44  ;;  %v5819_v9 = vld [vmem:[%s8482_s3 + $0x458] sm:$0xff]  ;;  %s7062_s3 = smov [#allocation2]  }
0x1b90   :  { %6886 = vmatprep.subr.bf16.mxu1 %v7055_v8  ;;  %v6887_v31 = vpack.c.bf16 %v5819_v9, %v5818_v49  ;;  %s5446_s0 = sshll.u32 %s7062_s3, 4  ;;  %s5447_s0 = int_to_ptr.vmem [resolvable:$true] %s5446_s0 }
0x1b91   :  { %s7031_s7 = scalar_lea.vmem %s5447_s0, 32  ;;  %p7036_p1 = scmp.lt.s32.totalorder %s5447_s0, %s5447_s0 }
0x1b92   :  { %p7032_p0 = scmp.ne.s32.totalorder %s5447_s0, %s7031_s7  ;;  %p7037_p2 = scmp.lt.s32.totalorder %s7031_s7, %s7031_s7 }
0x1b93   :  { %6888 = vmatpush3.bf16.msra.mxu1 %v6887_v31 }
0x1b94   :  { %p7038_p3 = por %p7037_p2, %p7036_p1 }
0x1b96   :  { %p7039_p4 = pnand %p7038_p3, %p7032_p0 }
0x1c59   :  { %v5336_v57 = vpop.f32.mrb[44].mxu0 }
0x1c5a   :  { %v6549_v56 = vpop.f32.mrb[45].mxu0 }
0x1c61   :  { %v5263_v63 = vpop.f32.mrb[42].mxu1 }
0x1c62   :  { %v5337_v17 = vadd.f32 %v5336_v57, %v5263_v63  ;;  %v6538_v58 = vpop.f32.mrb[43].mxu1 }
0x1c64   :  { %v5348_v8 = vadd.f32 %v5815_v2, %v5337_v17 }
0x1c66   :  { %vm5349_vm1 = vcmp.gt.f32.partialorder %v5348_v8, 0.0  ;;  %v5350_v5 = vmul.f32 0.01, %v5348_v8 }
0x1c68   :  { %v5351_v6 = vsel %vm5349_vm1, %v5348_v8, %v5350_v5 }
0x1c69   :  { %6559 = vmatmul.mubr.msk.f32.vlgmr.msra.gmra.mrb[44].mxu1 %vm67_vm0, %v5351_v6 }
0x1d3c   :  { %v5434_v23 = vpop.f32.mrb[44].mxu1 }
0x1d3d   :  { %v5435_v7 = vadd.f32 %v5821_v19, %v5434_v23  ;;  %v6560_v16 = vpop.f32.mrb[45].mxu1 }
0x1d3f   :  { %5439 = vst.msk [vmem:[#allocation2] sm:$0x3] %vm5438_vm3, %v5435_v7 }
0x1d40   :  { %7042 = shalt.err (!%p7039_p4)
}
0x1d41   :  { %s7043_s1 = scalar_lea.hbm %s8484_s5, 32 }
0x1d42   :  { %p7044_p5 = scmp.ne.s32.totalorder %s8484_s5, %s7043_s1  ;;  %p7047_p6 = scmp.lt.u32.totalorder %s7043_s1, %s8484_s5 }
0x1d44   :  { %p7049_p7 = pnand %p7047_p6, %p7044_p5 }
0x1d46   :  { %7052 = shalt.err (!%p7049_p7)
}
0x1d47   :  { %5449 = dma.vmem_to_hbm [thread:$0]  %s5447_s0, 32, %s8484_s5, [#allocation3]  }
0x1d48   :  { %7053 = dma.done.wait [#allocation3], 32  }
0x1d49   :  { %7054 = vsyncadd [#allocation3], 4294967264 }
0x1d4a   :  { %5453 = vsyncpa [#allocation3], 1 }

</bundles_post_ra>
